<compile_context>
chip_gen: v6e
topology: v6e:2x2x1
jax: 0.10.0
libtpu: 0.0.40
codegen_flags: <defaults>
</compile_context>

<pallas_src>
import math
import numpy as np
import jax
import jax.numpy as jnp
from jax import lax
from jax.experimental import pallas as pl
from jax.experimental.pallas import tpu as pltpu

C = 3  # in/out channels fixed by the module
K = 3  # kernel size


def _make_kernel(TB, H, W):
    HP, WP = H + 2, W + 2  # extended conv1 grid == padded conv2 input frame

    def kernel(x_ref, w1_ref, b1_ref, w2_ref, b2_ref, o_ref):
        # x_ref : (TB, C, H+4, W+4)  input padded by 2 (zeros) in VMEM
        # w*_ref: (C*C*K*K,)         flat weights in SMEM, order [co, ci, kh, kw]
        # b*_ref: (C,)               biases in SMEM
        # o_ref : (TB, C, H, W)      output block in VMEM
        xp = x_ref[...]  # whole padded block as a register-resident value

        # ---- conv1 + bias, evaluated on the extended (H+2, W+2) grid --------
        # Extended output index e corresponds to original row e-1; the outer
        # ring (e == 0 or e == H+1) is garbage and is zeroed below so the
        # intermediate behaves exactly like conv2's padding=1 zeros.
        acc1 = [jnp.zeros((TB, HP, WP), jnp.float32) + b1_ref[co]
                for co in range(C)]
        for ci in range(C):
            for kh in range(K):
                for kw in range(K):
                    sl = xp[:, ci, kh:kh + HP, kw:kw + WP]  # shared across co
                    for co in range(C):
                        wv = w1_ref[((co * C + ci) * K + kh) * K + kw]
                        acc1[co] = acc1[co] + sl * wv

        # relu + zero the 1-pixel ring (masked border select, no VMEM traffic)
        row = lax.broadcasted_iota(jnp.int32, (TB, HP, WP), 1)
        col = lax.broadcasted_iota(jnp.int32, (TB, HP, WP), 2)
        interior = (row >= 1) & (row <= H) & (col >= 1) & (col <= W)
        y1 = [jnp.where(interior, jnp.maximum(a, 0.0), 0.0) for a in acc1]

        # ---- conv2 + bias on the (H, W) interior + relu + residual ----------
        acc2 = [jnp.zeros((TB, H, W), jnp.float32) + b2_ref[co]
                for co in range(C)]
        for ci in range(C):
            y1c = y1[ci]
            for kh in range(K):
                for kw in range(K):
                    sl = y1c[:, kh:kh + H, kw:kw + W]       # shared across co
                    for co in range(C):
                        wv = w2_ref[((co * C + ci) * K + kh) * K + kw]
                        acc2[co] = acc2[co] + sl * wv

        for co in range(C):
            res = xp[:, co, 2:2 + H, 2:2 + W]               # original x
            o_ref[:, co, :, :] = jnp.maximum(acc2[co], 0.0) + res

    return kernel


def simple_residual_block(x, w1, b1, w2, b2, block_batch=None):
    """x: (N, C, H, W) float32; w1/w2: (C, C, 3, 3) OIHW; b1/b2: (C,)."""
    N, Cin, H, W = x.shape
    assert Cin == C

    # Fold batch into the block to amortize per-grid-step overhead, but keep
    # >= 2 grid steps so both TensorCores are used on v7x.
    if block_batch is None:
        block_batch = max(1, N // 2)
        while N % block_batch:
            block_batch -= 1
    TB = block_batch
    grid = (N // TB,)

    # Pad by 2 so conv1 can be evaluated on the extended (H+2, W+2) grid
    # entirely in registers (see kernel header comment).
    xp = jnp.pad(x, ((0, 0), (0, 0), (2, 2), (2, 2)))

    smem = pl.BlockSpec(memory_space=pltpu.MemorySpace.SMEM)
    return pl.pallas_call(
        _make_kernel(TB, H, W),
        out_shape=jax.ShapeDtypeStruct((N, C, H, W), jnp.float32),
        grid=grid,
        in_specs=[
            pl.BlockSpec((TB, C, H + 4, W + 4), lambda n: (n, 0, 0, 0)),
            smem,  # w1 (flattened)
            smem,  # b1
            smem,  # w2 (flattened)
            smem,  # b2
        ],
        out_specs=pl.BlockSpec((TB, C, H, W), lambda n: (n, 0, 0, 0)),
        compiler_params=pltpu.CompilerParams(dimension_semantics=("parallel",)),
    )(xp, w1.reshape(-1), b1, w2.reshape(-1), b2)


def reference(x, w1, b1, w2, b2):
    """Pure-JAX reference matching the PyTorch forward."""
    dn = lax.conv_dimension_numbers(x.shape, w1.shape, ("NCHW", "OIHW", "NCHW"))

    def conv(inp, w, b):
        y = lax.conv_general_dilated(inp, w, (1, 1), ((1, 1), (1, 1)),
                                     dimension_numbers=dn)
        return y + b[None, :, None, None]

    out = jax.nn.relu(conv(x, w1, b1))
    out = conv(out, w2, b2)
    return jax.nn.relu(out) + x


if __name__ == "__main__":
    N, H, W = 2, 16, 16
    key = jax.random.PRNGKey(0)
    kx, kw1, kb1, kw2, kb2 = jax.random.split(key, 5)

    # Deterministic PyTorch-style uniform(-1/sqrt(fan_in), +) init.
    bound = 1.0 / math.sqrt(C * K * K)
    w1 = jax.random.uniform(kw1, (C, C, K, K), jnp.float32, -bound, bound)
    b1 = jax.random.uniform(kb1, (C,), jnp.float32, -bound, bound)
    w2 = jax.random.uniform(kw2, (C, C, K, K), jnp.float32, -bound, bound)
    b2 = jax.random.uniform(kb2, (C,), jnp.float32, -bound, bound)

    x = jax.random.normal(kx, (N, C, H, W), jnp.float32)

    out = simple_residual_block(x, w1, b1, w2, b2)
    out = jax.block_until_ready(out)

    ref = jax.block_until_ready(reference(x, w1, b1, w2, b2))
    assert out.shape == (N, C, H, W)
    np.testing.assert_allclose(np.asarray(out), np.asarray(ref),
                               atol=1e-4, rtol=1e-4)

    print("KERNEL_OK")
</pallas_src>

<mosaic_0001>
module attributes {stable_mosaic.version = 11 : i64} {
  func.func @kernel(%arg0: i32, %arg1: memref<1x3x20x20xf32, #tpu.memory_space<vmem>>, %arg2: memref<81xf32, #tpu.memory_space<smem>>, %arg3: memref<3xf32, #tpu.memory_space<smem>>, %arg4: memref<81xf32, #tpu.memory_space<smem>>, %arg5: memref<3xf32, #tpu.memory_space<smem>>, %arg6: memref<1x3x16x16xf32, #tpu.memory_space<vmem>>) attributes {dimension_semantics = [#tpu.dimension_semantics<parallel>], iteration_bounds = array<i64: 2>, scalar_prefetch = 0 : i64, scratch_operands = 0 : i64, tpu.core_type = #tpu.core_type<tc>, window_params = [{transform_indices = @transform_0, window_bounds = array<i64: 1, 3, 20, 20>}, {transform_indices = @transform_1, window_bounds = array<i64: 81>}, {transform_indices = @transform_2, window_bounds = array<i64: 3>}, {transform_indices = @transform_3, window_bounds = array<i64: 81>}, {transform_indices = @transform_4, window_bounds = array<i64: 3>}, {transform_indices = @transform_5, window_bounds = array<i64: 1, 3, 16, 16>}]} {
    %c0 = arith.constant 0 : index
    %c0_0 = arith.constant 0 : index
    %c0_1 = arith.constant 0 : index
    %c0_2 = arith.constant 0 : index
    %0 = vector.load %arg1[%c0, %c0_0, %c0_1, %c0_2] : memref<1x3x20x20xf32, #tpu.memory_space<vmem>>, vector<1x3x20x20xf32>
    %cst = arith.constant 0.000000e+00 : f32
    %1 = vector.broadcast %cst : f32 to vector<1x18x18xf32>
    %c0_3 = arith.constant 0 : index
    %2 = memref.load %arg3[%c0_3] : memref<3xf32, #tpu.memory_space<smem>>
    %3 = vector.broadcast %2 : f32 to vector<1x18x18xf32>
    %4 = arith.addf %1, %3 : vector<1x18x18xf32>
    %cst_4 = arith.constant 0.000000e+00 : f32
    %5 = vector.broadcast %cst_4 : f32 to vector<1x18x18xf32>
    %c1 = arith.constant 1 : index
    %6 = memref.load %arg3[%c1] : memref<3xf32, #tpu.memory_space<smem>>
    %7 = vector.broadcast %6 : f32 to vector<1x18x18xf32>
    %8 = arith.addf %5, %7 : vector<1x18x18xf32>
    %cst_5 = arith.constant 0.000000e+00 : f32
    %9 = vector.broadcast %cst_5 : f32 to vector<1x18x18xf32>
    %c2 = arith.constant 2 : index
    %10 = memref.load %arg3[%c2] : memref<3xf32, #tpu.memory_space<smem>>
    %11 = vector.broadcast %10 : f32 to vector<1x18x18xf32>
    %12 = arith.addf %9, %11 : vector<1x18x18xf32>
    %13 = vector.extract_strided_slice %0 {offsets = [0, 0, 0, 0], sizes = [1, 1, 18, 18], strides = [1, 1, 1, 1]} : vector<1x3x20x20xf32> to vector<1x1x18x18xf32>
    %14 = vector.shape_cast %13 : vector<1x1x18x18xf32> to vector<1x18x18xf32>
    %c0_6 = arith.constant 0 : index
    %15 = memref.load %arg2[%c0_6] : memref<81xf32, #tpu.memory_space<smem>>
    %16 = vector.broadcast %15 : f32 to vector<1x18x18xf32>
    %17 = arith.mulf %14, %16 : vector<1x18x18xf32>
    %18 = arith.addf %4, %17 : vector<1x18x18xf32>
    %c27 = arith.constant 27 : index
    %19 = memref.load %arg2[%c27] : memref<81xf32, #tpu.memory_space<smem>>
    %20 = vector.broadcast %19 : f32 to vector<1x18x18xf32>
    %21 = arith.mulf %14, %20 : vector<1x18x18xf32>
    %22 = arith.addf %8, %21 : vector<1x18x18xf32>
    %c54 = arith.constant 54 : index
    %23 = memref.load %arg2[%c54] : memref<81xf32, #tpu.memory_space<smem>>
    %24 = vector.broadcast %23 : f32 to vector<1x18x18xf32>
    %25 = arith.mulf %14, %24 : vector<1x18x18xf32>
    %26 = arith.addf %12, %25 : vector<1x18x18xf32>
    %27 = vector.extract_strided_slice %0 {offsets = [0, 0, 0, 1], sizes = [1, 1, 18, 18], strides = [1, 1, 1, 1]} : vector<1x3x20x20xf32> to vector<1x1x18x18xf32>
    %28 = vector.shape_cast %27 : vector<1x1x18x18xf32> to vector<1x18x18xf32>
    %c1_7 = arith.constant 1 : index
    %29 = memref.load %arg2[%c1_7] : memref<81xf32, #tpu.memory_space<smem>>
    %30 = vector.broadcast %29 : f32 to vector<1x18x18xf32>
    %31 = arith.mulf %28, %30 : vector<1x18x18xf32>
    %32 = arith.addf %18, %31 : vector<1x18x18xf32>
    %c28 = arith.constant 28 : index
    %33 = memref.load %arg2[%c28] : memref<81xf32, #tpu.memory_space<smem>>
    %34 = vector.broadcast %33 : f32 to vector<1x18x18xf32>
    %35 = arith.mulf %28, %34 : vector<1x18x18xf32>
    %36 = arith.addf %22, %35 : vector<1x18x18xf32>
    %c55 = arith.constant 55 : index
    %37 = memref.load %arg2[%c55] : memref<81xf32, #tpu.memory_space<smem>>
    %38 = vector.broadcast %37 : f32 to vector<1x18x18xf32>
    %39 = arith.mulf %28, %38 : vector<1x18x18xf32>
    %40 = arith.addf %26, %39 : vector<1x18x18xf32>
    %41 = vector.extract_strided_slice %0 {offsets = [0, 0, 0, 2], sizes = [1, 1, 18, 18], strides = [1, 1, 1, 1]} : vector<1x3x20x20xf32> to vector<1x1x18x18xf32>
    %42 = vector.shape_cast %41 : vector<1x1x18x18xf32> to vector<1x18x18xf32>
    %c2_8 = arith.constant 2 : index
    %43 = memref.load %arg2[%c2_8] : memref<81xf32, #tpu.memory_space<smem>>
    %44 = vector.broadcast %43 : f32 to vector<1x18x18xf32>
    %45 = arith.mulf %42, %44 : vector<1x18x18xf32>
    %46 = arith.addf %32, %45 : vector<1x18x18xf32>
    %c29 = arith.constant 29 : index
    %47 = memref.load %arg2[%c29] : memref<81xf32, #tpu.memory_space<smem>>
    %48 = vector.broadcast %47 : f32 to vector<1x18x18xf32>
    %49 = arith.mulf %42, %48 : vector<1x18x18xf32>
    %50 = arith.addf %36, %49 : vector<1x18x18xf32>
    %c56 = arith.constant 56 : index
    %51 = memref.load %arg2[%c56] : memref<81xf32, #tpu.memory_space<smem>>
    %52 = vector.broadcast %51 : f32 to vector<1x18x18xf32>
    %53 = arith.mulf %42, %52 : vector<1x18x18xf32>
    %54 = arith.addf %40, %53 : vector<1x18x18xf32>
    %55 = vector.extract_strided_slice %0 {offsets = [0, 0, 1, 0], sizes = [1, 1, 18, 18], strides = [1, 1, 1, 1]} : vector<1x3x20x20xf32> to vector<1x1x18x18xf32>
    %56 = vector.shape_cast %55 : vector<1x1x18x18xf32> to vector<1x18x18xf32>
    %c3 = arith.constant 3 : index
    %57 = memref.load %arg2[%c3] : memref<81xf32, #tpu.memory_space<smem>>
    %58 = vector.broadcast %57 : f32 to vector<1x18x18xf32>
    %59 = arith.mulf %56, %58 : vector<1x18x18xf32>
    %60 = arith.addf %46, %59 : vector<1x18x18xf32>
    %c30 = arith.constant 30 : index
    %61 = memref.load %arg2[%c30] : memref<81xf32, #tpu.memory_space<smem>>
    %62 = vector.broadcast %61 : f32 to vector<1x18x18xf32>
    %63 = arith.mulf %56, %62 : vector<1x18x18xf32>
    %64 = arith.addf %50, %63 : vector<1x18x18xf32>
    %c57 = arith.constant 57 : index
    %65 = memref.load %arg2[%c57] : memref<81xf32, #tpu.memory_space<smem>>
    %66 = vector.broadcast %65 : f32 to vector<1x18x18xf32>
    %67 = arith.mulf %56, %66 : vector<1x18x18xf32>
    %68 = arith.addf %54, %67 : vector<1x18x18xf32>
    %69 = vector.extract_strided_slice %0 {offsets = [0, 0, 1, 1], sizes = [1, 1, 18, 18], strides = [1, 1, 1, 1]} : vector<1x3x20x20xf32> to vector<1x1x18x18xf32>
    %70 = vector.shape_cast %69 : vector<1x1x18x18xf32> to vector<1x18x18xf32>
    %c4 = arith.constant 4 : index
    %71 = memref.load %arg2[%c4] : memref<81xf32, #tpu.memory_space<smem>>
    %72 = vector.broadcast %71 : f32 to vector<1x18x18xf32>
    %73 = arith.mulf %70, %72 : vector<1x18x18xf32>
    %74 = arith.addf %60, %73 : vector<1x18x18xf32>
    %c31 = arith.constant 31 : index
    %75 = memref.load %arg2[%c31] : memref<81xf32, #tpu.memory_space<smem>>
    %76 = vector.broadcast %75 : f32 to vector<1x18x18xf32>
    %77 = arith.mulf %70, %76 : vector<1x18x18xf32>
    %78 = arith.addf %64, %77 : vector<1x18x18xf32>
    %c58 = arith.constant 58 : index
    %79 = memref.load %arg2[%c58] : memref<81xf32, #tpu.memory_space<smem>>
    %80 = vector.broadcast %79 : f32 to vector<1x18x18xf32>
    %81 = arith.mulf %70, %80 : vector<1x18x18xf32>
    %82 = arith.addf %68, %81 : vector<1x18x18xf32>
    %83 = vector.extract_strided_slice %0 {offsets = [0, 0, 1, 2], sizes = [1, 1, 18, 18], strides = [1, 1, 1, 1]} : vector<1x3x20x20xf32> to vector<1x1x18x18xf32>
    %84 = vector.shape_cast %83 : vector<1x1x18x18xf32> to vector<1x18x18xf32>
    %c5 = arith.constant 5 : index
    %85 = memref.load %arg2[%c5] : memref<81xf32, #tpu.memory_space<smem>>
    %86 = vector.broadcast %85 : f32 to vector<1x18x18xf32>
    %87 = arith.mulf %84, %86 : vector<1x18x18xf32>
    %88 = arith.addf %74, %87 : vector<1x18x18xf32>
    %c32 = arith.constant 32 : index
    %89 = memref.load %arg2[%c32] : memref<81xf32, #tpu.memory_space<smem>>
    %90 = vector.broadcast %89 : f32 to vector<1x18x18xf32>
    %91 = arith.mulf %84, %90 : vector<1x18x18xf32>
    %92 = arith.addf %78, %91 : vector<1x18x18xf32>
    %c59 = arith.constant 59 : index
    %93 = memref.load %arg2[%c59] : memref<81xf32, #tpu.memory_space<smem>>
    %94 = vector.broadcast %93 : f32 to vector<1x18x18xf32>
    %95 = arith.mulf %84, %94 : vector<1x18x18xf32>
    %96 = arith.addf %82, %95 : vector<1x18x18xf32>
    %97 = vector.extract_strided_slice %0 {offsets = [0, 0, 2, 0], sizes = [1, 1, 18, 18], strides = [1, 1, 1, 1]} : vector<1x3x20x20xf32> to vector<1x1x18x18xf32>
    %98 = vector.shape_cast %97 : vector<1x1x18x18xf32> to vector<1x18x18xf32>
    %c6 = arith.constant 6 : index
    %99 = memref.load %arg2[%c6] : memref<81xf32, #tpu.memory_space<smem>>
    %100 = vector.broadcast %99 : f32 to vector<1x18x18xf32>
    %101 = arith.mulf %98, %100 : vector<1x18x18xf32>
    %102 = arith.addf %88, %101 : vector<1x18x18xf32>
    %c33 = arith.constant 33 : index
    %103 = memref.load %arg2[%c33] : memref<81xf32, #tpu.memory_space<smem>>
    %104 = vector.broadcast %103 : f32 to vector<1x18x18xf32>
    %105 = arith.mulf %98, %104 : vector<1x18x18xf32>
    %106 = arith.addf %92, %105 : vector<1x18x18xf32>
    %c60 = arith.constant 60 : index
    %107 = memref.load %arg2[%c60] : memref<81xf32, #tpu.memory_space<smem>>
    %108 = vector.broadcast %107 : f32 to vector<1x18x18xf32>
    %109 = arith.mulf %98, %108 : vector<1x18x18xf32>
    %110 = arith.addf %96, %109 : vector<1x18x18xf32>
    %111 = vector.extract_strided_slice %0 {offsets = [0, 0, 2, 1], sizes = [1, 1, 18, 18], strides = [1, 1, 1, 1]} : vector<1x3x20x20xf32> to vector<1x1x18x18xf32>
    %112 = vector.shape_cast %111 : vector<1x1x18x18xf32> to vector<1x18x18xf32>
    %c7 = arith.constant 7 : index
    %113 = memref.load %arg2[%c7] : memref<81xf32, #tpu.memory_space<smem>>
    %114 = vector.broadcast %113 : f32 to vector<1x18x18xf32>
    %115 = arith.mulf %112, %114 : vector<1x18x18xf32>
    %116 = arith.addf %102, %115 : vector<1x18x18xf32>
    %c34 = arith.constant 34 : index
    %117 = memref.load %arg2[%c34] : memref<81xf32, #tpu.memory_space<smem>>
    %118 = vector.broadcast %117 : f32 to vector<1x18x18xf32>
    %119 = arith.mulf %112, %118 : vector<1x18x18xf32>
    %120 = arith.addf %106, %119 : vector<1x18x18xf32>
    %c61 = arith.constant 61 : index
    %121 = memref.load %arg2[%c61] : memref<81xf32, #tpu.memory_space<smem>>
    %122 = vector.broadcast %121 : f32 to vector<1x18x18xf32>
    %123 = arith.mulf %112, %122 : vector<1x18x18xf32>
    %124 = arith.addf %110, %123 : vector<1x18x18xf32>
    %125 = vector.extract_strided_slice %0 {offsets = [0, 0, 2, 2], sizes = [1, 1, 18, 18], strides = [1, 1, 1, 1]} : vector<1x3x20x20xf32> to vector<1x1x18x18xf32>
    %126 = vector.shape_cast %125 : vector<1x1x18x18xf32> to vector<1x18x18xf32>
    %c8 = arith.constant 8 : index
    %127 = memref.load %arg2[%c8] : memref<81xf32, #tpu.memory_space<smem>>
    %128 = vector.broadcast %127 : f32 to vector<1x18x18xf32>
    %129 = arith.mulf %126, %128 : vector<1x18x18xf32>
    %130 = arith.addf %116, %129 : vector<1x18x18xf32>
    %c35 = arith.constant 35 : index
    %131 = memref.load %arg2[%c35] : memref<81xf32, #tpu.memory_space<smem>>
    %132 = vector.broadcast %131 : f32 to vector<1x18x18xf32>
    %133 = arith.mulf %126, %132 : vector<1x18x18xf32>
    %134 = arith.addf %120, %133 : vector<1x18x18xf32>
    %c62 = arith.constant 62 : index
    %135 = memref.load %arg2[%c62] : memref<81xf32, #tpu.memory_space<smem>>
    %136 = vector.broadcast %135 : f32 to vector<1x18x18xf32>
    %137 = arith.mulf %126, %136 : vector<1x18x18xf32>
    %138 = arith.addf %124, %137 : vector<1x18x18xf32>
    %139 = vector.extract_strided_slice %0 {offsets = [0, 1, 0, 0], sizes = [1, 1, 18, 18], strides = [1, 1, 1, 1]} : vector<1x3x20x20xf32> to vector<1x1x18x18xf32>
    %140 = vector.shape_cast %139 : vector<1x1x18x18xf32> to vector<1x18x18xf32>
    %c9 = arith.constant 9 : index
    %141 = memref.load %arg2[%c9] : memref<81xf32, #tpu.memory_space<smem>>
    %142 = vector.broadcast %141 : f32 to vector<1x18x18xf32>
    %143 = arith.mulf %140, %142 : vector<1x18x18xf32>
    %144 = arith.addf %130, %143 : vector<1x18x18xf32>
    %c36 = arith.constant 36 : index
    %145 = memref.load %arg2[%c36] : memref<81xf32, #tpu.memory_space<smem>>
    %146 = vector.broadcast %145 : f32 to vector<1x18x18xf32>
    %147 = arith.mulf %140, %146 : vector<1x18x18xf32>
    %148 = arith.addf %134, %147 : vector<1x18x18xf32>
    %c63 = arith.constant 63 : index
    %149 = memref.load %arg2[%c63] : memref<81xf32, #tpu.memory_space<smem>>
    %150 = vector.broadcast %149 : f32 to vector<1x18x18xf32>
    %151 = arith.mulf %140, %150 : vector<1x18x18xf32>
    %152 = arith.addf %138, %151 : vector<1x18x18xf32>
    %153 = vector.extract_strided_slice %0 {offsets = [0, 1, 0, 1], sizes = [1, 1, 18, 18], strides = [1, 1, 1, 1]} : vector<1x3x20x20xf32> to vector<1x1x18x18xf32>
    %154 = vector.shape_cast %153 : vector<1x1x18x18xf32> to vector<1x18x18xf32>
    %c10 = arith.constant 10 : index
    %155 = memref.load %arg2[%c10] : memref<81xf32, #tpu.memory_space<smem>>
    %156 = vector.broadcast %155 : f32 to vector<1x18x18xf32>
    %157 = arith.mulf %154, %156 : vector<1x18x18xf32>
    %158 = arith.addf %144, %157 : vector<1x18x18xf32>
    %c37 = arith.constant 37 : index
    %159 = memref.load %arg2[%c37] : memref<81xf32, #tpu.memory_space<smem>>
    %160 = vector.broadcast %159 : f32 to vector<1x18x18xf32>
    %161 = arith.mulf %154, %160 : vector<1x18x18xf32>
    %162 = arith.addf %148, %161 : vector<1x18x18xf32>
    %c64 = arith.constant 64 : index
    %163 = memref.load %arg2[%c64] : memref<81xf32, #tpu.memory_space<smem>>
    %164 = vector.broadcast %163 : f32 to vector<1x18x18xf32>
    %165 = arith.mulf %154, %164 : vector<1x18x18xf32>
    %166 = arith.addf %152, %165 : vector<1x18x18xf32>
    %167 = vector.extract_strided_slice %0 {offsets = [0, 1, 0, 2], sizes = [1, 1, 18, 18], strides = [1, 1, 1, 1]} : vector<1x3x20x20xf32> to vector<1x1x18x18xf32>
    %168 = vector.shape_cast %167 : vector<1x1x18x18xf32> to vector<1x18x18xf32>
    %c11 = arith.constant 11 : index
    %169 = memref.load %arg2[%c11] : memref<81xf32, #tpu.memory_space<smem>>
    %170 = vector.broadcast %169 : f32 to vector<1x18x18xf32>
    %171 = arith.mulf %168, %170 : vector<1x18x18xf32>
    %172 = arith.addf %158, %171 : vector<1x18x18xf32>
    %c38 = arith.constant 38 : index
    %173 = memref.load %arg2[%c38] : memref<81xf32, #tpu.memory_space<smem>>
    %174 = vector.broadcast %173 : f32 to vector<1x18x18xf32>
    %175 = arith.mulf %168, %174 : vector<1x18x18xf32>
    %176 = arith.addf %162, %175 : vector<1x18x18xf32>
    %c65 = arith.constant 65 : index
    %177 = memref.load %arg2[%c65] : memref<81xf32, #tpu.memory_space<smem>>
    %178 = vector.broadcast %177 : f32 to vector<1x18x18xf32>
    %179 = arith.mulf %168, %178 : vector<1x18x18xf32>
    %180 = arith.addf %166, %179 : vector<1x18x18xf32>
    %181 = vector.extract_strided_slice %0 {offsets = [0, 1, 1, 0], sizes = [1, 1, 18, 18], strides = [1, 1, 1, 1]} : vector<1x3x20x20xf32> to vector<1x1x18x18xf32>
    %182 = vector.shape_cast %181 : vector<1x1x18x18xf32> to vector<1x18x18xf32>
    %c12 = arith.constant 12 : index
    %183 = memref.load %arg2[%c12] : memref<81xf32, #tpu.memory_space<smem>>
    %184 = vector.broadcast %183 : f32 to vector<1x18x18xf32>
    %185 = arith.mulf %182, %184 : vector<1x18x18xf32>
    %186 = arith.addf %172, %185 : vector<1x18x18xf32>
    %c39 = arith.constant 39 : index
    %187 = memref.load %arg2[%c39] : memref<81xf32, #tpu.memory_space<smem>>
    %188 = vector.broadcast %187 : f32 to vector<1x18x18xf32>
    %189 = arith.mulf %182, %188 : vector<1x18x18xf32>
    %190 = arith.addf %176, %189 : vector<1x18x18xf32>
    %c66 = arith.constant 66 : index
    %191 = memref.load %arg2[%c66] : memref<81xf32, #tpu.memory_space<smem>>
    %192 = vector.broadcast %191 : f32 to vector<1x18x18xf32>
    %193 = arith.mulf %182, %192 : vector<1x18x18xf32>
    %194 = arith.addf %180, %193 : vector<1x18x18xf32>
    %195 = vector.extract_strided_slice %0 {offsets = [0, 1, 1, 1], sizes = [1, 1, 18, 18], strides = [1, 1, 1, 1]} : vector<1x3x20x20xf32> to vector<1x1x18x18xf32>
    %196 = vector.shape_cast %195 : vector<1x1x18x18xf32> to vector<1x18x18xf32>
    %c13 = arith.constant 13 : index
    %197 = memref.load %arg2[%c13] : memref<81xf32, #tpu.memory_space<smem>>
    %198 = vector.broadcast %197 : f32 to vector<1x18x18xf32>
    %199 = arith.mulf %196, %198 : vector<1x18x18xf32>
    %200 = arith.addf %186, %199 : vector<1x18x18xf32>
    %c40 = arith.constant 40 : index
    %201 = memref.load %arg2[%c40] : memref<81xf32, #tpu.memory_space<smem>>
    %202 = vector.broadcast %201 : f32 to vector<1x18x18xf32>
    %203 = arith.mulf %196, %202 : vector<1x18x18xf32>
    %204 = arith.addf %190, %203 : vector<1x18x18xf32>
    %c67 = arith.constant 67 : index
    %205 = memref.load %arg2[%c67] : memref<81xf32, #tpu.memory_space<smem>>
    %206 = vector.broadcast %205 : f32 to vector<1x18x18xf32>
    %207 = arith.mulf %196, %206 : vector<1x18x18xf32>
    %208 = arith.addf %194, %207 : vector<1x18x18xf32>
    %209 = vector.extract_strided_slice %0 {offsets = [0, 1, 1, 2], sizes = [1, 1, 18, 18], strides = [1, 1, 1, 1]} : vector<1x3x20x20xf32> to vector<1x1x18x18xf32>
    %210 = vector.shape_cast %209 : vector<1x1x18x18xf32> to vector<1x18x18xf32>
    %c14 = arith.constant 14 : index
    %211 = memref.load %arg2[%c14] : memref<81xf32, #tpu.memory_space<smem>>
    %212 = vector.broadcast %211 : f32 to vector<1x18x18xf32>
    %213 = arith.mulf %210, %212 : vector<1x18x18xf32>
    %214 = arith.addf %200, %213 : vector<1x18x18xf32>
    %c41 = arith.constant 41 : index
    %215 = memref.load %arg2[%c41] : memref<81xf32, #tpu.memory_space<smem>>
    %216 = vector.broadcast %215 : f32 to vector<1x18x18xf32>
    %217 = arith.mulf %210, %216 : vector<1x18x18xf32>
    %218 = arith.addf %204, %217 : vector<1x18x18xf32>
    %c68 = arith.constant 68 : index
    %219 = memref.load %arg2[%c68] : memref<81xf32, #tpu.memory_space<smem>>
    %220 = vector.broadcast %219 : f32 to vector<1x18x18xf32>
    %221 = arith.mulf %210, %220 : vector<1x18x18xf32>
    %222 = arith.addf %208, %221 : vector<1x18x18xf32>
    %223 = vector.extract_strided_slice %0 {offsets = [0, 1, 2, 0], sizes = [1, 1, 18, 18], strides = [1, 1, 1, 1]} : vector<1x3x20x20xf32> to vector<1x1x18x18xf32>
    %224 = vector.shape_cast %223 : vector<1x1x18x18xf32> to vector<1x18x18xf32>
    %c15 = arith.constant 15 : index
    %225 = memref.load %arg2[%c15] : memref<81xf32, #tpu.memory_space<smem>>
    %226 = vector.broadcast %225 : f32 to vector<1x18x18xf32>
    %227 = arith.mulf %224, %226 : vector<1x18x18xf32>
    %228 = arith.addf %214, %227 : vector<1x18x18xf32>
    %c42 = arith.constant 42 : index
    %229 = memref.load %arg2[%c42] : memref<81xf32, #tpu.memory_space<smem>>
    %230 = vector.broadcast %229 : f32 to vector<1x18x18xf32>
    %231 = arith.mulf %224, %230 : vector<1x18x18xf32>
    %232 = arith.addf %218, %231 : vector<1x18x18xf32>
    %c69 = arith.constant 69 : index
    %233 = memref.load %arg2[%c69] : memref<81xf32, #tpu.memory_space<smem>>
    %234 = vector.broadcast %233 : f32 to vector<1x18x18xf32>
    %235 = arith.mulf %224, %234 : vector<1x18x18xf32>
    %236 = arith.addf %222, %235 : vector<1x18x18xf32>
    %237 = vector.extract_strided_slice %0 {offsets = [0, 1, 2, 1], sizes = [1, 1, 18, 18], strides = [1, 1, 1, 1]} : vector<1x3x20x20xf32> to vector<1x1x18x18xf32>
    %238 = vector.shape_cast %237 : vector<1x1x18x18xf32> to vector<1x18x18xf32>
    %c16 = arith.constant 16 : index
    %239 = memref.load %arg2[%c16] : memref<81xf32, #tpu.memory_space<smem>>
    %240 = vector.broadcast %239 : f32 to vector<1x18x18xf32>
    %241 = arith.mulf %238, %240 : vector<1x18x18xf32>
    %242 = arith.addf %228, %241 : vector<1x18x18xf32>
    %c43 = arith.constant 43 : index
    %243 = memref.load %arg2[%c43] : memref<81xf32, #tpu.memory_space<smem>>
    %244 = vector.broadcast %243 : f32 to vector<1x18x18xf32>
    %245 = arith.mulf %238, %244 : vector<1x18x18xf32>
    %246 = arith.addf %232, %245 : vector<1x18x18xf32>
    %c70 = arith.constant 70 : index
    %247 = memref.load %arg2[%c70] : memref<81xf32, #tpu.memory_space<smem>>
    %248 = vector.broadcast %247 : f32 to vector<1x18x18xf32>
    %249 = arith.mulf %238, %248 : vector<1x18x18xf32>
    %250 = arith.addf %236, %249 : vector<1x18x18xf32>
    %251 = vector.extract_strided_slice %0 {offsets = [0, 1, 2, 2], sizes = [1, 1, 18, 18], strides = [1, 1, 1, 1]} : vector<1x3x20x20xf32> to vector<1x1x18x18xf32>
    %252 = vector.shape_cast %251 : vector<1x1x18x18xf32> to vector<1x18x18xf32>
    %c17 = arith.constant 17 : index
    %253 = memref.load %arg2[%c17] : memref<81xf32, #tpu.memory_space<smem>>
    %254 = vector.broadcast %253 : f32 to vector<1x18x18xf32>
    %255 = arith.mulf %252, %254 : vector<1x18x18xf32>
    %256 = arith.addf %242, %255 : vector<1x18x18xf32>
    %c44 = arith.constant 44 : index
    %257 = memref.load %arg2[%c44] : memref<81xf32, #tpu.memory_space<smem>>
    %258 = vector.broadcast %257 : f32 to vector<1x18x18xf32>
    %259 = arith.mulf %252, %258 : vector<1x18x18xf32>
    %260 = arith.addf %246, %259 : vector<1x18x18xf32>
    %c71 = arith.constant 71 : index
    %261 = memref.load %arg2[%c71] : memref<81xf32, #tpu.memory_space<smem>>
    %262 = vector.broadcast %261 : f32 to vector<1x18x18xf32>
    %263 = arith.mulf %252, %262 : vector<1x18x18xf32>
    %264 = arith.addf %250, %263 : vector<1x18x18xf32>
    %265 = vector.extract_strided_slice %0 {offsets = [0, 2, 0, 0], sizes = [1, 1, 18, 18], strides = [1, 1, 1, 1]} : vector<1x3x20x20xf32> to vector<1x1x18x18xf32>
    %266 = vector.shape_cast %265 : vector<1x1x18x18xf32> to vector<1x18x18xf32>
    %c18 = arith.constant 18 : index
    %267 = memref.load %arg2[%c18] : memref<81xf32, #tpu.memory_space<smem>>
    %268 = vector.broadcast %267 : f32 to vector<1x18x18xf32>
    %269 = arith.mulf %266, %268 : vector<1x18x18xf32>
    %270 = arith.addf %256, %269 : vector<1x18x18xf32>
    %c45 = arith.constant 45 : index
    %271 = memref.load %arg2[%c45] : memref<81xf32, #tpu.memory_space<smem>>
    %272 = vector.broadcast %271 : f32 to vector<1x18x18xf32>
    %273 = arith.mulf %266, %272 : vector<1x18x18xf32>
    %274 = arith.addf %260, %273 : vector<1x18x18xf32>
    %c72 = arith.constant 72 : index
    %275 = memref.load %arg2[%c72] : memref<81xf32, #tpu.memory_space<smem>>
    %276 = vector.broadcast %275 : f32 to vector<1x18x18xf32>
    %277 = arith.mulf %266, %276 : vector<1x18x18xf32>
    %278 = arith.addf %264, %277 : vector<1x18x18xf32>
    %279 = vector.extract_strided_slice %0 {offsets = [0, 2, 0, 1], sizes = [1, 1, 18, 18], strides = [1, 1, 1, 1]} : vector<1x3x20x20xf32> to vector<1x1x18x18xf32>
    %280 = vector.shape_cast %279 : vector<1x1x18x18xf32> to vector<1x18x18xf32>
    %c19 = arith.constant 19 : index
    %281 = memref.load %arg2[%c19] : memref<81xf32, #tpu.memory_space<smem>>
    %282 = vector.broadcast %281 : f32 to vector<1x18x18xf32>
    %283 = arith.mulf %280, %282 : vector<1x18x18xf32>
    %284 = arith.addf %270, %283 : vector<1x18x18xf32>
    %c46 = arith.constant 46 : index
    %285 = memref.load %arg2[%c46] : memref<81xf32, #tpu.memory_space<smem>>
    %286 = vector.broadcast %285 : f32 to vector<1x18x18xf32>
    %287 = arith.mulf %280, %286 : vector<1x18x18xf32>
    %288 = arith.addf %274, %287 : vector<1x18x18xf32>
    %c73 = arith.constant 73 : index
    %289 = memref.load %arg2[%c73] : memref<81xf32, #tpu.memory_space<smem>>
    %290 = vector.broadcast %289 : f32 to vector<1x18x18xf32>
    %291 = arith.mulf %280, %290 : vector<1x18x18xf32>
    %292 = arith.addf %278, %291 : vector<1x18x18xf32>
    %293 = vector.extract_strided_slice %0 {offsets = [0, 2, 0, 2], sizes = [1, 1, 18, 18], strides = [1, 1, 1, 1]} : vector<1x3x20x20xf32> to vector<1x1x18x18xf32>
    %294 = vector.shape_cast %293 : vector<1x1x18x18xf32> to vector<1x18x18xf32>
    %c20 = arith.constant 20 : index
    %295 = memref.load %arg2[%c20] : memref<81xf32, #tpu.memory_space<smem>>
    %296 = vector.broadcast %295 : f32 to vector<1x18x18xf32>
    %297 = arith.mulf %294, %296 : vector<1x18x18xf32>
    %298 = arith.addf %284, %297 : vector<1x18x18xf32>
    %c47 = arith.constant 47 : index
    %299 = memref.load %arg2[%c47] : memref<81xf32, #tpu.memory_space<smem>>
    %300 = vector.broadcast %299 : f32 to vector<1x18x18xf32>
    %301 = arith.mulf %294, %300 : vector<1x18x18xf32>
    %302 = arith.addf %288, %301 : vector<1x18x18xf32>
    %c74 = arith.constant 74 : index
    %303 = memref.load %arg2[%c74] : memref<81xf32, #tpu.memory_space<smem>>
    %304 = vector.broadcast %303 : f32 to vector<1x18x18xf32>
    %305 = arith.mulf %294, %304 : vector<1x18x18xf32>
    %306 = arith.addf %292, %305 : vector<1x18x18xf32>
    %307 = vector.extract_strided_slice %0 {offsets = [0, 2, 1, 0], sizes = [1, 1, 18, 18], strides = [1, 1, 1, 1]} : vector<1x3x20x20xf32> to vector<1x1x18x18xf32>
    %308 = vector.shape_cast %307 : vector<1x1x18x18xf32> to vector<1x18x18xf32>
    %c21 = arith.constant 21 : index
    %309 = memref.load %arg2[%c21] : memref<81xf32, #tpu.memory_space<smem>>
    %310 = vector.broadcast %309 : f32 to vector<1x18x18xf32>
    %311 = arith.mulf %308, %310 : vector<1x18x18xf32>
    %312 = arith.addf %298, %311 : vector<1x18x18xf32>
    %c48 = arith.constant 48 : index
    %313 = memref.load %arg2[%c48] : memref<81xf32, #tpu.memory_space<smem>>
    %314 = vector.broadcast %313 : f32 to vector<1x18x18xf32>
    %315 = arith.mulf %308, %314 : vector<1x18x18xf32>
    %316 = arith.addf %302, %315 : vector<1x18x18xf32>
    %c75 = arith.constant 75 : index
    %317 = memref.load %arg2[%c75] : memref<81xf32, #tpu.memory_space<smem>>
    %318 = vector.broadcast %317 : f32 to vector<1x18x18xf32>
    %319 = arith.mulf %308, %318 : vector<1x18x18xf32>
    %320 = arith.addf %306, %319 : vector<1x18x18xf32>
    %321 = vector.extract_strided_slice %0 {offsets = [0, 2, 1, 1], sizes = [1, 1, 18, 18], strides = [1, 1, 1, 1]} : vector<1x3x20x20xf32> to vector<1x1x18x18xf32>
    %322 = vector.shape_cast %321 : vector<1x1x18x18xf32> to vector<1x18x18xf32>
    %c22 = arith.constant 22 : index
    %323 = memref.load %arg2[%c22] : memref<81xf32, #tpu.memory_space<smem>>
    %324 = vector.broadcast %323 : f32 to vector<1x18x18xf32>
    %325 = arith.mulf %322, %324 : vector<1x18x18xf32>
    %326 = arith.addf %312, %325 : vector<1x18x18xf32>
    %c49 = arith.constant 49 : index
    %327 = memref.load %arg2[%c49] : memref<81xf32, #tpu.memory_space<smem>>
    %328 = vector.broadcast %327 : f32 to vector<1x18x18xf32>
    %329 = arith.mulf %322, %328 : vector<1x18x18xf32>
    %330 = arith.addf %316, %329 : vector<1x18x18xf32>
    %c76 = arith.constant 76 : index
    %331 = memref.load %arg2[%c76] : memref<81xf32, #tpu.memory_space<smem>>
    %332 = vector.broadcast %331 : f32 to vector<1x18x18xf32>
    %333 = arith.mulf %322, %332 : vector<1x18x18xf32>
    %334 = arith.addf %320, %333 : vector<1x18x18xf32>
    %335 = vector.extract_strided_slice %0 {offsets = [0, 2, 1, 2], sizes = [1, 1, 18, 18], strides = [1, 1, 1, 1]} : vector<1x3x20x20xf32> to vector<1x1x18x18xf32>
    %336 = vector.shape_cast %335 : vector<1x1x18x18xf32> to vector<1x18x18xf32>
    %c23 = arith.constant 23 : index
    %337 = memref.load %arg2[%c23] : memref<81xf32, #tpu.memory_space<smem>>
    %338 = vector.broadcast %337 : f32 to vector<1x18x18xf32>
    %339 = arith.mulf %336, %338 : vector<1x18x18xf32>
    %340 = arith.addf %326, %339 : vector<1x18x18xf32>
    %c50 = arith.constant 50 : index
    %341 = memref.load %arg2[%c50] : memref<81xf32, #tpu.memory_space<smem>>
    %342 = vector.broadcast %341 : f32 to vector<1x18x18xf32>
    %343 = arith.mulf %336, %342 : vector<1x18x18xf32>
    %344 = arith.addf %330, %343 : vector<1x18x18xf32>
    %c77 = arith.constant 77 : index
    %345 = memref.load %arg2[%c77] : memref<81xf32, #tpu.memory_space<smem>>
    %346 = vector.broadcast %345 : f32 to vector<1x18x18xf32>
    %347 = arith.mulf %336, %346 : vector<1x18x18xf32>
    %348 = arith.addf %334, %347 : vector<1x18x18xf32>
    %349 = vector.extract_strided_slice %0 {offsets = [0, 2, 2, 0], sizes = [1, 1, 18, 18], strides = [1, 1, 1, 1]} : vector<1x3x20x20xf32> to vector<1x1x18x18xf32>
    %350 = vector.shape_cast %349 : vector<1x1x18x18xf32> to vector<1x18x18xf32>
    %c24 = arith.constant 24 : index
    %351 = memref.load %arg2[%c24] : memref<81xf32, #tpu.memory_space<smem>>
    %352 = vector.broadcast %351 : f32 to vector<1x18x18xf32>
    %353 = arith.mulf %350, %352 : vector<1x18x18xf32>
    %354 = arith.addf %340, %353 : vector<1x18x18xf32>
    %c51 = arith.constant 51 : index
    %355 = memref.load %arg2[%c51] : memref<81xf32, #tpu.memory_space<smem>>
    %356 = vector.broadcast %355 : f32 to vector<1x18x18xf32>
    %357 = arith.mulf %350, %356 : vector<1x18x18xf32>
    %358 = arith.addf %344, %357 : vector<1x18x18xf32>
    %c78 = arith.constant 78 : index
    %359 = memref.load %arg2[%c78] : memref<81xf32, #tpu.memory_space<smem>>
    %360 = vector.broadcast %359 : f32 to vector<1x18x18xf32>
    %361 = arith.mulf %350, %360 : vector<1x18x18xf32>
    %362 = arith.addf %348, %361 : vector<1x18x18xf32>
    %363 = vector.extract_strided_slice %0 {offsets = [0, 2, 2, 1], sizes = [1, 1, 18, 18], strides = [1, 1, 1, 1]} : vector<1x3x20x20xf32> to vector<1x1x18x18xf32>
    %364 = vector.shape_cast %363 : vector<1x1x18x18xf32> to vector<1x18x18xf32>
    %c25 = arith.constant 25 : index
    %365 = memref.load %arg2[%c25] : memref<81xf32, #tpu.memory_space<smem>>
    %366 = vector.broadcast %365 : f32 to vector<1x18x18xf32>
    %367 = arith.mulf %364, %366 : vector<1x18x18xf32>
    %368 = arith.addf %354, %367 : vector<1x18x18xf32>
    %c52 = arith.constant 52 : index
    %369 = memref.load %arg2[%c52] : memref<81xf32, #tpu.memory_space<smem>>
    %370 = vector.broadcast %369 : f32 to vector<1x18x18xf32>
    %371 = arith.mulf %364, %370 : vector<1x18x18xf32>
    %372 = arith.addf %358, %371 : vector<1x18x18xf32>
    %c79 = arith.constant 79 : index
    %373 = memref.load %arg2[%c79] : memref<81xf32, #tpu.memory_space<smem>>
    %374 = vector.broadcast %373 : f32 to vector<1x18x18xf32>
    %375 = arith.mulf %364, %374 : vector<1x18x18xf32>
    %376 = arith.addf %362, %375 : vector<1x18x18xf32>
    %377 = vector.extract_strided_slice %0 {offsets = [0, 2, 2, 2], sizes = [1, 1, 18, 18], strides = [1, 1, 1, 1]} : vector<1x3x20x20xf32> to vector<1x1x18x18xf32>
    %378 = vector.shape_cast %377 : vector<1x1x18x18xf32> to vector<1x18x18xf32>
    %c26 = arith.constant 26 : index
    %379 = memref.load %arg2[%c26] : memref<81xf32, #tpu.memory_space<smem>>
    %380 = vector.broadcast %379 : f32 to vector<1x18x18xf32>
    %381 = arith.mulf %378, %380 : vector<1x18x18xf32>
    %382 = arith.addf %368, %381 : vector<1x18x18xf32>
    %c53 = arith.constant 53 : index
    %383 = memref.load %arg2[%c53] : memref<81xf32, #tpu.memory_space<smem>>
    %384 = vector.broadcast %383 : f32 to vector<1x18x18xf32>
    %385 = arith.mulf %378, %384 : vector<1x18x18xf32>
    %386 = arith.addf %372, %385 : vector<1x18x18xf32>
    %c80 = arith.constant 80 : index
    %387 = memref.load %arg2[%c80] : memref<81xf32, #tpu.memory_space<smem>>
    %388 = vector.broadcast %387 : f32 to vector<1x18x18xf32>
    %389 = arith.mulf %378, %388 : vector<1x18x18xf32>
    %390 = arith.addf %376, %389 : vector<1x18x18xf32>
    %391 = tpu.iota {dimensions = array<i32: 1>} : vector<1x18x18xi32>
    %392 = tpu.iota {dimensions = array<i32: 2>} : vector<1x18x18xi32>
    %c1_i32 = arith.constant 1 : i32
    %393 = vector.broadcast %c1_i32 : i32 to vector<1x18x18xi32>
    %394 = arith.cmpi sge, %391, %393 : vector<1x18x18xi32>
    %c16_i32 = arith.constant 16 : i32
    %395 = vector.broadcast %c16_i32 : i32 to vector<1x18x18xi32>
    %396 = arith.cmpi sle, %391, %395 : vector<1x18x18xi32>
    %397 = arith.andi %394, %396 : vector<1x18x18xi1>
    %c1_i32_9 = arith.constant 1 : i32
    %398 = vector.broadcast %c1_i32_9 : i32 to vector<1x18x18xi32>
    %399 = arith.cmpi sge, %392, %398 : vector<1x18x18xi32>
    %400 = arith.andi %397, %399 : vector<1x18x18xi1>
    %c16_i32_10 = arith.constant 16 : i32
    %401 = vector.broadcast %c16_i32_10 : i32 to vector<1x18x18xi32>
    %402 = arith.cmpi sle, %392, %401 : vector<1x18x18xi32>
    %403 = arith.andi %400, %402 : vector<1x18x18xi1>
    %cst_11 = arith.constant 0.000000e+00 : f32
    %404 = vector.broadcast %cst_11 : f32 to vector<1x18x18xf32>
    %405 = arith.maximumf %382, %404 : vector<1x18x18xf32>
    %cst_12 = arith.constant 0.000000e+00 : f32
    %406 = vector.broadcast %cst_12 : f32 to vector<1x18x18xf32>
    %407 = arith.select %403, %405, %406 : vector<1x18x18xi1>, vector<1x18x18xf32>
    %cst_13 = arith.constant 0.000000e+00 : f32
    %408 = vector.broadcast %cst_13 : f32 to vector<1x18x18xf32>
    %409 = arith.maximumf %386, %408 : vector<1x18x18xf32>
    %cst_14 = arith.constant 0.000000e+00 : f32
    %410 = vector.broadcast %cst_14 : f32 to vector<1x18x18xf32>
    %411 = arith.select %403, %409, %410 : vector<1x18x18xi1>, vector<1x18x18xf32>
    %cst_15 = arith.constant 0.000000e+00 : f32
    %412 = vector.broadcast %cst_15 : f32 to vector<1x18x18xf32>
    %413 = arith.maximumf %390, %412 : vector<1x18x18xf32>
    %cst_16 = arith.constant 0.000000e+00 : f32
    %414 = vector.broadcast %cst_16 : f32 to vector<1x18x18xf32>
    %415 = arith.select %403, %413, %414 : vector<1x18x18xi1>, vector<1x18x18xf32>
    %cst_17 = arith.constant 0.000000e+00 : f32
    %416 = vector.broadcast %cst_17 : f32 to vector<1x16x16xf32>
    %c0_18 = arith.constant 0 : index
    %417 = memref.load %arg5[%c0_18] : memref<3xf32, #tpu.memory_space<smem>>
    %418 = vector.broadcast %417 : f32 to vector<1x16x16xf32>
    %419 = arith.addf %416, %418 : vector<1x16x16xf32>
    %cst_19 = arith.constant 0.000000e+00 : f32
    %420 = vector.broadcast %cst_19 : f32 to vector<1x16x16xf32>
    %c1_20 = arith.constant 1 : index
    %421 = memref.load %arg5[%c1_20] : memref<3xf32, #tpu.memory_space<smem>>
    %422 = vector.broadcast %421 : f32 to vector<1x16x16xf32>
    %423 = arith.addf %420, %422 : vector<1x16x16xf32>
    %cst_21 = arith.constant 0.000000e+00 : f32
    %424 = vector.broadcast %cst_21 : f32 to vector<1x16x16xf32>
    %c2_22 = arith.constant 2 : index
    %425 = memref.load %arg5[%c2_22] : memref<3xf32, #tpu.memory_space<smem>>
    %426 = vector.broadcast %425 : f32 to vector<1x16x16xf32>
    %427 = arith.addf %424, %426 : vector<1x16x16xf32>
    %428 = vector.extract_strided_slice %407 {offsets = [0, 0, 0], sizes = [1, 16, 16], strides = [1, 1, 1]} : vector<1x18x18xf32> to vector<1x16x16xf32>
    %c0_23 = arith.constant 0 : index
    %429 = memref.load %arg4[%c0_23] : memref<81xf32, #tpu.memory_space<smem>>
    %430 = vector.broadcast %429 : f32 to vector<1x16x16xf32>
    %431 = arith.mulf %428, %430 : vector<1x16x16xf32>
    %432 = arith.addf %419, %431 : vector<1x16x16xf32>
    %c27_24 = arith.constant 27 : index
    %433 = memref.load %arg4[%c27_24] : memref<81xf32, #tpu.memory_space<smem>>
    %434 = vector.broadcast %433 : f32 to vector<1x16x16xf32>
    %435 = arith.mulf %428, %434 : vector<1x16x16xf32>
    %436 = arith.addf %423, %435 : vector<1x16x16xf32>
    %c54_25 = arith.constant 54 : index
    %437 = memref.load %arg4[%c54_25] : memref<81xf32, #tpu.memory_space<smem>>
    %438 = vector.broadcast %437 : f32 to vector<1x16x16xf32>
    %439 = arith.mulf %428, %438 : vector<1x16x16xf32>
    %440 = arith.addf %427, %439 : vector<1x16x16xf32>
    %441 = vector.extract_strided_slice %407 {offsets = [0, 0, 1], sizes = [1, 16, 16], strides = [1, 1, 1]} : vector<1x18x18xf32> to vector<1x16x16xf32>
    %c1_26 = arith.constant 1 : index
    %442 = memref.load %arg4[%c1_26] : memref<81xf32, #tpu.memory_space<smem>>
    %443 = vector.broadcast %442 : f32 to vector<1x16x16xf32>
    %444 = arith.mulf %441, %443 : vector<1x16x16xf32>
    %445 = arith.addf %432, %444 : vector<1x16x16xf32>
    %c28_27 = arith.constant 28 : index
    %446 = memref.load %arg4[%c28_27] : memref<81xf32, #tpu.memory_space<smem>>
    %447 = vector.broadcast %446 : f32 to vector<1x16x16xf32>
    %448 = arith.mulf %441, %447 : vector<1x16x16xf32>
    %449 = arith.addf %436, %448 : vector<1x16x16xf32>
    %c55_28 = arith.constant 55 : index
    %450 = memref.load %arg4[%c55_28] : memref<81xf32, #tpu.memory_space<smem>>
    %451 = vector.broadcast %450 : f32 to vector<1x16x16xf32>
    %452 = arith.mulf %441, %451 : vector<1x16x16xf32>
    %453 = arith.addf %440, %452 : vector<1x16x16xf32>
    %454 = vector.extract_strided_slice %407 {offsets = [0, 0, 2], sizes = [1, 16, 16], strides = [1, 1, 1]} : vector<1x18x18xf32> to vector<1x16x16xf32>
    %c2_29 = arith.constant 2 : index
    %455 = memref.load %arg4[%c2_29] : memref<81xf32, #tpu.memory_space<smem>>
    %456 = vector.broadcast %455 : f32 to vector<1x16x16xf32>
    %457 = arith.mulf %454, %456 : vector<1x16x16xf32>
    %458 = arith.addf %445, %457 : vector<1x16x16xf32>
    %c29_30 = arith.constant 29 : index
    %459 = memref.load %arg4[%c29_30] : memref<81xf32, #tpu.memory_space<smem>>
    %460 = vector.broadcast %459 : f32 to vector<1x16x16xf32>
    %461 = arith.mulf %454, %460 : vector<1x16x16xf32>
    %462 = arith.addf %449, %461 : vector<1x16x16xf32>
    %c56_31 = arith.constant 56 : index
    %463 = memref.load %arg4[%c56_31] : memref<81xf32, #tpu.memory_space<smem>>
    %464 = vector.broadcast %463 : f32 to vector<1x16x16xf32>
    %465 = arith.mulf %454, %464 : vector<1x16x16xf32>
    %466 = arith.addf %453, %465 : vector<1x16x16xf32>
    %467 = vector.extract_strided_slice %407 {offsets = [0, 1, 0], sizes = [1, 16, 16], strides = [1, 1, 1]} : vector<1x18x18xf32> to vector<1x16x16xf32>
    %c3_32 = arith.constant 3 : index
    %468 = memref.load %arg4[%c3_32] : memref<81xf32, #tpu.memory_space<smem>>
    %469 = vector.broadcast %468 : f32 to vector<1x16x16xf32>
    %470 = arith.mulf %467, %469 : vector<1x16x16xf32>
    %471 = arith.addf %458, %470 : vector<1x16x16xf32>
    %c30_33 = arith.constant 30 : index
    %472 = memref.load %arg4[%c30_33] : memref<81xf32, #tpu.memory_space<smem>>
    %473 = vector.broadcast %472 : f32 to vector<1x16x16xf32>
    %474 = arith.mulf %467, %473 : vector<1x16x16xf32>
    %475 = arith.addf %462, %474 : vector<1x16x16xf32>
    %c57_34 = arith.constant 57 : index
    %476 = memref.load %arg4[%c57_34] : memref<81xf32, #tpu.memory_space<smem>>
    %477 = vector.broadcast %476 : f32 to vector<1x16x16xf32>
    %478 = arith.mulf %467, %477 : vector<1x16x16xf32>
    %479 = arith.addf %466, %478 : vector<1x16x16xf32>
    %480 = vector.extract_strided_slice %407 {offsets = [0, 1, 1], sizes = [1, 16, 16], strides = [1, 1, 1]} : vector<1x18x18xf32> to vector<1x16x16xf32>
    %c4_35 = arith.constant 4 : index
    %481 = memref.load %arg4[%c4_35] : memref<81xf32, #tpu.memory_space<smem>>
    %482 = vector.broadcast %481 : f32 to vector<1x16x16xf32>
    %483 = arith.mulf %480, %482 : vector<1x16x16xf32>
    %484 = arith.addf %471, %483 : vector<1x16x16xf32>
    %c31_36 = arith.constant 31 : index
    %485 = memref.load %arg4[%c31_36] : memref<81xf32, #tpu.memory_space<smem>>
    %486 = vector.broadcast %485 : f32 to vector<1x16x16xf32>
    %487 = arith.mulf %480, %486 : vector<1x16x16xf32>
    %488 = arith.addf %475, %487 : vector<1x16x16xf32>
    %c58_37 = arith.constant 58 : index
    %489 = memref.load %arg4[%c58_37] : memref<81xf32, #tpu.memory_space<smem>>
    %490 = vector.broadcast %489 : f32 to vector<1x16x16xf32>
    %491 = arith.mulf %480, %490 : vector<1x16x16xf32>
    %492 = arith.addf %479, %491 : vector<1x16x16xf32>
    %493 = vector.extract_strided_slice %407 {offsets = [0, 1, 2], sizes = [1, 16, 16], strides = [1, 1, 1]} : vector<1x18x18xf32> to vector<1x16x16xf32>
    %c5_38 = arith.constant 5 : index
    %494 = memref.load %arg4[%c5_38] : memref<81xf32, #tpu.memory_space<smem>>
    %495 = vector.broadcast %494 : f32 to vector<1x16x16xf32>
    %496 = arith.mulf %493, %495 : vector<1x16x16xf32>
    %497 = arith.addf %484, %496 : vector<1x16x16xf32>
    %c32_39 = arith.constant 32 : index
    %498 = memref.load %arg4[%c32_39] : memref<81xf32, #tpu.memory_space<smem>>
    %499 = vector.broadcast %498 : f32 to vector<1x16x16xf32>
    %500 = arith.mulf %493, %499 : vector<1x16x16xf32>
    %501 = arith.addf %488, %500 : vector<1x16x16xf32>
    %c59_40 = arith.constant 59 : index
    %502 = memref.load %arg4[%c59_40] : memref<81xf32, #tpu.memory_space<smem>>
    %503 = vector.broadcast %502 : f32 to vector<1x16x16xf32>
    %504 = arith.mulf %493, %503 : vector<1x16x16xf32>
    %505 = arith.addf %492, %504 : vector<1x16x16xf32>
    %506 = vector.extract_strided_slice %407 {offsets = [0, 2, 0], sizes = [1, 16, 16], strides = [1, 1, 1]} : vector<1x18x18xf32> to vector<1x16x16xf32>
    %c6_41 = arith.constant 6 : index
    %507 = memref.load %arg4[%c6_41] : memref<81xf32, #tpu.memory_space<smem>>
    %508 = vector.broadcast %507 : f32 to vector<1x16x16xf32>
    %509 = arith.mulf %506, %508 : vector<1x16x16xf32>
    %510 = arith.addf %497, %509 : vector<1x16x16xf32>
    %c33_42 = arith.constant 33 : index
    %511 = memref.load %arg4[%c33_42] : memref<81xf32, #tpu.memory_space<smem>>
    %512 = vector.broadcast %511 : f32 to vector<1x16x16xf32>
    %513 = arith.mulf %506, %512 : vector<1x16x16xf32>
    %514 = arith.addf %501, %513 : vector<1x16x16xf32>
    %c60_43 = arith.constant 60 : index
    %515 = memref.load %arg4[%c60_43] : memref<81xf32, #tpu.memory_space<smem>>
    %516 = vector.broadcast %515 : f32 to vector<1x16x16xf32>
    %517 = arith.mulf %506, %516 : vector<1x16x16xf32>
    %518 = arith.addf %505, %517 : vector<1x16x16xf32>
    %519 = vector.extract_strided_slice %407 {offsets = [0, 2, 1], sizes = [1, 16, 16], strides = [1, 1, 1]} : vector<1x18x18xf32> to vector<1x16x16xf32>
    %c7_44 = arith.constant 7 : index
    %520 = memref.load %arg4[%c7_44] : memref<81xf32, #tpu.memory_space<smem>>
    %521 = vector.broadcast %520 : f32 to vector<1x16x16xf32>
    %522 = arith.mulf %519, %521 : vector<1x16x16xf32>
    %523 = arith.addf %510, %522 : vector<1x16x16xf32>
    %c34_45 = arith.constant 34 : index
    %524 = memref.load %arg4[%c34_45] : memref<81xf32, #tpu.memory_space<smem>>
    %525 = vector.broadcast %524 : f32 to vector<1x16x16xf32>
    %526 = arith.mulf %519, %525 : vector<1x16x16xf32>
    %527 = arith.addf %514, %526 : vector<1x16x16xf32>
    %c61_46 = arith.constant 61 : index
    %528 = memref.load %arg4[%c61_46] : memref<81xf32, #tpu.memory_space<smem>>
    %529 = vector.broadcast %528 : f32 to vector<1x16x16xf32>
    %530 = arith.mulf %519, %529 : vector<1x16x16xf32>
    %531 = arith.addf %518, %530 : vector<1x16x16xf32>
    %532 = vector.extract_strided_slice %407 {offsets = [0, 2, 2], sizes = [1, 16, 16], strides = [1, 1, 1]} : vector<1x18x18xf32> to vector<1x16x16xf32>
    %c8_47 = arith.constant 8 : index
    %533 = memref.load %arg4[%c8_47] : memref<81xf32, #tpu.memory_space<smem>>
    %534 = vector.broadcast %533 : f32 to vector<1x16x16xf32>
    %535 = arith.mulf %532, %534 : vector<1x16x16xf32>
    %536 = arith.addf %523, %535 : vector<1x16x16xf32>
    %c35_48 = arith.constant 35 : index
    %537 = memref.load %arg4[%c35_48] : memref<81xf32, #tpu.memory_space<smem>>
    %538 = vector.broadcast %537 : f32 to vector<1x16x16xf32>
    %539 = arith.mulf %532, %538 : vector<1x16x16xf32>
    %540 = arith.addf %527, %539 : vector<1x16x16xf32>
    %c62_49 = arith.constant 62 : index
    %541 = memref.load %arg4[%c62_49] : memref<81xf32, #tpu.memory_space<smem>>
    %542 = vector.broadcast %541 : f32 to vector<1x16x16xf32>
    %543 = arith.mulf %532, %542 : vector<1x16x16xf32>
    %544 = arith.addf %531, %543 : vector<1x16x16xf32>
    %545 = vector.extract_strided_slice %411 {offsets = [0, 0, 0], sizes = [1, 16, 16], strides = [1, 1, 1]} : vector<1x18x18xf32> to vector<1x16x16xf32>
    %c9_50 = arith.constant 9 : index
    %546 = memref.load %arg4[%c9_50] : memref<81xf32, #tpu.memory_space<smem>>
    %547 = vector.broadcast %546 : f32 to vector<1x16x16xf32>
    %548 = arith.mulf %545, %547 : vector<1x16x16xf32>
    %549 = arith.addf %536, %548 : vector<1x16x16xf32>
    %c36_51 = arith.constant 36 : index
    %550 = memref.load %arg4[%c36_51] : memref<81xf32, #tpu.memory_space<smem>>
    %551 = vector.broadcast %550 : f32 to vector<1x16x16xf32>
    %552 = arith.mulf %545, %551 : vector<1x16x16xf32>
    %553 = arith.addf %540, %552 : vector<1x16x16xf32>
    %c63_52 = arith.constant 63 : index
    %554 = memref.load %arg4[%c63_52] : memref<81xf32, #tpu.memory_space<smem>>
    %555 = vector.broadcast %554 : f32 to vector<1x16x16xf32>
    %556 = arith.mulf %545, %555 : vector<1x16x16xf32>
    %557 = arith.addf %544, %556 : vector<1x16x16xf32>
    %558 = vector.extract_strided_slice %411 {offsets = [0, 0, 1], sizes = [1, 16, 16], strides = [1, 1, 1]} : vector<1x18x18xf32> to vector<1x16x16xf32>
    %c10_53 = arith.constant 10 : index
    %559 = memref.load %arg4[%c10_53] : memref<81xf32, #tpu.memory_space<smem>>
    %560 = vector.broadcast %559 : f32 to vector<1x16x16xf32>
    %561 = arith.mulf %558, %560 : vector<1x16x16xf32>
    %562 = arith.addf %549, %561 : vector<1x16x16xf32>
    %c37_54 = arith.constant 37 : index
    %563 = memref.load %arg4[%c37_54] : memref<81xf32, #tpu.memory_space<smem>>
    %564 = vector.broadcast %563 : f32 to vector<1x16x16xf32>
    %565 = arith.mulf %558, %564 : vector<1x16x16xf32>
    %566 = arith.addf %553, %565 : vector<1x16x16xf32>
    %c64_55 = arith.constant 64 : index
    %567 = memref.load %arg4[%c64_55] : memref<81xf32, #tpu.memory_space<smem>>
    %568 = vector.broadcast %567 : f32 to vector<1x16x16xf32>
    %569 = arith.mulf %558, %568 : vector<1x16x16xf32>
    %570 = arith.addf %557, %569 : vector<1x16x16xf32>
    %571 = vector.extract_strided_slice %411 {offsets = [0, 0, 2], sizes = [1, 16, 16], strides = [1, 1, 1]} : vector<1x18x18xf32> to vector<1x16x16xf32>
    %c11_56 = arith.constant 11 : index
    %572 = memref.load %arg4[%c11_56] : memref<81xf32, #tpu.memory_space<smem>>
    %573 = vector.broadcast %572 : f32 to vector<1x16x16xf32>
    %574 = arith.mulf %571, %573 : vector<1x16x16xf32>
    %575 = arith.addf %562, %574 : vector<1x16x16xf32>
    %c38_57 = arith.constant 38 : index
    %576 = memref.load %arg4[%c38_57] : memref<81xf32, #tpu.memory_space<smem>>
    %577 = vector.broadcast %576 : f32 to vector<1x16x16xf32>
    %578 = arith.mulf %571, %577 : vector<1x16x16xf32>
    %579 = arith.addf %566, %578 : vector<1x16x16xf32>
    %c65_58 = arith.constant 65 : index
    %580 = memref.load %arg4[%c65_58] : memref<81xf32, #tpu.memory_space<smem>>
    %581 = vector.broadcast %580 : f32 to vector<1x16x16xf32>
    %582 = arith.mulf %571, %581 : vector<1x16x16xf32>
    %583 = arith.addf %570, %582 : vector<1x16x16xf32>
    %584 = vector.extract_strided_slice %411 {offsets = [0, 1, 0], sizes = [1, 16, 16], strides = [1, 1, 1]} : vector<1x18x18xf32> to vector<1x16x16xf32>
    %c12_59 = arith.constant 12 : index
    %585 = memref.load %arg4[%c12_59] : memref<81xf32, #tpu.memory_space<smem>>
    %586 = vector.broadcast %585 : f32 to vector<1x16x16xf32>
    %587 = arith.mulf %584, %586 : vector<1x16x16xf32>
    %588 = arith.addf %575, %587 : vector<1x16x16xf32>
    %c39_60 = arith.constant 39 : index
    %589 = memref.load %arg4[%c39_60] : memref<81xf32, #tpu.memory_space<smem>>
    %590 = vector.broadcast %589 : f32 to vector<1x16x16xf32>
    %591 = arith.mulf %584, %590 : vector<1x16x16xf32>
    %592 = arith.addf %579, %591 : vector<1x16x16xf32>
    %c66_61 = arith.constant 66 : index
    %593 = memref.load %arg4[%c66_61] : memref<81xf32, #tpu.memory_space<smem>>
    %594 = vector.broadcast %593 : f32 to vector<1x16x16xf32>
    %595 = arith.mulf %584, %594 : vector<1x16x16xf32>
    %596 = arith.addf %583, %595 : vector<1x16x16xf32>
    %597 = vector.extract_strided_slice %411 {offsets = [0, 1, 1], sizes = [1, 16, 16], strides = [1, 1, 1]} : vector<1x18x18xf32> to vector<1x16x16xf32>
    %c13_62 = arith.constant 13 : index
    %598 = memref.load %arg4[%c13_62] : memref<81xf32, #tpu.memory_space<smem>>
    %599 = vector.broadcast %598 : f32 to vector<1x16x16xf32>
    %600 = arith.mulf %597, %599 : vector<1x16x16xf32>
    %601 = arith.addf %588, %600 : vector<1x16x16xf32>
    %c40_63 = arith.constant 40 : index
    %602 = memref.load %arg4[%c40_63] : memref<81xf32, #tpu.memory_space<smem>>
    %603 = vector.broadcast %602 : f32 to vector<1x16x16xf32>
    %604 = arith.mulf %597, %603 : vector<1x16x16xf32>
    %605 = arith.addf %592, %604 : vector<1x16x16xf32>
    %c67_64 = arith.constant 67 : index
    %606 = memref.load %arg4[%c67_64] : memref<81xf32, #tpu.memory_space<smem>>
    %607 = vector.broadcast %606 : f32 to vector<1x16x16xf32>
    %608 = arith.mulf %597, %607 : vector<1x16x16xf32>
    %609 = arith.addf %596, %608 : vector<1x16x16xf32>
    %610 = vector.extract_strided_slice %411 {offsets = [0, 1, 2], sizes = [1, 16, 16], strides = [1, 1, 1]} : vector<1x18x18xf32> to vector<1x16x16xf32>
    %c14_65 = arith.constant 14 : index
    %611 = memref.load %arg4[%c14_65] : memref<81xf32, #tpu.memory_space<smem>>
    %612 = vector.broadcast %611 : f32 to vector<1x16x16xf32>
    %613 = arith.mulf %610, %612 : vector<1x16x16xf32>
    %614 = arith.addf %601, %613 : vector<1x16x16xf32>
    %c41_66 = arith.constant 41 : index
    %615 = memref.load %arg4[%c41_66] : memref<81xf32, #tpu.memory_space<smem>>
    %616 = vector.broadcast %615 : f32 to vector<1x16x16xf32>
    %617 = arith.mulf %610, %616 : vector<1x16x16xf32>
    %618 = arith.addf %605, %617 : vector<1x16x16xf32>
    %c68_67 = arith.constant 68 : index
    %619 = memref.load %arg4[%c68_67] : memref<81xf32, #tpu.memory_space<smem>>
    %620 = vector.broadcast %619 : f32 to vector<1x16x16xf32>
    %621 = arith.mulf %610, %620 : vector<1x16x16xf32>
    %622 = arith.addf %609, %621 : vector<1x16x16xf32>
    %623 = vector.extract_strided_slice %411 {offsets = [0, 2, 0], sizes = [1, 16, 16], strides = [1, 1, 1]} : vector<1x18x18xf32> to vector<1x16x16xf32>
    %c15_68 = arith.constant 15 : index
    %624 = memref.load %arg4[%c15_68] : memref<81xf32, #tpu.memory_space<smem>>
    %625 = vector.broadcast %624 : f32 to vector<1x16x16xf32>
    %626 = arith.mulf %623, %625 : vector<1x16x16xf32>
    %627 = arith.addf %614, %626 : vector<1x16x16xf32>
    %c42_69 = arith.constant 42 : index
    %628 = memref.load %arg4[%c42_69] : memref<81xf32, #tpu.memory_space<smem>>
    %629 = vector.broadcast %628 : f32 to vector<1x16x16xf32>
    %630 = arith.mulf %623, %629 : vector<1x16x16xf32>
    %631 = arith.addf %618, %630 : vector<1x16x16xf32>
    %c69_70 = arith.constant 69 : index
    %632 = memref.load %arg4[%c69_70] : memref<81xf32, #tpu.memory_space<smem>>
    %633 = vector.broadcast %632 : f32 to vector<1x16x16xf32>
    %634 = arith.mulf %623, %633 : vector<1x16x16xf32>
    %635 = arith.addf %622, %634 : vector<1x16x16xf32>
    %636 = vector.extract_strided_slice %411 {offsets = [0, 2, 1], sizes = [1, 16, 16], strides = [1, 1, 1]} : vector<1x18x18xf32> to vector<1x16x16xf32>
    %c16_71 = arith.constant 16 : index
    %637 = memref.load %arg4[%c16_71] : memref<81xf32, #tpu.memory_space<smem>>
    %638 = vector.broadcast %637 : f32 to vector<1x16x16xf32>
    %639 = arith.mulf %636, %638 : vector<1x16x16xf32>
    %640 = arith.addf %627, %639 : vector<1x16x16xf32>
    %c43_72 = arith.constant 43 : index
    %641 = memref.load %arg4[%c43_72] : memref<81xf32, #tpu.memory_space<smem>>
    %642 = vector.broadcast %641 : f32 to vector<1x16x16xf32>
    %643 = arith.mulf %636, %642 : vector<1x16x16xf32>
    %644 = arith.addf %631, %643 : vector<1x16x16xf32>
    %c70_73 = arith.constant 70 : index
    %645 = memref.load %arg4[%c70_73] : memref<81xf32, #tpu.memory_space<smem>>
    %646 = vector.broadcast %645 : f32 to vector<1x16x16xf32>
    %647 = arith.mulf %636, %646 : vector<1x16x16xf32>
    %648 = arith.addf %635, %647 : vector<1x16x16xf32>
    %649 = vector.extract_strided_slice %411 {offsets = [0, 2, 2], sizes = [1, 16, 16], strides = [1, 1, 1]} : vector<1x18x18xf32> to vector<1x16x16xf32>
    %c17_74 = arith.constant 17 : index
    %650 = memref.load %arg4[%c17_74] : memref<81xf32, #tpu.memory_space<smem>>
    %651 = vector.broadcast %650 : f32 to vector<1x16x16xf32>
    %652 = arith.mulf %649, %651 : vector<1x16x16xf32>
    %653 = arith.addf %640, %652 : vector<1x16x16xf32>
    %c44_75 = arith.constant 44 : index
    %654 = memref.load %arg4[%c44_75] : memref<81xf32, #tpu.memory_space<smem>>
    %655 = vector.broadcast %654 : f32 to vector<1x16x16xf32>
    %656 = arith.mulf %649, %655 : vector<1x16x16xf32>
    %657 = arith.addf %644, %656 : vector<1x16x16xf32>
    %c71_76 = arith.constant 71 : index
    %658 = memref.load %arg4[%c71_76] : memref<81xf32, #tpu.memory_space<smem>>
    %659 = vector.broadcast %658 : f32 to vector<1x16x16xf32>
    %660 = arith.mulf %649, %659 : vector<1x16x16xf32>
    %661 = arith.addf %648, %660 : vector<1x16x16xf32>
    %662 = vector.extract_strided_slice %415 {offsets = [0, 0, 0], sizes = [1, 16, 16], strides = [1, 1, 1]} : vector<1x18x18xf32> to vector<1x16x16xf32>
    %c18_77 = arith.constant 18 : index
    %663 = memref.load %arg4[%c18_77] : memref<81xf32, #tpu.memory_space<smem>>
    %664 = vector.broadcast %663 : f32 to vector<1x16x16xf32>
    %665 = arith.mulf %662, %664 : vector<1x16x16xf32>
    %666 = arith.addf %653, %665 : vector<1x16x16xf32>
    %c45_78 = arith.constant 45 : index
    %667 = memref.load %arg4[%c45_78] : memref<81xf32, #tpu.memory_space<smem>>
    %668 = vector.broadcast %667 : f32 to vector<1x16x16xf32>
    %669 = arith.mulf %662, %668 : vector<1x16x16xf32>
    %670 = arith.addf %657, %669 : vector<1x16x16xf32>
    %c72_79 = arith.constant 72 : index
    %671 = memref.load %arg4[%c72_79] : memref<81xf32, #tpu.memory_space<smem>>
    %672 = vector.broadcast %671 : f32 to vector<1x16x16xf32>
    %673 = arith.mulf %662, %672 : vector<1x16x16xf32>
    %674 = arith.addf %661, %673 : vector<1x16x16xf32>
    %675 = vector.extract_strided_slice %415 {offsets = [0, 0, 1], sizes = [1, 16, 16], strides = [1, 1, 1]} : vector<1x18x18xf32> to vector<1x16x16xf32>
    %c19_80 = arith.constant 19 : index
    %676 = memref.load %arg4[%c19_80] : memref<81xf32, #tpu.memory_space<smem>>
    %677 = vector.broadcast %676 : f32 to vector<1x16x16xf32>
    %678 = arith.mulf %675, %677 : vector<1x16x16xf32>
    %679 = arith.addf %666, %678 : vector<1x16x16xf32>
    %c46_81 = arith.constant 46 : index
    %680 = memref.load %arg4[%c46_81] : memref<81xf32, #tpu.memory_space<smem>>
    %681 = vector.broadcast %680 : f32 to vector<1x16x16xf32>
    %682 = arith.mulf %675, %681 : vector<1x16x16xf32>
    %683 = arith.addf %670, %682 : vector<1x16x16xf32>
    %c73_82 = arith.constant 73 : index
    %684 = memref.load %arg4[%c73_82] : memref<81xf32, #tpu.memory_space<smem>>
    %685 = vector.broadcast %684 : f32 to vector<1x16x16xf32>
    %686 = arith.mulf %675, %685 : vector<1x16x16xf32>
    %687 = arith.addf %674, %686 : vector<1x16x16xf32>
    %688 = vector.extract_strided_slice %415 {offsets = [0, 0, 2], sizes = [1, 16, 16], strides = [1, 1, 1]} : vector<1x18x18xf32> to vector<1x16x16xf32>
    %c20_83 = arith.constant 20 : index
    %689 = memref.load %arg4[%c20_83] : memref<81xf32, #tpu.memory_space<smem>>
    %690 = vector.broadcast %689 : f32 to vector<1x16x16xf32>
    %691 = arith.mulf %688, %690 : vector<1x16x16xf32>
    %692 = arith.addf %679, %691 : vector<1x16x16xf32>
    %c47_84 = arith.constant 47 : index
    %693 = memref.load %arg4[%c47_84] : memref<81xf32, #tpu.memory_space<smem>>
    %694 = vector.broadcast %693 : f32 to vector<1x16x16xf32>
    %695 = arith.mulf %688, %694 : vector<1x16x16xf32>
    %696 = arith.addf %683, %695 : vector<1x16x16xf32>
    %c74_85 = arith.constant 74 : index
    %697 = memref.load %arg4[%c74_85] : memref<81xf32, #tpu.memory_space<smem>>
    %698 = vector.broadcast %697 : f32 to vector<1x16x16xf32>
    %699 = arith.mulf %688, %698 : vector<1x16x16xf32>
    %700 = arith.addf %687, %699 : vector<1x16x16xf32>
    %701 = vector.extract_strided_slice %415 {offsets = [0, 1, 0], sizes = [1, 16, 16], strides = [1, 1, 1]} : vector<1x18x18xf32> to vector<1x16x16xf32>
    %c21_86 = arith.constant 21 : index
    %702 = memref.load %arg4[%c21_86] : memref<81xf32, #tpu.memory_space<smem>>
    %703 = vector.broadcast %702 : f32 to vector<1x16x16xf32>
    %704 = arith.mulf %701, %703 : vector<1x16x16xf32>
    %705 = arith.addf %692, %704 : vector<1x16x16xf32>
    %c48_87 = arith.constant 48 : index
    %706 = memref.load %arg4[%c48_87] : memref<81xf32, #tpu.memory_space<smem>>
    %707 = vector.broadcast %706 : f32 to vector<1x16x16xf32>
    %708 = arith.mulf %701, %707 : vector<1x16x16xf32>
    %709 = arith.addf %696, %708 : vector<1x16x16xf32>
    %c75_88 = arith.constant 75 : index
    %710 = memref.load %arg4[%c75_88] : memref<81xf32, #tpu.memory_space<smem>>
    %711 = vector.broadcast %710 : f32 to vector<1x16x16xf32>
    %712 = arith.mulf %701, %711 : vector<1x16x16xf32>
    %713 = arith.addf %700, %712 : vector<1x16x16xf32>
    %714 = vector.extract_strided_slice %415 {offsets = [0, 1, 1], sizes = [1, 16, 16], strides = [1, 1, 1]} : vector<1x18x18xf32> to vector<1x16x16xf32>
    %c22_89 = arith.constant 22 : index
    %715 = memref.load %arg4[%c22_89] : memref<81xf32, #tpu.memory_space<smem>>
    %716 = vector.broadcast %715 : f32 to vector<1x16x16xf32>
    %717 = arith.mulf %714, %716 : vector<1x16x16xf32>
    %718 = arith.addf %705, %717 : vector<1x16x16xf32>
    %c49_90 = arith.constant 49 : index
    %719 = memref.load %arg4[%c49_90] : memref<81xf32, #tpu.memory_space<smem>>
    %720 = vector.broadcast %719 : f32 to vector<1x16x16xf32>
    %721 = arith.mulf %714, %720 : vector<1x16x16xf32>
    %722 = arith.addf %709, %721 : vector<1x16x16xf32>
    %c76_91 = arith.constant 76 : index
    %723 = memref.load %arg4[%c76_91] : memref<81xf32, #tpu.memory_space<smem>>
    %724 = vector.broadcast %723 : f32 to vector<1x16x16xf32>
    %725 = arith.mulf %714, %724 : vector<1x16x16xf32>
    %726 = arith.addf %713, %725 : vector<1x16x16xf32>
    %727 = vector.extract_strided_slice %415 {offsets = [0, 1, 2], sizes = [1, 16, 16], strides = [1, 1, 1]} : vector<1x18x18xf32> to vector<1x16x16xf32>
    %c23_92 = arith.constant 23 : index
    %728 = memref.load %arg4[%c23_92] : memref<81xf32, #tpu.memory_space<smem>>
    %729 = vector.broadcast %728 : f32 to vector<1x16x16xf32>
    %730 = arith.mulf %727, %729 : vector<1x16x16xf32>
    %731 = arith.addf %718, %730 : vector<1x16x16xf32>
    %c50_93 = arith.constant 50 : index
    %732 = memref.load %arg4[%c50_93] : memref<81xf32, #tpu.memory_space<smem>>
    %733 = vector.broadcast %732 : f32 to vector<1x16x16xf32>
    %734 = arith.mulf %727, %733 : vector<1x16x16xf32>
    %735 = arith.addf %722, %734 : vector<1x16x16xf32>
    %c77_94 = arith.constant 77 : index
    %736 = memref.load %arg4[%c77_94] : memref<81xf32, #tpu.memory_space<smem>>
    %737 = vector.broadcast %736 : f32 to vector<1x16x16xf32>
    %738 = arith.mulf %727, %737 : vector<1x16x16xf32>
    %739 = arith.addf %726, %738 : vector<1x16x16xf32>
    %740 = vector.extract_strided_slice %415 {offsets = [0, 2, 0], sizes = [1, 16, 16], strides = [1, 1, 1]} : vector<1x18x18xf32> to vector<1x16x16xf32>
    %c24_95 = arith.constant 24 : index
    %741 = memref.load %arg4[%c24_95] : memref<81xf32, #tpu.memory_space<smem>>
    %742 = vector.broadcast %741 : f32 to vector<1x16x16xf32>
    %743 = arith.mulf %740, %742 : vector<1x16x16xf32>
    %744 = arith.addf %731, %743 : vector<1x16x16xf32>
    %c51_96 = arith.constant 51 : index
    %745 = memref.load %arg4[%c51_96] : memref<81xf32, #tpu.memory_space<smem>>
    %746 = vector.broadcast %745 : f32 to vector<1x16x16xf32>
    %747 = arith.mulf %740, %746 : vector<1x16x16xf32>
    %748 = arith.addf %735, %747 : vector<1x16x16xf32>
    %c78_97 = arith.constant 78 : index
    %749 = memref.load %arg4[%c78_97] : memref<81xf32, #tpu.memory_space<smem>>
    %750 = vector.broadcast %749 : f32 to vector<1x16x16xf32>
    %751 = arith.mulf %740, %750 : vector<1x16x16xf32>
    %752 = arith.addf %739, %751 : vector<1x16x16xf32>
    %753 = vector.extract_strided_slice %415 {offsets = [0, 2, 1], sizes = [1, 16, 16], strides = [1, 1, 1]} : vector<1x18x18xf32> to vector<1x16x16xf32>
    %c25_98 = arith.constant 25 : index
    %754 = memref.load %arg4[%c25_98] : memref<81xf32, #tpu.memory_space<smem>>
    %755 = vector.broadcast %754 : f32 to vector<1x16x16xf32>
    %756 = arith.mulf %753, %755 : vector<1x16x16xf32>
    %757 = arith.addf %744, %756 : vector<1x16x16xf32>
    %c52_99 = arith.constant 52 : index
    %758 = memref.load %arg4[%c52_99] : memref<81xf32, #tpu.memory_space<smem>>
    %759 = vector.broadcast %758 : f32 to vector<1x16x16xf32>
    %760 = arith.mulf %753, %759 : vector<1x16x16xf32>
    %761 = arith.addf %748, %760 : vector<1x16x16xf32>
    %c79_100 = arith.constant 79 : index
    %762 = memref.load %arg4[%c79_100] : memref<81xf32, #tpu.memory_space<smem>>
    %763 = vector.broadcast %762 : f32 to vector<1x16x16xf32>
    %764 = arith.mulf %753, %763 : vector<1x16x16xf32>
    %765 = arith.addf %752, %764 : vector<1x16x16xf32>
    %766 = vector.extract_strided_slice %415 {offsets = [0, 2, 2], sizes = [1, 16, 16], strides = [1, 1, 1]} : vector<1x18x18xf32> to vector<1x16x16xf32>
    %c26_101 = arith.constant 26 : index
    %767 = memref.load %arg4[%c26_101] : memref<81xf32, #tpu.memory_space<smem>>
    %768 = vector.broadcast %767 : f32 to vector<1x16x16xf32>
    %769 = arith.mulf %766, %768 : vector<1x16x16xf32>
    %770 = arith.addf %757, %769 : vector<1x16x16xf32>
    %c53_102 = arith.constant 53 : index
    %771 = memref.load %arg4[%c53_102] : memref<81xf32, #tpu.memory_space<smem>>
    %772 = vector.broadcast %771 : f32 to vector<1x16x16xf32>
    %773 = arith.mulf %766, %772 : vector<1x16x16xf32>
    %774 = arith.addf %761, %773 : vector<1x16x16xf32>
    %c80_103 = arith.constant 80 : index
    %775 = memref.load %arg4[%c80_103] : memref<81xf32, #tpu.memory_space<smem>>
    %776 = vector.broadcast %775 : f32 to vector<1x16x16xf32>
    %777 = arith.mulf %766, %776 : vector<1x16x16xf32>
    %778 = arith.addf %765, %777 : vector<1x16x16xf32>
    %779 = vector.extract_strided_slice %0 {offsets = [0, 0, 2, 2], sizes = [1, 1, 16, 16], strides = [1, 1, 1, 1]} : vector<1x3x20x20xf32> to vector<1x1x16x16xf32>
    %780 = vector.shape_cast %779 : vector<1x1x16x16xf32> to vector<1x16x16xf32>
    %cst_104 = arith.constant 0.000000e+00 : f32
    %781 = vector.broadcast %cst_104 : f32 to vector<1x16x16xf32>
    %782 = arith.maximumf %770, %781 : vector<1x16x16xf32>
    %783 = arith.addf %782, %780 : vector<1x16x16xf32>
    %c0_105 = arith.constant 0 : index
    %c0_106 = arith.constant 0 : index
    %c0_107 = arith.constant 0 : index
    %c0_108 = arith.constant 0 : index
    %784 = vector.load %arg6[%c0_105, %c0_106, %c0_107, %c0_108] : memref<1x3x16x16xf32, #tpu.memory_space<vmem>>, vector<1x1x16x16xf32>
    %785 = vector.shape_cast %784 : vector<1x1x16x16xf32> to vector<1x16x16xf32>
    %786 = vector.shape_cast %783 : vector<1x16x16xf32> to vector<1x1x16x16xf32>
    tpu.vector_store %arg6[%c0_105, %c0_106, %c0_107, %c0_108], %786 {strides = array<i32>} : memref<1x3x16x16xf32, #tpu.memory_space<vmem>>, vector<1x1x16x16xf32>,
    %787 = vector.extract_strided_slice %0 {offsets = [0, 1, 2, 2], sizes = [1, 1, 16, 16], strides = [1, 1, 1, 1]} : vector<1x3x20x20xf32> to vector<1x1x16x16xf32>
    %788 = vector.shape_cast %787 : vector<1x1x16x16xf32> to vector<1x16x16xf32>
    %cst_109 = arith.constant 0.000000e+00 : f32
    %789 = vector.broadcast %cst_109 : f32 to vector<1x16x16xf32>
    %790 = arith.maximumf %774, %789 : vector<1x16x16xf32>
    %791 = arith.addf %790, %788 : vector<1x16x16xf32>
    %c0_110 = arith.constant 0 : index
    %c1_111 = arith.constant 1 : index
    %c0_112 = arith.constant 0 : index
    %c0_113 = arith.constant 0 : index
    %792 = vector.load %arg6[%c0_110, %c1_111, %c0_112, %c0_113] : memref<1x3x16x16xf32, #tpu.memory_space<vmem>>, vector<1x1x16x16xf32>
    %793 = vector.shape_cast %792 : vector<1x1x16x16xf32> to vector<1x16x16xf32>
    %794 = vector.shape_cast %791 : vector<1x16x16xf32> to vector<1x1x16x16xf32>
    tpu.vector_store %arg6[%c0_110, %c1_111, %c0_112, %c0_113], %794 {strides = array<i32>} : memref<1x3x16x16xf32, #tpu.memory_space<vmem>>, vector<1x1x16x16xf32>,
    %795 = vector.extract_strided_slice %0 {offsets = [0, 2, 2, 2], sizes = [1, 1, 16, 16], strides = [1, 1, 1, 1]} : vector<1x3x20x20xf32> to vector<1x1x16x16xf32>
    %796 = vector.shape_cast %795 : vector<1x1x16x16xf32> to vector<1x16x16xf32>
    %cst_114 = arith.constant 0.000000e+00 : f32
    %797 = vector.broadcast %cst_114 : f32 to vector<1x16x16xf32>
    %798 = arith.maximumf %778, %797 : vector<1x16x16xf32>
    %799 = arith.addf %798, %796 : vector<1x16x16xf32>
    %c0_115 = arith.constant 0 : index
    %c2_116 = arith.constant 2 : index
    %c0_117 = arith.constant 0 : index
    %c0_118 = arith.constant 0 : index
    %800 = vector.load %arg6[%c0_115, %c2_116, %c0_117, %c0_118] : memref<1x3x16x16xf32, #tpu.memory_space<vmem>>, vector<1x1x16x16xf32>
    %801 = vector.shape_cast %800 : vector<1x1x16x16xf32> to vector<1x16x16xf32>
    %802 = vector.shape_cast %799 : vector<1x16x16xf32> to vector<1x1x16x16xf32>
    tpu.vector_store %arg6[%c0_115, %c2_116, %c0_117, %c0_118], %802 {strides = array<i32>} : memref<1x3x16x16xf32, #tpu.memory_space<vmem>>, vector<1x1x16x16xf32>,
    return
  }
  func.func @transform_0(%arg0: i32) -> (i32, i32, i32, i32) {
    %c0_i32 = arith.constant 0 : i32
    %c0_i32_0 = arith.constant 0 : i32
    %c0_i32_1 = arith.constant 0 : i32
    %c0_i32_2 = arith.constant 0 : i32
    return %arg0, %c0_i32, %c0_i32_0, %c0_i32_1 : i32, i32, i32, i32
  }
  func.func @transform_1(%arg0: i32) -> i32 {
    %c0_i32 = arith.constant 0 : i32
    %c0_i32_0 = arith.constant 0 : i32
    return %c0_i32 : i32
  }
  func.func @transform_2(%arg0: i32) -> i32 {
    %c0_i32 = arith.constant 0 : i32
    %c0_i32_0 = arith.constant 0 : i32
    return %c0_i32 : i32
  }
  func.func @transform_3(%arg0: i32) -> i32 {
    %c0_i32 = arith.constant 0 : i32
    %c0_i32_0 = arith.constant 0 : i32
    return %c0_i32 : i32
  }
  func.func @transform_4(%arg0: i32) -> i32 {
    %c0_i32 = arith.constant 0 : i32
    %c0_i32_0 = arith.constant 0 : i32
    return %c0_i32 : i32
  }
  func.func @transform_5(%arg0: i32) -> (i32, i32, i32, i32) {
    %c0_i32 = arith.constant 0 : i32
    %c0_i32_0 = arith.constant 0 : i32
    %c0_i32_1 = arith.constant 0 : i32
    %c0_i32_2 = arith.constant 0 : i32
    return %arg0, %c0_i32, %c0_i32_0, %c0_i32_1 : i32, i32, i32, i32
  }
}

</mosaic_0001>

<bundles_post_ra>
// kernel: tpu_custom_call.1
= control target key start
LH: loop header
LB: loop body
LE: loop exit
PB: predicated region body
PF: predicated region fallthrough
CT: control target
= control target key end

     0   :  { %s6542_s0 = inlined_call_operand.vmem [shape: f32[2,3,20,20], index: 0, kind: input, shape index: {}]   ;;  %s6543_s1 = inlined_call_operand.vmem [shape: f32[81], index: 1, kind: input, shape index: {}]   ;;  %s6544_s2 = inlined_call_operand.vmem [shape: f32[3], index: 2, kind: input, shape index: {}]   ;;  %s6545_s3 = inlined_call_operand.vmem [shape: f32[81], index: 3, kind: input, shape index: {}]   ;;  %s6546_s4 = inlined_call_operand.vmem [shape: f32[3], index: 4, kind: input, shape index: {}]   ;;  %s6547_s5 = inlined_call_operand.hbm [shape: f32[2,3,16,16], index: 5, kind: output, shape index: {}]  }
   0x1   :  { %6559 = sst [smem:[#allocation107_spill]] %s6542_s0 }
   0x2   :  { %6560 = sst [smem:[#allocation108_spill]] %s6543_s1 }
   0x3   :  { %6561 = sst [smem:[#allocation109_spill]] %s6544_s2 }
   0x4   :  { %10 = vsyncpa [#allocation4], 0 }
   0x5   :  { %11 = vsyncpa [#allocation6], 0 }
   0x6   :  { %12 = vsyncpa [#allocation9], 0 }
   0x7   :  { %13 = vsyncpa [#allocation3], 0 }
   0x8   :  { %15 = vsyncpa [#allocation3 + $0x1], 0  ;;  %s4032_s18 = smov 0   ;;  %s4034_s19 = smov 0  }
   0x9   :  { %s4036_s20 = smov 0   ;;  %s4038_s21 = smov 0  }
   0xa LB: > { %s4053_s22 = sadd.s32 4294967295, %s3991_s21   ;;  %s3567_s23 = sadd.s32 4294967294, %s3991_s21   ;;  %s3991_s21 = sphi %s4038_s21, %s6786_s21   ;;  %s3987_s20 = sphi %s4036_s20, %s6785_s20   ;;  %s3983_s19 = sphi %s4034_s19, %s6784_s19   ;;  %s3979_s18 = sphi %s4032_s18, %s6783_s18  }
   0xb   : > { %s4057_s24 = sadd.s32 1, %s3991_s21   ;;  %s138_s25 = sadd.s32 1, %s3987_s20 }
   0xc   : > { %s135_s26 = ssub.s32 %s3991_s21, %s4057_s24  ;;  %p148_p0 = scmp.ne.s32.totalorder %s3987_s20, %s3983_s19 }
   0xd   : > { %p136_p1 = scmp.eq.s32.totalorder %s135_s26, 0  ;;  %p149_p2 = scmp.eq.s32.totalorder %s4053_s22, 1 }
   0xe   : > { %p154_p3 = scmp.ne.s32.totalorder %s3983_s19, %s3979_s18  ;;  %p155_p4 = scmp.eq.s32.totalorder %s3567_s23, 1 }
   0xf   : > { %s4068_s27 = scalar_select %p136_p1, %s3987_s20, %s138_s25  }
  0x10   : > { %p4070_p5 = por %p149_p2, %p148_p0  ;;  %p4074_p6 = por %p155_p4, %p154_p3 }
  0x11   : > { %p3568_p7 = scmp.ge.s32.totalorder %s3991_s21, 1  ;;  %p162_p8 = scmp.lt.s32.totalorder %s3991_s21, 3 }
  0x12   : > { %s6562_s28 = scalar_select %p4070_p5, 1, 0 }
  0x13   : > { %s6563_s29 = scalar_select %p4074_p6, 1, 0 }
  0x14   : > { %p6548_p9 = scmp.eq.s32.totalorder %s4053_s22, 0  ;;  %p4081_p10 = pnand %p3568_p7, %p162_p8 }
  0x15   : > { %s6565_s2 = sld [smem:[#allocation109_spill]]  ;;  %s197_s15 = sshll.u32 %s6545_s3, 4  ;;  %s4102_s15 = int_to_ptr.vmem [resolvable:$true] %s197_s15 }
  0x16   : > { %s6564_s30 = scalar_select %p4081_p10, 1, 0 }
  0x17   : > { %p3772_p11 = pneg %p4081_p10  ;;  %s6566_s1 = sld [smem:[#allocation108_spill]] }
  0x18   : > { %s208_s23 = sshll.u32 %s6546_s4, 4  ;;  %s209_s23 = int_to_ptr.vmem [resolvable:$true] %s208_s23 }
  0x19   : > { %p4095_p12 = pnand %p6548_p9, %p3772_p11 }
  0x1b   : > { %s186_s8 = sshll.u32 %s6565_s2, 4  ;;  %p3861_p0 = pneg %p4095_p12  ;;  %s187_s8 = int_to_ptr.vmem [resolvable:$true] %s186_s8 }
  0x1c   : > { %s3859_s25 = scalar_lea.vmem %s187_s8, 16  ;;  %p3867_p3 = scmp.lt.s32.totalorder %s187_s8, %s187_s8 }
  0x1d   : > { %s175_s11 = sshll.u32 %s6566_s1, 4  ;;  %p3860_p13 = scmp.ne.s32.totalorder %s187_s8, %s3859_s25  ;;  %s176_s11 = int_to_ptr.vmem [resolvable:$true] %s175_s11 }
  0x1e   : > { %p3868_p4 = scmp.lt.s32.totalorder %s3859_s25, %s3859_s25 }
  0x1f   : > { %p3862_p1 = pnand %p3861_p0, %p3860_p13 }
  0x20   : > { %p3869_p7 = por %p3868_p4, %p3867_p3 }
  0x21   : > { %p3863_p2 = pneg %p3862_p1 }
  0x23   : > { %p3870_p8 = pnand %p3869_p7, %p3863_p2 }
  0x25   : > { %3873 = shalt.err (!%p3870_p8)
}
  0x26   : > { %s3993_s26 = smov [#allocation5]   ;;  %s3874_s6 = scalar_lea.vmem %s176_s11, 16 }
  0x27   : > { %3778 = dma.vmem_to_smem (!%p4095_p12), %s187_s8, 16, %s3993_s26, [#allocation6]  }
  0x28   : > { %p3875_p11 = scmp.ne.s32.totalorder %s176_s11, %s3874_s6  ;;  %p3882_p5 = scmp.lt.s32.totalorder %s176_s11, %s176_s11 }
  0x29   : > { %p3883_p10 = scmp.lt.s32.totalorder %s3874_s6, %s3874_s6 }
  0x2a   : > { %p3877_p9 = pnand %p3875_p11, %p3861_p0 }
  0x2b   : > { %p3884_p13 = por %p3883_p10, %p3882_p5 }
  0x2c   : > { %p3878_p6 = pneg %p3877_p9 }
  0x2e   : > { %p3885_p1 = pnand %p3884_p13, %p3878_p6 }
  0x30   : > { %3888 = shalt.err (!%p3885_p1)
}
  0x31   : > { %s3994_s7 = smov [#allocation2]   ;;  %s3889_s8 = scalar_lea.vmem %s4102_s15, 16 }
  0x32   : > { %3775 = dma.vmem_to_smem (!%p4095_p12), %s176_s11, 16, %s3994_s7, [#allocation4]  }
  0x33   : > { %p3890_p2 = scmp.ne.s32.totalorder %s4102_s15, %s3889_s8  ;;  %p3897_p9 = scmp.lt.s32.totalorder %s4102_s15, %s4102_s15 }
  0x34   : > { %p3898_p7 = scmp.lt.s32.totalorder %s3889_s8, %s3889_s8 }
  0x35   : > { %p3892_p3 = pnand %p3890_p2, %p3861_p0 }
  0x36   : > { %p3899_p5 = por %p3898_p7, %p3897_p9 }
  0x37   : > { %p3893_p4 = pneg %p3892_p3 }
  0x39   : > { %p3900_p6 = pnand %p3899_p5, %p3893_p4 }
  0x3b   : > { %3903 = shalt.err (!%p3900_p6)
}
  0x3c   : > { %s3995_s9 = smov [#allocation7]   ;;  %s3904_s13 = scalar_lea.vmem %s209_s23, 16 }
  0x3d   : > { %3781 = dma.vmem_to_smem (!%p4095_p12), %s4102_s15, 16, %s3995_s9, [#allocation6]  }
  0x3e   : > { %p3905_p10 = scmp.ne.s32.totalorder %s209_s23, %s3904_s13  ;;  %p3912_p13 = scmp.lt.s32.totalorder %s209_s23, %s209_s23 }
  0x3f   : > { %p3913_p1 = scmp.lt.s32.totalorder %s3904_s13, %s3904_s13 }
  0x40   : > { %p3907_p8 = pnand %p3905_p10, %p3861_p0 }
  0x41   : > { %p3914_p2 = por %p3913_p1, %p3912_p13 }
  0x42   : > { %p3908_p11 = pneg %p3907_p8 }
  0x44   : > { %p3915_p3 = pnand %p3914_p2, %p3908_p11 }
  0x46   : > { %3918 = shalt.err (!%p3915_p3)
}
  0x47   : > { %s3996_s14 = smov [#allocation8]   ;;  %p6568_p4 = scmp.ne.s32.totalorder %s6564_s30, 0 }
  0x48   : > { %3784 = dma.vmem_to_smem (!%p4095_p12), %s209_s23, 16, %s3996_s14, [#allocation9]  }
  0x49   : > { %229 = sbr.rel (%p6568_p4) target bundleno = 889 (0x379), region = 40 }
  0x4e   : > { %p6569_p9 = scmp.eq.s32.totalorder %s4053_s22, 0 }
  0x50   : > { %3962 = dma.done.wait (%p6569_p9), [#allocation4], 16   ;;  %p6570_p7 = pmov %p6569_p9 }
  0x52   : > { %3964 = vsyncadd (%p6570_p7), [#allocation4], 4294967280  ;;  %p6571_p0 = pmov %p6570_p7 }
  0x54   : > { %3966 = dma.done.wait (%p6571_p0), [#allocation6], 32   ;;  %p6572_p5 = pmov %p6571_p0 }
  0x55   : > { %p6573_p6 = pmov %p6571_p0 }
  0x56   : > { %3968 = vsyncadd (%p6572_p5), [#allocation6], 4294967264 }
  0x57   : > { %3970 = dma.done.wait (%p6573_p6), [#allocation9], 16   ;;  %p6574_p12 = pmov %p6571_p0 }
  0x59   : > { %3972 = vsyncadd (%p6574_p12), [#allocation9], 4294967280 }
  0x5a   : > { %247 = sfence }
  0x5b   : > { %p270_p10 = scmp.lt.s32.totalorder %s4053_s22, 1  ;;  %s3584_s30 = sld [smem:[#allocation2 + $0x1]]  ;;  %vm445_vm0 = vcmask 1046528   ;;  %vm653_vm1 = vcmask 1045504   ;;  %vm3405_vm11 = vcmask 130048  }
  0x5c   : > { %s3585_s12 = sld [smem:[#allocation2 + $0x1c]]  ;;  %s3997_s6 = smov 127  }
  0x5d   : > { %s271_s15 = scalar_select %p270_p10, %s4053_s22, 1 }
  0x5e   : > { %s6575_s0 = sld [smem:[#allocation107_spill]]  ;;  %s6557_s11 = smov 126  }
  0x5f   : > { %s3752_s16 = smul.u32 72, %s271_s15  ;;  %s3586_s26 = sld [smem:[#allocation2 + $0x37]] }
  0x60   : > { %s3587_s7 = sld [smem:[#allocation2 + $0x2]]  ;;  %p6781_p11 = scmp.ne.s32.totalorder %s6562_s28, 0 }
  0x61   : > { %v318_v0 = vstv %s3584_s30  ;;  %s3588_s8 = sld [smem:[#allocation2 + $0x1d]] }
  0x62   : > { %v338_v3 = vstv %s3585_s12  ;;  %s3589_s9 = sld [smem:[#allocation2 + $0x38]] }
  0x63   : > { %s3593_s10 = sld [smem:[#allocation2 + $0x4]] }
  0x64   : > { %s4157_s25 = scalar_lea.vmem %s6575_s0, %s3752_s16  ;;  %s3594_s13 = sld [smem:[#allocation2 + $0x1f]] }
  0x65   : > { %v4160_v1 = vld [vmem:[%s4157_s25 + $0x10] sm:$0xf]  ;;  %v4163_v2 = vld [vmem:[%s4157_s25] sm:$0xff]  ;;  %v4166_v4 = vld [vmem:[%s4157_s25 + $0x8] sm:$0xff]  ;;  %v358_v11 = vstv %s3586_s26  ;;  %s3595_s14 = sld [smem:[#allocation2 + $0x3a]] }
  0x66   : > { %v321_v5 = vmul.f32 %v318_v0, %v4160_v1  ;;  %v319_v6 = vmul.f32 %v318_v0, %v4163_v2  ;;  %v339_v7 = vmul.f32 %v338_v3, %v4163_v2  ;;  %v320_v8 = vmul.f32 %v318_v0, %v4166_v4  ;;  %s3596_s30 = sld [smem:[#allocation2 + $0x5]] }
  0x67   : > { %v341_v9 = vmul.f32 %v338_v3, %v4160_v1  ;;  %v340_v10 = vmul.f32 %v338_v3, %v4166_v4  ;;  %v360_v12 = vmul.f32 %v358_v11, %v4166_v4  ;;  %v359_v13 = vmul.f32 %v358_v11, %v4163_v2  ;;  %s3597_s12 = sld [smem:[#allocation2 + $0x20]] }
  0x68   : > { %329 = vrot.lane.b32.xlu1 %v321_v5, %s3997_s6  ;;  %325 = vrot.lane.b32.xlu0 %v319_v6, %s3997_s6  ;;  %v378_v14 = vstv %s3587_s7  ;;  %v361_v16 = vmul.f32 %v358_v11, %v4160_v1  ;;  %v398_v19 = vstv %s3588_s8  ;;  %s3598_s15 = sld [smem:[#allocation2 + $0x3b]] }
  0x69   : > { %v379_v15 = vmul.f32 %v378_v14, %v4163_v2  ;;  %v381_v17 = vmul.f32 %v378_v14, %v4160_v1  ;;  %v380_v18 = vmul.f32 %v378_v14, %v4166_v4  ;;  %v400_v20 = vmul.f32 %v398_v19, %v4166_v4  ;;  %s3602_s16 = sld [smem:[#allocation2 + $0x7]] }
  0x6a   : > { %v399_v21 = vmul.f32 %v398_v19, %v4163_v2  ;;  %v418_v22 = vstv %s3589_s9  ;;  %v496_v23 = vstv %s3593_s10  ;;  %v401_v25 = vmul.f32 %v398_v19, %v4160_v1  ;;  %s3603_s17 = sld [smem:[#allocation2 + $0x22]] }
  0x6b   : > { %v419_v24 = vmul.f32 %v418_v22, %v4163_v2  ;;  %v498_v26 = vmul.f32 %v496_v23, %v4166_v4  ;;  %v499_v27 = vmul.f32 %v496_v23, %v4160_v1  ;;  %v497_v28 = vmul.f32 %v496_v23, %v4163_v2  ;;  %s3604_s23 = sld [smem:[#allocation2 + $0x3d]] }
  0x6c   : > { %345 = vrot.lane.b32.xlu1 %v339_v7, %s3997_s6  ;;  %327 = vrot.lane.b32.xlu0 %v320_v8, %s3997_s6  ;;  %v521_v29 = vstv %s3594_s13  ;;  %v421_v30 = vmul.f32 %v418_v22, %v4160_v1  ;;  %v420_v31 = vmul.f32 %v418_v22, %v4166_v4  ;;  %v546_v38 = vstv %s3595_s14  ;;  %s3605_s26 = sld [smem:[#allocation2 + $0x8]] }
  0x6d   : > { %v522_v32 = vmul.f32 %v521_v29, %v4163_v2  ;;  %v504_v33 = vrot.slane %v498_v26, 1  ;;  %v506_v34 = vrot.slane %v499_v27, 1  ;;  %v503_v35 = vrot.slane %v497_v28, 1  ;;  %s3606_s7 = sld [smem:[#allocation2 + $0x23]] }
  0x6e   : > { %v523_v36 = vmul.f32 %v521_v29, %v4166_v4  ;;  %v524_v37 = vmul.f32 %v521_v29, %v4160_v1  ;;  %v548_v44 = vmul.f32 %v546_v38, %v4166_v4  ;;  %v549_v46 = vmul.f32 %v546_v38, %v4160_v1  ;;  %s3607_s8 = sld [smem:[#allocation2 + $0x3e]] }
  0x6f   : > { %v507_v39 = vsel %vm445_vm0, %v504_v33, %v506_v34  ;;  %v505_v40 = vsel %vm445_vm0, %v503_v35, %v504_v33  ;;  %v528_v41 = vrot.slane %v522_v32, 1  ;;  %v547_v47 = vmul.f32 %v546_v38, %v4163_v2  ;;  %s3611_s9 = sld [smem:[#allocation2 + $0xa]] }
  0x70   : > { %349 = vrot.lane.b32.xlu1 %v341_v9, %s3997_s6  ;;  %347 = vrot.lane.b32.xlu0 %v340_v10, %s3997_s6  ;;  %v529_v42 = vrot.slane %v523_v36, 1  ;;  %v531_v43 = vrot.slane %v524_v37, 1  ;;  %v571_v48 = vstv %s3596_s30  ;;  %v554_v50 = vrot.slane %v548_v44, 1  ;;  %s3612_s10 = sld [smem:[#allocation2 + $0x25]] }
  0x71   : > { %v556_v51 = vrot.slane %v549_v46, 1  ;;  %v553_v52 = vrot.slane %v547_v47, 1  ;;  %v572_v53 = vmul.f32 %v571_v48, %v4163_v2  ;;  %v573_v54 = vmul.f32 %v571_v48, %v4166_v4  ;;  %s3613_s13 = sld [smem:[#allocation2 + $0x40]] }
  0x72   : > { %v530_v45 = vsel %vm445_vm0, %v528_v41, %v529_v42  ;;  %v532_v49 = vsel %vm445_vm0, %v529_v42, %v531_v43  ;;  %v574_v55 = vmul.f32 %v571_v48, %v4160_v1  ;;  %v596_v60 = vstv %s3597_s12  ;;  %s3614_s14 = sld [smem:[#allocation2 + $0xb]] }
  0x73   : > { %v557_v56 = vsel %vm445_vm0, %v554_v50, %v556_v51  ;;  %v555_v57 = vsel %vm445_vm0, %v553_v52, %v554_v50  ;;  %v578_v58 = vrot.slane %v572_v53, 1  ;;  %v579_v59 = vrot.slane %v573_v54, 1  ;;  %s3615_s30 = sld [smem:[#allocation2 + $0x26]] }
  0x74   : > { %367 = vrot.lane.b32.xlu1 %v360_v12, %s3997_s6  ;;  %365 = vrot.lane.b32.xlu0 %v359_v13, %s3997_s6  ;;  %v581_v61 = vrot.slane %v574_v55, 1  ;;  %v621_v62 = vstv %s3598_s15  ;;  %v598_v0 = vmul.f32 %v596_v60, %v4166_v4  ;;  %v599_v3 = vmul.f32 %v596_v60, %v4160_v1  ;;  %s3616_s12 = sld [smem:[#allocation2 + $0x41]] }
  0x75   : > { %v580_v63 = vsel %vm445_vm0, %v578_v58, %v579_v59  ;;  %v597_v5 = vmul.f32 %v596_v60, %v4163_v2  ;;  %v622_v7 = vmul.f32 %v621_v62, %v4163_v2  ;;  %v623_v11 = vmul.f32 %v621_v62, %v4166_v4  ;;  %s3620_s15 = sld [smem:[#allocation2 + $0xd]] }
  0x76   : > { %v582_v6 = vsel %vm445_vm0, %v579_v59, %v581_v61  ;;  %v604_v8 = vrot.slane %v598_v0, 1  ;;  %v606_v9 = vrot.slane %v599_v3, 1  ;;  %v624_v12 = vmul.f32 %v621_v62, %v4160_v1  ;;  %s5813_s0 = sld [smem:[#allocation7 + $0x3c]] }
  0x77   : > { %v603_v10 = vrot.slane %v597_v5, 1  ;;  %v704_v13 = vstv %s3602_s16  ;;  %v729_v23 = vstv %s3603_s17  ;;  %v754_v35 = vstv %s3604_s23  ;;  %s3621_s16 = sld [smem:[#allocation2 + $0x28]] }
  0x78   : > { %385 = vrot.lane.b32.xlu1 %v379_v15, %s6557_s11  ;;  %369 = vrot.lane.b32.xlu0 %v361_v16, %s3997_s6  ;;  %v607_v14 = vsel %vm445_vm0, %v604_v8, %v606_v9  ;;  %v628_v16 = vrot.slane %v622_v7, 1  ;;  %v706_v19 = vmul.f32 %v704_v13, %v4166_v4  ;;  %v705_v22 = vmul.f32 %v704_v13, %v4163_v2  ;;  %s3622_s17 = sld [smem:[#allocation2 + $0x43]] }
  0x79   : > { %v605_v15 = vsel %vm445_vm0, %v603_v10, %v604_v8  ;;  %v730_v28 = vmul.f32 %v729_v23, %v4163_v2  ;;  %v731_v29 = vmul.f32 %v729_v23, %v4166_v4  ;;  %v779_v37 = vstv %s3605_s26  ;;  %v4299_v10 = vld [vmem:[%s4157_s25 + $0x20] sm:$0xff]  ;;  %s3623_s23 = sld [smem:[#allocation2 + $0xe]] }
  0x7a   : > { %v711_v27 = vrot.slane %v705_v22, 2  ;;  %v755_v41 = vmul.f32 %v754_v35, %v4163_v2  ;;  %v781_v47 = vmul.f32 %v779_v37, %v4166_v4  ;;  %v782_v48 = vmul.f32 %v779_v37, %v4160_v1  ;;  %s3624_s26 = sld [smem:[#allocation2 + $0x29]] }
  0x7b   : > { %v736_v33 = vrot.slane %v730_v28, 2  ;;  %v804_v53 = vstv %s3606_s7  ;;  %v829_v55 = vstv %s3607_s8  ;;  %s3625_s7 = sld [smem:[#allocation2 + $0x44]] }
  0x7c   : > { %389 = vrot.lane.b32.xlu1 %v381_v17, %s6557_s11  ;;  %387 = vrot.lane.b32.xlu0 %v380_v18, %s6557_s11  ;;  %v629_v17 = vrot.slane %v623_v11, 1  ;;  %v631_v18 = vrot.slane %v624_v12, 1  ;;  %v761_v46 = vrot.slane %v755_v41, 2  ;;  %v787_v52 = vrot.slane %v781_v47, 2  ;;  %v4302_v12 = vld [vmem:[%s4157_s25 + $0x18] sm:$0xff]  ;;  %s3629_s8 = sld [smem:[#allocation2 + $0x10]] }
  0x7d   : > { %v789_v54 = vrot.slane %v782_v48, 2  ;;  %v807_v58 = vmul.f32 %v804_v53, %v4160_v1  ;;  %v805_v59 = vmul.f32 %v804_v53, %v4163_v2  ;;  %v831_v3 = vmul.f32 %v829_v55, %v4166_v4  ;;  %s5820_s1 = sld [smem:[#allocation7 + $0x13]] }
  0x7e   : > { %v832_v5 = vmul.f32 %v829_v55, %v4160_v1  ;;  %v878_v11 = vstv %s3611_s9  ;;  %s3630_s9 = sld [smem:[#allocation2 + $0x2b]] }
  0x7f   : > { %v790_v60 = vsel %vm653_vm1, %v787_v52, %v789_v54  ;;  %v811_v0 = vrot.slane %v805_v59, 2  ;;  %s5876_s2 = sld [smem:[#allocation7 + $0x4c]] }
  0x80   : > { %407 = vrot.lane.b32.xlu1 %v400_v20, %s6557_s11  ;;  %405 = vrot.lane.b32.xlu0 %v399_v21, %s6557_s11  ;;  %v630_v20 = vsel %vm445_vm0, %v628_v16, %v629_v17  ;;  %v707_v21 = vmul.f32 %v704_v13, %v4160_v1  ;;  %v880_v13 = vmul.f32 %v878_v11, %v4299_v10  ;;  %v4309_v16 = vld [vmem:[%s4157_s25 + $0x28] sm:$0xf] }
  0x82   : > { %v714_v26 = vrot.slane %v707_v21, 2  ;;  %v918_v21 = vstv %s3613_s13  ;;  %s3632_s13 = sld [smem:[#allocation2 + $0x11]] }
  0x84   : > { %425 = vrot.lane.b32.xlu1 %v419_v24, %s6557_s11  ;;  %409 = vrot.lane.b32.xlu0 %v401_v25, %s6557_s11  ;;  %v632_v24 = vsel %vm445_vm0, %v629_v17, %v631_v18  ;;  %v712_v25 = vrot.slane %v706_v19, 2 }
  0x86   : > { %v713_v32 = vsel %vm653_vm1, %v711_v27, %v712_v25 }
  0x88   : > { %429 = vrot.lane.b32.xlu1 %v421_v30, %s6557_s11  ;;  %427 = vrot.lane.b32.xlu0 %v420_v31, %s6557_s11  ;;  %v732_v30 = vmul.f32 %v729_v23, %v4160_v1  ;;  %v715_v31 = vsel %vm653_vm1, %v712_v25, %v714_v26  ;;  %v919_v25 = vmul.f32 %v918_v21, %v4302_v12 }
  0x8a   : > { %v739_v36 = vrot.slane %v732_v30, 2  ;;  %v921_v30 = vmul.f32 %v918_v21, %v4309_v16 }
  0x8c   : > { %510 = vrot.lane.b32.xlu1 %v507_v39, %s3997_s6  ;;  %508 = vrot.lane.b32.xlu0 %v505_v40, %s3997_s6  ;;  %v756_v39 = vmul.f32 %v754_v35, %v4166_v4  ;;  %v757_v40 = vmul.f32 %v754_v35, %v4160_v1  ;;  %v958_v35 = vstv %s3615_s30  ;;  %s3634_s30 = sld [smem:[#allocation2 + $0x47]] }
  0x8e   : > { %v762_v44 = vrot.slane %v756_v39, 2  ;;  %v959_v39 = vmul.f32 %v958_v35, %v4302_v12 }
  0x90   : > { %533 = vrot.lane.b32.xlu1 %v530_v45, %s3997_s6  ;;  %512 = vrot.lane.b32.xlu0 %v506_v34, %s3997_s6  ;;  %v737_v34 = vrot.slane %v731_v29, 2  ;;  %v764_v45 = vrot.slane %v757_v40, 2  ;;  %v763_v50 = vsel %vm653_vm1, %v761_v46, %v762_v44  ;;  %v978_v40 = vstv %s3616_s12  ;;  %s3638_s12 = sld [smem:[#allocation2 + $0x13]] }
  0x92   : > { %v738_v38 = vsel %vm653_vm1, %v736_v33, %v737_v34  ;;  %v740_v42 = vsel %vm653_vm1, %v737_v34, %v739_v36 }
  0x94   : > { %537 = vrot.lane.b32.xlu1 %v531_v43, %s3997_s6  ;;  %535 = vrot.lane.b32.xlu0 %v532_v49, %s3997_s6  ;;  %v780_v43 = vmul.f32 %v779_v37, %v4163_v2  ;;  %v765_v49 = vsel %vm653_vm1, %v762_v44, %v764_v45  ;;  %v979_v44 = vmul.f32 %v978_v40, %v4302_v12 }
  0x98   : > { %560 = vrot.lane.b32.xlu1 %v557_v56, %s3997_s6  ;;  %558 = vrot.lane.b32.xlu0 %v555_v57, %s3997_s6  ;;  %v806_v57 = vmul.f32 %v804_v53, %v4166_v4  ;;  %v839_v4 = vrot.slane %v832_v5, 2  ;;  %v980_v53 = vmul.f32 %v978_v40, %v4299_v10  ;;  %v1105_v5 = vstv %s3622_s17  ;;  %s3641_s17 = sld [smem:[#allocation2 + $0x14]] }
  0x9a   : > { %v812_v62 = vrot.slane %v806_v57, 2 }
  0x9c   : > { %583 = vrot.lane.b32.xlu1 %v580_v63, %s6557_s11  ;;  %562 = vrot.lane.b32.xlu0 %v556_v51, %s3997_s6  ;;  %v786_v51 = vrot.slane %v780_v43, 2  ;;  %v814_v63 = vrot.slane %v807_v58, 2  ;;  %v813_v7 = vsel %vm653_vm1, %v811_v0, %v812_v62  ;;  %v1055_v43 = vstv %s3620_s15  ;;  %s3639_s15 = sld [smem:[#allocation2 + $0x2e]] }
  0x9d   : > { %v1057_v46 = vmul.f32 %v1055_v43, %v4299_v10  ;;  %v1058_v47 = vmul.f32 %v1055_v43, %v4309_v16  ;;  %v1056_v48 = vmul.f32 %v1055_v43, %v4302_v12  ;;  %v1180_v43 = vstv %s3625_s7  ;;  %s3647_s7 = sld [smem:[#allocation2 + $0x16]] }
  0x9e   : > { %v788_v56 = vsel %vm653_vm1, %v786_v51, %v787_v52  ;;  %v981_v52 = vmul.f32 %v978_v40, %v4309_v16 }
  0x9f   : > { %v1062_v57 = vrot.slane %v1056_v48, 1 }
  0xa0   : > { %587 = vrot.lane.b32.xlu1 %v581_v61, %s6557_s11  ;;  %585 = vrot.lane.b32.xlu0 %v582_v6, %s6557_s11  ;;  %v830_v61 = vmul.f32 %v829_v55, %v4163_v2  ;;  %v815_v6 = vsel %vm653_vm1, %v812_v62, %v814_v63  ;;  %v1063_v55 = vrot.slane %v1057_v46, 1 }
  0xa2   : > { %v836_v8 = vrot.slane %v830_v61, 2  ;;  %v1064_v0 = vsel %vm445_vm0, %v1062_v57, %v1063_v55  ;;  %v1182_v57 = vmul.f32 %v1180_v43, %v4299_v10 }
  0xa4   : > { %610 = vrot.lane.b32.xlu1 %v607_v14, %s6557_s11  ;;  %608 = vrot.lane.b32.xlu0 %v605_v15, %s6557_s11  ;;  %v879_v14 = vmul.f32 %v878_v11, %v4302_v12  ;;  %v898_v15 = vstv %s3612_s10  ;;  %s3631_s10 = sld [smem:[#allocation2 + $0x46]] }
  0xa5   : > { %v899_v17 = vmul.f32 %v898_v15, %v4302_v12  ;;  %v901_v19 = vmul.f32 %v898_v15, %v4309_v16 }
  0xa8   : > { %633 = vrot.lane.b32.xlu1 %v630_v20, %s6557_s11  ;;  %612 = vrot.lane.b32.xlu0 %v606_v9, %s6557_s11  ;;  %v837_v9 = vrot.slane %v831_v3, 2  ;;  %v900_v20 = vmul.f32 %v898_v15, %v4299_v10 }
  0xaa   : > { %v838_v2 = vsel %vm653_vm1, %v836_v8, %v837_v9  ;;  %v840_v1 = vsel %vm653_vm1, %v837_v9, %v839_v4  ;;  %v1107_v9 = vmul.f32 %v1105_v5, %v4299_v10 }
  0xac   : > { %637 = vrot.lane.b32.xlu1 %v631_v18, %s6557_s11  ;;  %635 = vrot.lane.b32.xlu0 %v632_v24, %s6557_s11  ;;  %v881_v18 = vmul.f32 %v878_v11, %v4309_v16  ;;  %v920_v24 = vmul.f32 %v918_v21, %v4299_v10 }
  0xb0   : > { %718 = vrot.lane.b32.xlu1 %v715_v31, %s3997_s6  ;;  %716 = vrot.lane.b32.xlu0 %v713_v32, %s3997_s6 }
  0xb4   : > { %741 = vrot.lane.b32.xlu1 %v738_v38, %s3997_s6  ;;  %720 = vrot.lane.b32.xlu0 %v714_v26, %s3997_s6  ;;  %v938_v26 = vstv %s3614_s14  ;;  %v960_v38 = vmul.f32 %v958_v35, %v4299_v10  ;;  %s3633_s14 = sld [smem:[#allocation2 + $0x2c]] }
  0xb5   : > { %v939_v29 = vmul.f32 %v938_v26, %v4302_v12  ;;  %v941_v33 = vmul.f32 %v938_v26, %v4309_v16  ;;  %v940_v34 = vmul.f32 %v938_v26, %v4299_v10 }
  0xb8   : > { %745 = vrot.lane.b32.xlu1 %v739_v36, %s3997_s6  ;;  %743 = vrot.lane.b32.xlu0 %v740_v42, %s3997_s6 }
  0xbc   : > { %768 = vrot.lane.b32.xlu1 %v765_v49, %s3997_s6  ;;  %766 = vrot.lane.b32.xlu0 %v763_v50, %s3997_s6  ;;  %v1080_v49 = vstv %s3621_s16  ;;  %s3640_s16 = sld [smem:[#allocation2 + $0x49]] }
  0xbd   : > { %v1082_v58 = vmul.f32 %v1080_v49, %v4299_v10  ;;  %v1083_v62 = vmul.f32 %v1080_v49, %v4309_v16 }
  0xbf   : > { %v1088_v3 = vrot.slane %v1082_v58, 1  ;;  %v1090_v8 = vrot.slane %v1083_v62, 1  ;;  %v1183_v62 = vmul.f32 %v1180_v43, %v4309_v16 }
  0xc0   : > { %791 = vrot.lane.b32.xlu1 %v788_v56, %s6557_s11  ;;  %770 = vrot.lane.b32.xlu0 %v764_v45, %s3997_s6  ;;  %v961_v45 = vmul.f32 %v958_v35, %v4309_v16  ;;  %v1065_v56 = vrot.slane %v1058_v47, 1 }
  0xc1   : > { %v1091_v15 = vsel %vm445_vm0, %v1088_v3, %v1090_v8 }
  0xc4   : > { %795 = vrot.lane.b32.xlu1 %v789_v54, %s6557_s11  ;;  %793 = vrot.lane.b32.xlu0 %v790_v60, %s6557_s11  ;;  %v1081_v54 = vmul.f32 %v1080_v49, %v4302_v12 }
  0xc6   : > { %v1087_v61 = vrot.slane %v1081_v54, 1 }
  0xc8   : > { %818 = vrot.lane.b32.xlu1 %v815_v6, %s6557_s11  ;;  %816 = vrot.lane.b32.xlu0 %v813_v7, %s6557_s11 }
  0xcc   : > { %841 = vrot.lane.b32.xlu1 %v838_v2, %s6557_s11  ;;  %820 = vrot.lane.b32.xlu0 %v814_v63, %s6557_s11  ;;  %v1066_v63 = vsel %vm445_vm0, %v1063_v55, %v1065_v56  ;;  %v1089_v2 = vsel %vm445_vm0, %v1087_v61, %v1088_v3 }
  0xd0   : > { %845 = vrot.lane.b32.xlu1 %v839_v4, %s6557_s11  ;;  %843 = vrot.lane.b32.xlu0 %v840_v1, %s6557_s11  ;;  %v1108_v4 = vmul.f32 %v1105_v5, %v4309_v16  ;;  %v1106_v1 = vmul.f32 %v1105_v5, %v4302_v12  ;;  %v1188_v5 = vrot.slane %v1182_v57, 1 }
  0xd4   : > { %887 = vrot.lane.b32.xlu1 %v880_v13, %s3997_s6  ;;  %885 = vrot.lane.b32.xlu0 %v879_v14, %s3997_s6  ;;  %v1130_v14 = vstv %s3623_s23  ;;  %s3642_s23 = sld [smem:[#allocation2 + $0x2f]] }
  0xd5   : > { %v1132_v21 = vmul.f32 %v1130_v14, %v4299_v10  ;;  %v1133_v26 = vmul.f32 %v1130_v14, %v4309_v16 }
  0xd7   : > { %v1140_v40 = vrot.slane %v1133_v26, 1 }
  0xd8   : > { %905 = vrot.lane.b32.xlu1 %v899_v17, %s3997_s6  ;;  %889 = vrot.lane.b32.xlu0 %v881_v18, %s3997_s6  ;;  %v1113_v17 = vrot.slane %v1107_v9, 1  ;;  %v1115_v18 = vrot.slane %v1108_v4, 1  ;;  %v1190_v4 = vrot.slane %v1183_v62, 1 }
  0xda   : > { %v4319_v22 = vpop.permute.xlu1 %329  ;;  %v4321_v23 = vpop.permute.xlu0 %325 }
  0xdc   : > { %909 = vrot.lane.b32.xlu1 %v901_v19, %s3997_s6  ;;  %907 = vrot.lane.b32.xlu0 %v900_v20, %s3997_s6  ;;  %v1112_v19 = vrot.slane %v1106_v1, 1  ;;  %v1131_v20 = vmul.f32 %v1130_v14, %v4302_v12  ;;  %v1287_v1 = vstv %s3630_s9  ;;  %s3649_s9 = sld [smem:[#allocation2 + $0x4c]] }
  0xdd   : > { %v1289_v26 = vmul.f32 %v1287_v1, %v4299_v10 }
  0xde   : > { %v4327_v27 = vpop.permute.xlu1 %345  ;;  %v4329_v28 = vpop.permute.xlu0 %327 }
  0xdf   : > { %6576 = vst [vmem:[#allocation15_spill] sm:$0xff] %v4327_v27 }
  0xe0   : > { %927 = vrot.lane.b32.xlu1 %v920_v24, %s3997_s6  ;;  %925 = vrot.lane.b32.xlu0 %v919_v25, %s3997_s6 }
  0xe2   : > { %v4335_v31 = vpop.permute.xlu1 %349  ;;  %v4337_v32 = vpop.permute.xlu0 %347 }
  0xe3   : > { %6577 = vst [vmem:[#allocation16_spill] sm:$0xff] %v4335_v31  ;;  %6578 = vst [vmem:[#allocation17_spill] sm:$0xff] %v4337_v32 }
  0xe4   : > { %945 = vrot.lane.b32.xlu1 %v939_v29, %s6557_s11  ;;  %929 = vrot.lane.b32.xlu0 %v921_v30, %s3997_s6  ;;  %v1116_v29 = vsel %vm445_vm0, %v1113_v17, %v1115_v18  ;;  %v1114_v30 = vsel %vm445_vm0, %v1112_v19, %v1113_v17 }
  0xe6   : > { %v4343_v36 = vpop.permute.xlu1 %367  ;;  %v4345_v37 = vpop.permute.xlu0 %365 }
  0xe7   : > { %6579 = vst [vmem:[#allocation18_spill] sm:$0xff] %v4343_v36  ;;  %6580 = vst [vmem:[#allocation19_spill] sm:$0xff] %v4345_v37 }
  0xe8   : > { %949 = vrot.lane.b32.xlu1 %v941_v33, %s6557_s11  ;;  %947 = vrot.lane.b32.xlu0 %v940_v34, %s6557_s11  ;;  %v1137_v33 = vrot.slane %v1131_v20, 1  ;;  %v1138_v34 = vrot.slane %v1132_v21, 1  ;;  %v1288_v21 = vmul.f32 %v1287_v1, %v4302_v12 }
  0xea   : > { %v4351_v41 = vpop.permute.xlu1 %385  ;;  %v4353_v42 = vpop.permute.xlu0 %369 }
  0xeb   : > { %6581 = vst [vmem:[#allocation20_spill] sm:$0xff] %v4353_v42 }
  0xec   : > { %967 = vrot.lane.b32.xlu1 %v960_v38, %s6557_s11  ;;  %965 = vrot.lane.b32.xlu0 %v959_v39, %s6557_s11  ;;  %v1155_v39 = vstv %s3624_s26  ;;  %s3643_s26 = sld [smem:[#allocation2 + $0x4a]] }
  0xed   : > { %v1158_v46 = vmul.f32 %v1155_v39, %v4309_v16  ;;  %v1156_v47 = vmul.f32 %v1155_v39, %v4302_v12 }
  0xee   : > { %v4362_v50 = vpop.permute.xlu1 %389  ;;  %v4364_v51 = vpop.permute.xlu0 %387 }
  0xef   : > { %v1165_v55 = vrot.slane %v1158_v46, 1 }
  0xf0   : > { %985 = vrot.lane.b32.xlu1 %v979_v44, %s6557_s11  ;;  %969 = vrot.lane.b32.xlu0 %v961_v45, %s6557_s11  ;;  %v1139_v44 = vsel %vm445_vm0, %v1137_v33, %v1138_v34  ;;  %v1157_v45 = vmul.f32 %v1155_v39, %v4299_v10 }
  0xf2   : > { %v4372_v59 = vpop.permute.xlu1 %407  ;;  %v4374_v60 = vpop.permute.xlu0 %405  ;;  %v1163_v54 = vrot.slane %v1157_v45, 1 }
  0xf3   : > { %6582 = vst [vmem:[#allocation21_spill] sm:$0xff] %v4372_v59  ;;  %6583 = vst [vmem:[#allocation22_spill] sm:$0xff] %v4374_v60 }
  0xf4   : > { %989 = vrot.lane.b32.xlu1 %v981_v52, %s6557_s11  ;;  %987 = vrot.lane.b32.xlu0 %v980_v53, %s6557_s11  ;;  %v1141_v52 = vsel %vm445_vm0, %v1138_v34, %v1140_v40  ;;  %v1181_v53 = vmul.f32 %v1180_v43, %v4302_v12  ;;  %v1294_v43 = vrot.slane %v1288_v21, 2 }
  0xf6   : > { %v4381_v6 = vpop.permute.xlu1 %425  ;;  %v4383_v7 = vpop.permute.xlu0 %409  ;;  %v1187_v3 = vrot.slane %v1181_v53, 1 }
  0xf7   : > { %6584 = vst [vmem:[#allocation23_spill] sm:$0xff] %v4381_v6  ;;  %6585 = vst [vmem:[#allocation24_spill] sm:$0xff] %v4383_v7 }
  0xf8   : > { %1069 = vrot.lane.b32.xlu1 %v1066_v63, %s3997_s6  ;;  %1067 = vrot.lane.b32.xlu0 %v1064_v0, %s3997_s6  ;;  %v1166_v63 = vsel %vm445_vm0, %v1163_v54, %v1165_v55  ;;  %v1189_v14 = vsel %vm445_vm0, %v1187_v3, %v1188_v5 }
  0xfa   : > { %v4391_v11 = vpop.permute.xlu1 %429  ;;  %v4393_v13 = vpop.permute.xlu0 %427 }
  0xfb   : > { %6586 = vst [vmem:[#allocation25_spill] sm:$0xff] %v4391_v11  ;;  %6587 = vst [vmem:[#allocation26_spill] sm:$0xff] %v4393_v13 }
  0xfc   : > { %1092 = vrot.lane.b32.xlu1 %v1089_v2, %s3997_s6  ;;  %1071 = vrot.lane.b32.xlu0 %v1065_v56, %s3997_s6  ;;  %v1162_v56 = vrot.slane %v1156_v47, 1  ;;  %v1262_v2 = vstv %s3629_s8  ;;  %v1290_v47 = vmul.f32 %v1287_v1, %v4309_v16  ;;  %s3648_s8 = sld [smem:[#allocation2 + $0x31]] }
  0xfd   : > { %v1265_v17 = vmul.f32 %v1262_v2, %v4309_v16 }
  0xfe   : > { %v4400_v24 = vpop.permute.xlu1 %510  ;;  %v4402_v25 = vpop.permute.xlu0 %508  ;;  %v1164_v0 = vsel %vm445_vm0, %v1162_v56, %v1163_v54  ;;  %v1297_v62 = vrot.slane %v1290_v47, 2  ;;  %v1387_v47 = vstv %s3634_s30  ;;  %s3656_s30 = sld [smem:[#allocation2 + $0x19]] }
  0xff   : > { %v1272_v33 = vrot.slane %v1265_v17, 2 }
 0x100   : > { %1096 = vrot.lane.b32.xlu1 %v1090_v8, %s3997_s6  ;;  %1094 = vrot.lane.b32.xlu0 %v1091_v15, %s3997_s6  ;;  %v1264_v15 = vmul.f32 %v1262_v2, %v4299_v10 }
 0x102   : > { %v4409_v35 = vpop.permute.xlu1 %533  ;;  %v4411_v38 = vpop.permute.xlu0 %512 }
 0x103   : > { %6588 = vst [vmem:[#allocation27_spill] sm:$0xff] %v4409_v35 }
 0x104   : > { %1119 = vrot.lane.b32.xlu1 %v1116_v29, %s3997_s6  ;;  %1117 = vrot.lane.b32.xlu0 %v1114_v30, %s3997_s6  ;;  %v1191_v29 = vsel %vm445_vm0, %v1188_v5, %v1190_v4  ;;  %v1270_v30 = vrot.slane %v1264_v15, 2  ;;  %v1337_v5 = vstv %s3632_s13  ;;  %s3651_s13 = sld [smem:[#allocation2 + $0x32]] }
 0x105   : > { %v1338_v15 = vmul.f32 %v1337_v5, %v4302_v12  ;;  %v1339_v17 = vmul.f32 %v1337_v5, %v4299_v10 }
 0x106   : > { %v4419_v48 = vpop.permute.xlu1 %537  ;;  %v4421_v49 = vpop.permute.xlu0 %535  ;;  %v1273_v45 = vsel %vm653_vm1, %v1270_v30, %v1272_v33 }
 0x107   : > { %6589 = vst [vmem:[#allocation28_spill] sm:$0xff] %v4419_v48  ;;  %6590 = vst [vmem:[#allocation29_spill] sm:$0xff] %v4421_v49  ;;  %v4833_v49 = vld [vmem:[%s4157_s25 + $0x10] sm:$0xf] }
 0x108   : > { %1142 = vrot.lane.b32.xlu1 %v1139_v44, %s6557_s11  ;;  %1121 = vrot.lane.b32.xlu0 %v1115_v18, %s3997_s6  ;;  %v1263_v18 = vmul.f32 %v1262_v2, %v4302_v12  ;;  %v1295_v44 = vrot.slane %v1289_v26, 2 }
 0x10a   : > { %v4428_v58 = vpop.permute.xlu1 %560  ;;  %v4430_v61 = vpop.permute.xlu0 %558  ;;  %v1269_v34 = vrot.slane %v1263_v18, 2  ;;  %v1296_v57 = vsel %vm653_vm1, %v1294_v43, %v1295_v44  ;;  %v1298_v1 = vsel %vm653_vm1, %v1295_v44, %v1297_v62  ;;  %v1340_v43 = vmul.f32 %v1337_v5, %v4309_v16 }
 0x10b   : > { %6591 = vst [vmem:[#allocation30_spill] sm:$0xff] %v4428_v58  ;;  %6592 = vst [vmem:[#allocation31_spill] sm:$0xff] %v4430_v61 }
 0x10c   : > { %1146 = vrot.lane.b32.xlu1 %v1140_v40, %s6557_s11  ;;  %1144 = vrot.lane.b32.xlu0 %v1141_v52, %s6557_s11  ;;  %v1271_v46 = vsel %vm653_vm1, %v1269_v34, %v1270_v30  ;;  %v1312_v52 = vstv %s3631_s10  ;;  %v1345_v34 = vrot.slane %v1339_v17, 2  ;;  %v1389_v17 = vmul.f32 %v1387_v47, %v4299_v10  ;;  %s3650_s10 = sld [smem:[#allocation2 + $0x17]] }
 0x10d   : > { %v1315_v56 = vmul.f32 %v1312_v52, %v4309_v16 }
 0x10e   : > { %v4437_v8 = vpop.permute.xlu1 %583  ;;  %v4439_v9 = vpop.permute.xlu0 %562 }
 0x10f   : > { %6593 = vst [vmem:[#allocation32_spill] sm:$0xff] %v4439_v9 }
 0x110   : > { %1169 = vrot.lane.b32.xlu1 %v1166_v63, %s6557_s11  ;;  %1167 = vrot.lane.b32.xlu0 %v1164_v0, %s6557_s11  ;;  %v1313_v63 = vmul.f32 %v1312_v52, %v4302_v12 }
 0x112   : > { %v4447_v19 = vpop.permute.xlu1 %587  ;;  %v4449_v20 = vpop.permute.xlu0 %585 }
 0x114   : > { %1192 = vrot.lane.b32.xlu1 %v1189_v14, %s6557_s11  ;;  %1171 = vrot.lane.b32.xlu0 %v1165_v55, %s6557_s11  ;;  %v1314_v55 = vmul.f32 %v1312_v52, %v4299_v10  ;;  %v1319_v14 = vrot.slane %v1313_v63, 2 }
 0x116   : > { %v4456_v39 = vpop.permute.xlu1 %610  ;;  %v4458_v40 = vpop.permute.xlu0 %608  ;;  %v1320_v2 = vrot.slane %v1314_v55, 2  ;;  %v1347_v55 = vrot.slane %v1340_v43, 2 }
 0x117   : > { %6594 = vst [vmem:[#allocation33_spill] sm:$0xff] %v4456_v39  ;;  %6595 = vst [vmem:[#allocation34_spill] sm:$0xff] %v4458_v40 }
 0x118   : > { %1196 = vrot.lane.b32.xlu1 %v1190_v4, %s6557_s11  ;;  %1194 = vrot.lane.b32.xlu0 %v1191_v29, %s6557_s11  ;;  %v1322_v4 = vrot.slane %v1315_v56, 2  ;;  %v1362_v29 = vstv %s3633_s14  ;;  %v1321_v30 = vsel %vm653_vm1, %v1319_v14, %v1320_v2  ;;  %s3652_s14 = sld [smem:[#allocation2 + $0x4d]] }
 0x119   : > { %v1365_v56 = vmul.f32 %v1362_v29, %v4309_v16 }
 0x11a   : > { %v4465_v53 = vpop.permute.xlu1 %633  ;;  %v4467_v54 = vpop.permute.xlu0 %612  ;;  %v1323_v26 = vsel %vm653_vm1, %v1320_v2, %v1322_v4  ;;  %v1388_v2 = vmul.f32 %v1387_v47, %v4302_v12 }
 0x11b   : > { %6596 = vst [vmem:[#allocation35_spill] sm:$0xff] %v4465_v53  ;;  %6597 = vst [vmem:[#allocation36_spill] sm:$0xff] %v4467_v54  ;;  %v1372_v14 = vrot.slane %v1365_v56, 2  ;;  %v1536_v53 = vstv %s3643_s26  ;;  %s293_s26 = sld [smem:[#allocation2]] }
 0x11c   : > { %1276 = vrot.lane.b32.xlu1 %v1273_v45, %s3997_s6  ;;  %1274 = vrot.lane.b32.xlu0 %v1271_v46, %s3997_s6  ;;  %v1364_v46 = vmul.f32 %v1362_v29, %v4299_v10 }
 0x11e   : > { %v4475_v0 = vpop.permute.xlu1 %637  ;;  %v4477_v3 = vpop.permute.xlu0 %635  ;;  %v1370_v5 = vrot.slane %v1364_v46, 2 }
 0x11f   : > { %6598 = vst [vmem:[#allocation37_spill] sm:$0xff] %v4475_v0  ;;  %6599 = vst [vmem:[#allocation38_spill] sm:$0xff] %v4477_v3  ;;  %v1516_v3 = vstv %s3642_s23  ;;  %s3661_s23 = sld [smem:[#allocation2 + $0x50]] }
 0x120   : > { %1299 = vrot.lane.b32.xlu1 %v1296_v57, %s3997_s6  ;;  %1278 = vrot.lane.b32.xlu0 %v1272_v33, %s3997_s6  ;;  %v1344_v33 = vrot.slane %v1338_v15, 2  ;;  %v1363_v57 = vmul.f32 %v1362_v29, %v4302_v12  ;;  %v1395_v12 = vrot.slane %v1389_v17, 2 }
 0x122   : > { %v4484_v18 = vpop.permute.xlu1 %718  ;;  %v4486_v21 = vpop.permute.xlu0 %716  ;;  %v1346_v52 = vsel %vm653_vm1, %v1344_v33, %v1345_v34  ;;  %v1369_v15 = vrot.slane %v1363_v57, 2  ;;  %v1436_v57 = vstv %s3638_s12  ;;  %s3657_s12 = sld [smem:[#allocation2 + $0x34]] }
 0x124   : > { %1303 = vrot.lane.b32.xlu1 %v1297_v62, %s3997_s6  ;;  %1301 = vrot.lane.b32.xlu0 %v1298_v1, %s3997_s6  ;;  %v1348_v1 = vsel %vm653_vm1, %v1345_v34, %v1347_v55  ;;  %v1371_v33 = vsel %vm653_vm1, %v1369_v15, %v1370_v5  ;;  %v1390_v34 = vmul.f32 %v1387_v47, %v4309_v16  ;;  %v4536_v47 = vld [vmem:[%s4157_s25 + $0x38] sm:$0xff] }
 0x125   : > { %v1438_v15 = vmul.f32 %v1436_v57, %v4536_v47 }
 0x126   : > { %v4493_v44 = vpop.permute.xlu1 %741  ;;  %v4495_v45 = vpop.permute.xlu0 %720 }
 0x127   : > { %6600 = vst [vmem:[#allocation39_spill] sm:$0xff] %v4493_v44 }
 0x128   : > { %1326 = vrot.lane.b32.xlu1 %v1323_v26, %s3997_s6  ;;  %1324 = vrot.lane.b32.xlu0 %v1321_v30, %s3997_s6  ;;  %v1394_v30 = vrot.slane %v1388_v2, 2 }
 0x12a   : > { %v4503_v62 = vpop.permute.xlu1 %745  ;;  %v4505_v63 = vpop.permute.xlu0 %743  ;;  %v1396_v46 = vsel %vm653_vm1, %v1394_v30, %v1395_v12  ;;  %v4550_v30 = vld [vmem:[%s4157_s25 + $0x40] sm:$0xf] }
 0x12b   : > { %6601 = vst [vmem:[#allocation40_spill] sm:$0xff] %v4503_v62  ;;  %6602 = vst [vmem:[#allocation41_spill] sm:$0xff] %v4505_v63 }
 0x12c   : > { %1349 = vrot.lane.b32.xlu1 %v1346_v52, %s6557_s11  ;;  %1328 = vrot.lane.b32.xlu0 %v1322_v4, %s3997_s6  ;;  %v1373_v4 = vsel %vm653_vm1, %v1370_v5, %v1372_v14  ;;  %v1397_v52 = vrot.slane %v1390_v34, 2  ;;  %v4539_v5 = vld [vmem:[%s4157_s25 + $0x30] sm:$0xff]  ;;  %v1439_v34 = vmul.f32 %v1436_v57, %v4550_v30 }
 0x12d   : > { %v1437_v17 = vmul.f32 %v1436_v57, %v4539_v5 }
 0x12e   : > { %v4512_v26 = vpop.permute.xlu1 %768  ;;  %v4514_v29 = vpop.permute.xlu0 %766  ;;  %v1398_v16 = vsel %vm653_vm1, %v1395_v12, %v1397_v52 }
 0x12f   : > { %6603 = vst [vmem:[#allocation42_spill] sm:$0xff] %v4512_v26  ;;  %6604 = vst [vmem:[#allocation43_spill] sm:$0xff] %v4514_v29 }
 0x130   : > { %1353 = vrot.lane.b32.xlu1 %v1347_v55, %s6557_s11  ;;  %1351 = vrot.lane.b32.xlu0 %v1348_v1, %s6557_s11 }
 0x132   : > { %v4521_v10 = vpop.permute.xlu1 %791  ;;  %v4523_v43 = vpop.permute.xlu0 %770 }
 0x133   : > { %6605 = vst [vmem:[#allocation44_spill] sm:$0xff] %v4523_v43 }
 0x134   : > { %1376 = vrot.lane.b32.xlu1 %v1373_v4, %s6557_s11  ;;  %1374 = vrot.lane.b32.xlu0 %v1371_v33, %s6557_s11 }
 0x136   : > { %v4528_v55 = vpop.permute.xlu1 %795  ;;  %v4530_v56 = vpop.permute.xlu0 %793 }
 0x138   : > { %1399 = vrot.lane.b32.xlu1 %v1396_v46, %s6557_s11  ;;  %1378 = vrot.lane.b32.xlu0 %v1372_v14, %s6557_s11  ;;  %v1456_v14 = vstv %s3639_s15  ;;  %s3658_s15 = sld [smem:[#allocation2 + $0x4f]] }
 0x139   : > { %v1457_v12 = vmul.f32 %v1456_v14, %v4539_v5 }
 0x13a   : > { %v4541_v2 = vpop.permute.xlu1 %818  ;;  %v4543_v1 = vpop.permute.xlu0 %816 }
 0x13b   : > { %6606 = vst [vmem:[#allocation45_spill] sm:$0xff] %v4541_v2  ;;  %6607 = vst [vmem:[#allocation46_spill] sm:$0xff] %v4543_v1 }
 0x13c   : > { %1403 = vrot.lane.b32.xlu1 %v1397_v52, %s6557_s11  ;;  %1401 = vrot.lane.b32.xlu0 %v1398_v16, %s6557_s11  ;;  %v1459_v16 = vmul.f32 %v1456_v14, %v4550_v30 }
 0x13e   : > { %v4552_v4 = vpop.permute.xlu1 %841  ;;  %v4554_v33 = vpop.permute.xlu0 %820 }
 0x13f   : > { %6608 = vst [vmem:[#allocation47_spill] sm:$0xff] %v4552_v4  ;;  %6609 = vst [vmem:[#allocation48_spill] sm:$0xff] %v4554_v33  ;;  %v1458_v4 = vmul.f32 %v1456_v14, %v4536_v47  ;;  %v1539_v33 = vmul.f32 %v1536_v53, %v4550_v30 }
 0x140   : > { %1445 = vrot.lane.b32.xlu1 %v1438_v15, %s3997_s6  ;;  %1443 = vrot.lane.b32.xlu0 %v1437_v17, %s3997_s6  ;;  %v1476_v15 = vstv %s3640_s16  ;;  %s3659_s16 = sld [smem:[#allocation2 + $0x1a]] }
 0x141   : > { %v1478_v57 = vmul.f32 %v1476_v15, %v4536_v47 }
 0x142   : > { %v4560_v46 = vpop.permute.xlu1 %845  ;;  %v4562_v52 = vpop.permute.xlu0 %843 }
 0x143   : > { %6610 = vst [vmem:[#allocation49_spill] sm:$0xff] %v4560_v46  ;;  %6611 = vst [vmem:[#allocation50_spill] sm:$0xff] %v4562_v52  ;;  %v1477_v52 = vmul.f32 %v1476_v15, %v4539_v5 }
 0x144   : > { %1463 = vrot.lane.b32.xlu1 %v1457_v12, %s3997_s6  ;;  %1447 = vrot.lane.b32.xlu0 %v1439_v34, %s3997_s6  ;;  %v1496_v12 = vstv %s3641_s17  ;;  %s3660_s17 = sld [smem:[#allocation2 + $0x35]] }
 0x145   : > { %v1497_v14 = vmul.f32 %v1496_v12, %v4539_v5  ;;  %v1499_v29 = vmul.f32 %v1496_v12, %v4550_v30 }
 0x146   : > { %v4568_v43 = vpop.permute.xlu1 %887  ;;  %v4570_v17 = vpop.permute.xlu0 %885 }
 0x148   : > { %1467 = vrot.lane.b32.xlu1 %v1459_v16, %s3997_s6  ;;  %1465 = vrot.lane.b32.xlu0 %v1458_v4, %s3997_s6  ;;  %v1479_v16 = vmul.f32 %v1476_v15, %v4550_v30  ;;  %v1518_v15 = vmul.f32 %v1516_v3, %v4536_v47 }
 0x14a   : > { %v4576_v34 = vpop.permute.xlu1 %905  ;;  %v4578_v46 = vpop.permute.xlu0 %889 }
 0x14b   : > { %6612 = vst [vmem:[#allocation51_spill] sm:$0xff] %v4576_v34 }
 0x14c   : > { %1485 = vrot.lane.b32.xlu1 %v1478_v57, %s3997_s6  ;;  %1483 = vrot.lane.b32.xlu0 %v1477_v52, %s3997_s6  ;;  %v1498_v57 = vmul.f32 %v1496_v12, %v4536_v47  ;;  %v1537_v12 = vmul.f32 %v1536_v53, %v4539_v5 }
 0x14e   : > { %v4584_v4 = vpop.permute.xlu1 %909  ;;  %v4586_v26 = vpop.permute.xlu0 %907 }
 0x14f   : > { %6613 = vst [vmem:[#allocation52_spill] sm:$0xff] %v4584_v4  ;;  %6614 = vst [vmem:[#allocation53_spill] sm:$0xff] %v4586_v26 }
 0x150   : > { %1503 = vrot.lane.b32.xlu1 %v1497_v14, %s6557_s11  ;;  %1487 = vrot.lane.b32.xlu0 %v1479_v16, %s3997_s6  ;;  %v1517_v14 = vmul.f32 %v1516_v3, %v4539_v5  ;;  %v1613_v16 = vstv %s3647_s7  ;;  %s3590_s7 = sld [smem:[#allocation2 + $0x3]] }
 0x152   : > { %v4592_v52 = vpop.permute.xlu1 %927  ;;  %v4594_v0 = vpop.permute.xlu0 %925 }
 0x153   : > { %6615 = vst [vmem:[#allocation54_spill] sm:$0xff] %v4592_v52  ;;  %6616 = vst [vmem:[#allocation55_spill] sm:$0xff] %v4594_v0  ;;  %v1519_v52 = vmul.f32 %v1516_v3, %v4550_v30  ;;  %v1614_v0 = vmul.f32 %v1613_v16, %v4539_v5  ;;  %v1538_v3 = vmul.f32 %v1536_v53, %v4536_v47 }
 0x154   : > { %1507 = vrot.lane.b32.xlu1 %v1499_v29, %s6557_s11  ;;  %1505 = vrot.lane.b32.xlu0 %v1498_v57, %s6557_s11  ;;  %v1615_v29 = vmul.f32 %v1613_v16, %v4536_v47  ;;  %v1616_v57 = vmul.f32 %v1613_v16, %v4550_v30 }
 0x155   : > { %v1620_v26 = vrot.slane %v1614_v0, 1 }
 0x156   : > { %v4600_v4 = vpop.permute.xlu1 %945  ;;  %v4602_v9 = vpop.permute.xlu0 %929 }
 0x157   : > { %6617 = vst [vmem:[#allocation56_spill] sm:$0xff] %v4602_v9  ;;  %v1638_v9 = vstv %s3648_s8  ;;  %s284_s8 = sld [smem:[#allocation5]] }
 0x158   : > { %1525 = vrot.lane.b32.xlu1 %v1518_v15, %s6557_s11  ;;  %1523 = vrot.lane.b32.xlu0 %v1517_v14, %s6557_s11  ;;  %v1621_v15 = vrot.slane %v1615_v29, 1  ;;  %v1623_v14 = vrot.slane %v1616_v57, 1  ;;  %v1639_v34 = vmul.f32 %v1638_v9, %v4539_v5  ;;  %v1640_v16 = vmul.f32 %v1638_v9, %v4536_v47 }
 0x159   : > { %v1641_v0 = vmul.f32 %v1638_v9, %v4550_v30  ;;  %v1663_v57 = vstv %s3649_s9  ;;  %s3599_s9 = sld [smem:[#allocation2 + $0x6]] }
 0x15a   : > { %v4611_v61 = vpop.permute.xlu1 %949  ;;  %v4613_v58 = vpop.permute.xlu0 %947  ;;  %v1622_v53 = vsel %vm445_vm0, %v1620_v26, %v1621_v15  ;;  %v1646_v29 = vrot.slane %v1640_v16, 1  ;;  %v1688_v16 = vstv %s3650_s10  ;;  %s3608_s10 = sld [smem:[#allocation2 + $0x9]] }
 0x15c   : > { %1543 = vrot.lane.b32.xlu1 %v1537_v12, %s6557_s11  ;;  %1527 = vrot.lane.b32.xlu0 %v1519_v52, %s6557_s11  ;;  %v1624_v52 = vsel %vm445_vm0, %v1621_v15, %v1623_v14  ;;  %v1645_v12 = vrot.slane %v1639_v34, 1  ;;  %v1648_v34 = vrot.slane %v1641_v0, 1 }
 0x15e   : > { %v4621_v62 = vpop.permute.xlu1 %967  ;;  %v4623_v13 = vpop.permute.xlu0 %965  ;;  %v1647_v26 = vsel %vm445_vm0, %v1645_v12, %v1646_v29  ;;  %v1690_v12 = vmul.f32 %v1688_v16, %v4536_v47 }
 0x15f   : > { %6618 = vst [vmem:[#allocation57_spill] sm:$0xff] %v4621_v62  ;;  %6619 = vst [vmem:[#allocation58_spill] sm:$0xff] %v4623_v13  ;;  %v1664_v13 = vmul.f32 %v1663_v57, %v4539_v5  ;;  %v646_v60 = vstv %s3599_s9  ;;  %s4977_s9 = sld [smem:[#allocation2 + $0x21]] }
 0x160   : > { %1547 = vrot.lane.b32.xlu1 %v1539_v33, %s6557_s11  ;;  %1545 = vrot.lane.b32.xlu0 %v1538_v3, %s6557_s11  ;;  %v1665_v33 = vmul.f32 %v1663_v57, %v4536_v47  ;;  %v1666_v3 = vmul.f32 %v1663_v57, %v4550_v30  ;;  %v1689_v57 = vmul.f32 %v1688_v16, %v4539_v5 }
 0x162   : > { %v4630_v11 = vpop.permute.xlu1 %985  ;;  %v4632_v6 = vpop.permute.xlu0 %969 }
 0x163   : > { %6620 = vst [vmem:[#allocation59_spill] sm:$0xff] %v4630_v11  ;;  %6621 = vst [vmem:[#allocation60_spill] sm:$0xff] %v4632_v6  ;;  %v1670_v11 = vrot.slane %v1664_v13, 1  ;;  %v1649_v6 = vsel %vm445_vm0, %v1646_v29, %v1648_v34  ;;  %v1695_v13 = vrot.slane %v1689_v57, 1  ;;  %v1691_v29 = vmul.f32 %v1688_v16, %v4550_v30 }
 0x164   : > { %1627 = vrot.lane.b32.xlu1 %v1624_v52, %s3997_s6  ;;  %1625 = vrot.lane.b32.xlu0 %v1622_v53, %s3997_s6  ;;  %v1671_v52 = vrot.slane %v1665_v33, 1  ;;  %v1673_v53 = vrot.slane %v1666_v3, 1  ;;  %v1696_v3 = vrot.slane %v1690_v12, 1  ;;  %v1738_v12 = vstv %s3652_s14  ;;  %s3626_s14 = sld [smem:[#allocation2 + $0xf]] }
 0x166   : > { %v4640_v9 = vpop.permute.xlu1 %989  ;;  %v4642_v15 = vpop.permute.xlu0 %987  ;;  %v1672_v33 = vsel %vm445_vm0, %v1670_v11, %v1671_v52  ;;  %v1697_v11 = vsel %vm445_vm0, %v1695_v13, %v1696_v3  ;;  %v1740_v13 = vmul.f32 %v1738_v12, %v4536_v47 }
 0x167   : > { %6622 = vst [vmem:[#allocation61_spill] sm:$0xff] %v4640_v9  ;;  %6623 = vst [vmem:[#allocation62_spill] sm:$0xff] %v4642_v15 }
 0x168   : > { %1650 = vrot.lane.b32.xlu1 %v1647_v26, %s3997_s6  ;;  %1629 = vrot.lane.b32.xlu0 %v1623_v14, %s3997_s6  ;;  %v1674_v14 = vsel %vm445_vm0, %v1671_v52, %v1673_v53  ;;  %v1713_v26 = vstv %s3651_s13  ;;  %v1698_v52 = vrot.slane %v1691_v29, 1  ;;  %s3617_s13 = sld [smem:[#allocation2 + $0xc]] }
 0x169   : > { %v1714_v42 = vmul.f32 %v1713_v26, %v4539_v5 }
 0x16a   : > { %v4649_v0 = vpop.permute.xlu1 %1069  ;;  %v4651_v62 = vpop.permute.xlu0 %1067  ;;  %v1699_v36 = vsel %vm445_vm0, %v1696_v3, %v1698_v52  ;;  %v1741_v3 = vmul.f32 %v1738_v12, %v4550_v30 }
 0x16c   : > { %1654 = vrot.lane.b32.xlu1 %v1648_v34, %s3997_s6  ;;  %1652 = vrot.lane.b32.xlu0 %v1649_v6, %s3997_s6  ;;  %v1715_v34 = vmul.f32 %v1713_v26, %v4536_v47  ;;  %v1716_v6 = vmul.f32 %v1713_v26, %v4550_v30  ;;  %v1739_v26 = vmul.f32 %v1738_v12, %v4539_v5 }
 0x16e   : > { %v4658_v15 = vpop.permute.xlu1 %1092  ;;  %v4660_v9 = vpop.permute.xlu0 %1071 }
 0x16f   : > { %6624 = vst [vmem:[#allocation63_spill] sm:$0xff] %v4658_v15  ;;  %v1720_v15 = vrot.slane %v1714_v42, 1  ;;  %v1745_v42 = vrot.slane %v1739_v26, 1 }
 0x170   : > { %1677 = vrot.lane.b32.xlu1 %v1674_v14, %s3997_s6  ;;  %1675 = vrot.lane.b32.xlu0 %v1672_v33, %s3997_s6  ;;  %v1721_v14 = vrot.slane %v1715_v34, 1  ;;  %v1723_v33 = vrot.slane %v1716_v6, 1  ;;  %v1746_v6 = vrot.slane %v1740_v13, 1  ;;  %v1845_v13 = vstv %s3657_s12  ;;  %s3580_s12 = sld [smem:[#allocation5 + $0x1]] }
 0x172   : > { %v4668_v16 = vpop.permute.xlu1 %1096  ;;  %v4670_v57 = vpop.permute.xlu0 %1094  ;;  %v1722_v34 = vsel %vm445_vm0, %v1720_v15, %v1721_v14  ;;  %v1747_v15 = vsel %vm445_vm0, %v1745_v42, %v1746_v6  ;;  %v1847_v42 = vmul.f32 %v1845_v13, %v4536_v47 }
 0x173   : > { %6625 = vst [vmem:[#allocation64_spill] sm:$0xff] %v4668_v16  ;;  %6626 = vst [vmem:[#allocation65_spill] sm:$0xff] %v4670_v57 }
 0x174   : > { %1700 = vrot.lane.b32.xlu1 %v1697_v11, %s6557_s11  ;;  %1679 = vrot.lane.b32.xlu0 %v1673_v53, %s3997_s6  ;;  %v1724_v53 = vsel %vm445_vm0, %v1721_v14, %v1723_v33  ;;  %v1820_v11 = vstv %s3656_s30  ;;  %v1748_v14 = vrot.slane %v1741_v3, 1  ;;  %s3582_s30 = sld [smem:[#allocation2 + $0x1b]] }
 0x176   : > { %v4677_v29 = vpop.permute.xlu1 %1119  ;;  %v4679_v2 = vpop.permute.xlu0 %1117 }
 0x177   : > { %6627 = vst [vmem:[#allocation66_spill] sm:$0xff] %v4677_v29  ;;  %6628 = vst [vmem:[#allocation67_spill] sm:$0xff] %v4679_v2  ;;  %v1821_v29 = vmul.f32 %v1820_v11, %v4539_v5  ;;  %v1749_v2 = vsel %vm445_vm0, %v1746_v6, %v1748_v14  ;;  %v1848_v6 = vmul.f32 %v1845_v13, %v4550_v30 }
 0x178   : > { %1704 = vrot.lane.b32.xlu1 %v1698_v52, %s6557_s11  ;;  %1702 = vrot.lane.b32.xlu0 %v1699_v36, %s6557_s11  ;;  %v1822_v52 = vmul.f32 %v1820_v11, %v4536_v47  ;;  %v1823_v36 = vmul.f32 %v1820_v11, %v4550_v30  ;;  %v1846_v11 = vmul.f32 %v1845_v13, %v4539_v5 }
 0x17a   : > { %v4686_v16 = vpop.permute.xlu1 %1142  ;;  %v4688_v57 = vpop.permute.xlu0 %1121 }
 0x17b   : > { %6629 = vst [vmem:[#allocation68_spill] sm:$0xff] %v4688_v57  ;;  %v1827_v57 = vrot.slane %v1821_v29, 2  ;;  %v1852_v29 = vrot.slane %v1846_v11, 2 }
 0x17c   : > { %1727 = vrot.lane.b32.xlu1 %v1724_v53, %s6557_s11  ;;  %1725 = vrot.lane.b32.xlu0 %v1722_v34, %s6557_s11  ;;  %v1828_v53 = vrot.slane %v1822_v52, 2  ;;  %v1830_v34 = vrot.slane %v1823_v36, 2  ;;  %v1853_v36 = vrot.slane %v1847_v42, 2  ;;  %v1895_v42 = vstv %s3659_s16  ;;  %s3635_s16 = sld [smem:[#allocation2 + $0x12]] }
 0x17e   : > { %v4696_v12 = vpop.permute.xlu1 %1146  ;;  %v4698_v26 = vpop.permute.xlu0 %1144  ;;  %v1829_v52 = vsel %vm653_vm1, %v1827_v57, %v1828_v53  ;;  %v1854_v57 = vsel %vm653_vm1, %v1852_v29, %v1853_v36  ;;  %v1897_v29 = vmul.f32 %v1895_v42, %v4536_v47 }
 0x180   : > { %1750 = vrot.lane.b32.xlu1 %v1747_v15, %s6557_s11  ;;  %1729 = vrot.lane.b32.xlu0 %v1723_v33, %s6557_s11  ;;  %v1831_v33 = vsel %vm653_vm1, %v1828_v53, %v1830_v34  ;;  %v1870_v15 = vstv %s3658_s15  ;;  %v1855_v53 = vrot.slane %v1848_v6, 2  ;;  %s4915_s15 = sld [smem:[#allocation2 + $0x1e]] }
 0x182   : > { %v4705_v3 = vpop.permute.xlu1 %1169  ;;  %v4707_v37 = vpop.permute.xlu0 %1167 }
 0x183   : > { %6630 = vst [vmem:[#allocation69_spill] sm:$0xff] %v4705_v3  ;;  %6631 = vst [vmem:[#allocation70_spill] sm:$0xff] %v4707_v37  ;;  %v1871_v3 = vmul.f32 %v1870_v15, %v4539_v5 }
 0x184   : > { %1754 = vrot.lane.b32.xlu1 %v1748_v14, %s6557_s11  ;;  %1752 = vrot.lane.b32.xlu0 %v1749_v2, %s6557_s11  ;;  %v1872_v14 = vmul.f32 %v1870_v15, %v4536_v47  ;;  %v1873_v2 = vmul.f32 %v1870_v15, %v4550_v30  ;;  %v1896_v15 = vmul.f32 %v1895_v42, %v4539_v5 }
 0x186   : > { %v4714_v1 = vpop.permute.xlu1 %1192  ;;  %v4716_v63 = vpop.permute.xlu0 %1171 }
 0x187   : > { %6632 = vst [vmem:[#allocation71_spill] sm:$0xff] %v4714_v1  ;;  %6633 = vst [vmem:[#allocation72_spill] sm:$0xff] %v4716_v63  ;;  %v1877_v1 = vrot.slane %v1871_v3, 2  ;;  %v1856_v63 = vsel %vm653_vm1, %v1853_v36, %v1855_v53  ;;  %v1902_v3 = vrot.slane %v1896_v15, 2  ;;  %v1898_v36 = vmul.f32 %v1895_v42, %v4550_v30 }
 0x188   : > { %1834 = vrot.lane.b32.xlu1 %v1831_v33, %s3997_s6  ;;  %1832 = vrot.lane.b32.xlu0 %v1829_v52, %s3997_s6  ;;  %v1878_v33 = vrot.slane %v1872_v14, 2  ;;  %v1880_v52 = vrot.slane %v1873_v2, 2  ;;  %v1903_v2 = vrot.slane %v1897_v29, 2  ;;  %v1945_v29 = vstv %s3661_s23  ;;  %s3583_s23 = sld [smem:[#allocation2 + $0x36]] }
 0x189   : > { %v1946_v48 = vmul.f32 %v1945_v29, %v4539_v5 }
 0x18a   : > { %v4724_v13 = vpop.permute.xlu1 %1196  ;;  %v4726_v11 = vpop.permute.xlu0 %1194  ;;  %v1879_v14 = vsel %vm653_vm1, %v1877_v1, %v1878_v33  ;;  %v1904_v54 = vsel %vm653_vm1, %v1902_v3, %v1903_v2  ;;  %v1905_v1 = vrot.slane %v1898_v36, 2  ;;  %v1947_v3 = vmul.f32 %v1945_v29, %v4536_v47 }
 0x18b   : > { %6634 = vst [vmem:[#allocation73_spill] sm:$0xff] %v4724_v13  ;;  %6635 = vst [vmem:[#allocation74_spill] sm:$0xff] %v4726_v11 }
 0x18c   : > { %1857 = vrot.lane.b32.xlu1 %v1854_v57, %s3997_s6  ;;  %1836 = vrot.lane.b32.xlu0 %v1830_v34, %s3997_s6  ;;  %v1881_v34 = vsel %vm653_vm1, %v1878_v33, %v1880_v52  ;;  %v1920_v57 = vstv %s3660_s17  ;;  %s3644_s17 = sld [smem:[#allocation2 + $0x15]] }
 0x18d   : > { %v1921_v33 = vmul.f32 %v1920_v57, %v4539_v5 }
 0x18e   : > { %v4733_v6 = vpop.permute.xlu1 %1276  ;;  %v4735_v37 = vpop.permute.xlu0 %1274 }
 0x18f   : > { %v1927_v44 = vrot.slane %v1921_v33, 2 }
 0x190   : > { %1861 = vrot.lane.b32.xlu1 %v1855_v53, %s3997_s6  ;;  %1859 = vrot.lane.b32.xlu0 %v1856_v63, %s3997_s6  ;;  %v1922_v53 = vmul.f32 %v1920_v57, %v4536_v47  ;;  %v1923_v63 = vmul.f32 %v1920_v57, %v4550_v30 }
 0x192   : > { %v4742_v11 = vpop.permute.xlu1 %1299  ;;  %v4744_v13 = vpop.permute.xlu0 %1278 }
 0x193   : > { %6636 = vst [vmem:[#allocation75_spill] sm:$0xff] %v4742_v11  ;;  %v1906_v11 = vsel %vm653_vm1, %v1903_v2, %v1905_v1  ;;  %v1948_v2 = vmul.f32 %v1945_v29, %v4550_v30 }
 0x194   : > { %1884 = vrot.lane.b32.xlu1 %v1881_v34, %s3997_s6  ;;  %1882 = vrot.lane.b32.xlu0 %v1879_v14, %s3997_s6  ;;  %v1928_v34 = vrot.slane %v1922_v53, 2  ;;  %v1930_v14 = vrot.slane %v1923_v63, 2  ;;  %v1952_v53 = vrot.slane %v1946_v48, 2  ;;  %v1953_v63 = vrot.slane %v1947_v3, 2 }
 0x196   : > { %v4752_v15 = vpop.permute.xlu1 %1303  ;;  %v4754_v42 = vpop.permute.xlu0 %1301 }
 0x197   : > { %6637 = vst [vmem:[#allocation76_spill] sm:$0xff] %v4752_v15  ;;  %6638 = vst [vmem:[#allocation77_spill] sm:$0xff] %v4754_v42 }
 0x198   : > { %1907 = vrot.lane.b32.xlu1 %v1904_v54, %s6557_s11  ;;  %1886 = vrot.lane.b32.xlu0 %v1880_v52, %s3997_s6  ;;  %v1931_v54 = vsel %vm653_vm1, %v1928_v34, %v1930_v14  ;;  %v1929_v52 = vsel %vm653_vm1, %v1927_v44, %v1928_v34 }
 0x19a   : > { %v4761_v36 = vpop.permute.xlu1 %1326  ;;  %v4763_v57 = vpop.permute.xlu0 %1324 }
 0x19b   : > { %6639 = vst [vmem:[#allocation78_spill] sm:$0xff] %v4761_v36  ;;  %6640 = vst [vmem:[#allocation79_spill] sm:$0xff] %v4763_v57  ;;  %v1955_v36 = vrot.slane %v1948_v2, 2 }
 0x19c   : > { %1911 = vrot.lane.b32.xlu1 %v1905_v1, %s6557_s11  ;;  %1909 = vrot.lane.b32.xlu0 %v1906_v11, %s6557_s11  ;;  %v1954_v1 = vsel %vm653_vm1, %v1952_v53, %v1953_v63 }
 0x19d   : > { %v1956_v48 = vsel %vm653_vm1, %v1953_v63, %v1955_v36 }
 0x19e   : > { %v4770_v33 = vpop.permute.xlu1 %1349  ;;  %v4772_v15 = vpop.permute.xlu0 %1328 }
 0x19f   : > { %6641 = vst [vmem:[#allocation80_spill] sm:$0xff] %v4772_v15 }
 0x1a0   : > { %1934 = vrot.lane.b32.xlu1 %v1931_v54, %s6557_s11  ;;  %1932 = vrot.lane.b32.xlu0 %v1929_v52, %s6557_s11 }
 0x1a2   : > { %v4777_v11 = vpop.permute.xlu1 %1353  ;;  %v4779_v57 = vpop.permute.xlu0 %1351 }
 0x1a3   : > { %6642 = vst [vmem:[#allocation81_spill] sm:$0xff] %v4777_v11 }
 0x1a4   : > { %1957 = vrot.lane.b32.xlu1 %v1954_v1, %s6557_s11  ;;  %1936 = vrot.lane.b32.xlu0 %v1930_v14, %s6557_s11 }
 0x1a6   : > { %v4784_v44 = vpop.permute.xlu1 %1376  ;;  %v4786_v29 = vpop.permute.xlu0 %1374 }
 0x1a7   : > { %6643 = vst [vmem:[#allocation82_spill] sm:$0xff] %v4784_v44  ;;  %6644 = vst [vmem:[#allocation83_spill] sm:$0xff] %v4786_v29 }
 0x1a8   : > { %1961 = vrot.lane.b32.xlu1 %v1955_v36, %s6557_s11  ;;  %1959 = vrot.lane.b32.xlu0 %v1956_v48, %s6557_s11  ;;  %v294_v48 = vstv %s293_s26  ;;  %s3581_s26 = sld [smem:[#allocation5 + $0x2]] }
 0x1aa   : > { %v4790_v34 = vpop.permute.xlu1 %1399  ;;  %v4792_v3 = vpop.permute.xlu0 %1378 }
 0x1ab   : > { %6645 = vst [vmem:[#allocation84_spill] sm:$0xff] %v4790_v34  ;;  %6646 = vst [vmem:[#allocation85_spill] sm:$0xff] %v4792_v3  ;;  %v4815_v34 = vld [vmem:[%s4157_s25] sm:$0xff]  ;;  %v438_v3 = vstv %s3590_s7  ;;  %s4949_s7 = sld [smem:[#allocation2 + $0x18]] }
 0x1ac   : > { %v295_v15 = vmul.f32 %v4815_v34, %v294_v48  ;;  %v441_v35 = vmul.f32 %v4833_v49, %v438_v3 }
 0x1ae   : > { %v4794_v54 = vpop.permute.xlu1 %1403  ;;  %v4796_v52 = vpop.permute.xlu0 %1401 }
 0x1af   : > { %6647 = vst [vmem:[#allocation86_spill] sm:$0xff] %v4794_v54  ;;  %6648 = vst [vmem:[#allocation87_spill] sm:$0xff] %v4796_v52 }
 0x1b2   : > { %v4798_v14 = vpop.permute.xlu1 %1445  ;;  %v4800_v53 = vpop.permute.xlu0 %1443 }
 0x1b6   : > { %v4802_v63 = vpop.permute.xlu1 %1463  ;;  %v4804_v36 = vpop.permute.xlu0 %1447 }
 0x1b7   : > { %6649 = vst [vmem:[#allocation88_spill] sm:$0xff] %v4802_v63  ;;  %6650 = vst [vmem:[#allocation89_spill] sm:$0xff] %v4804_v36  ;;  %v285_v63 = vstv %s284_s8  ;;  %v449_v36 = vrot.slane %v441_v35, 1  ;;  %v649_v35 = vmul.f32 %v4833_v49, %v646_v60  ;;  %s4958_s8 = sld [smem:[#allocation2 + $0x39]] }
 0x1b8   : > { %v298_v29 = vadd.f32 %v295_v15, %v285_v63 }
 0x1ba   : > { %v4806_v2 = vpop.permute.xlu1 %1467  ;;  %v4808_v1 = vpop.permute.xlu0 %1465 }
 0x1bb   : > { %6651 = vst [vmem:[#allocation90_spill] sm:$0xff] %v4806_v2  ;;  %6652 = vst [vmem:[#allocation91_spill] sm:$0xff] %v4808_v1  ;;  %v4823_v2 = vld [vmem:[%s4157_s25 + $0x8] sm:$0xff] }
 0x1bc   : > { %v440_v1 = vmul.f32 %v4823_v2, %v438_v3  ;;  %v648_v11 = vmul.f32 %v4823_v2, %v646_v60 }
 0x1be   : > { %v4810_v54 = vpop.permute.xlu1 %1485  ;;  %v4812_v52 = vpop.permute.xlu0 %1483  ;;  %v447_v7 = vrot.slane %v440_v1, 1 }
 0x1bf   : > { %6653 = vst [vmem:[#allocation92_spill] sm:$0xff] %v4810_v54  ;;  %6654 = vst [vmem:[#allocation93_spill] sm:$0xff] %v4812_v52  ;;  %v439_v54 = vmul.f32 %v4815_v34, %v438_v3  ;;  %v296_v52 = vmul.f32 %v4823_v2, %v294_v48 }
 0x1c1   : > { %v446_v31 = vrot.slane %v439_v54, 1  ;;  %v299_v59 = vadd.f32 %v296_v52, %v285_v63 }
 0x1c2   : > { %v4818_v44 = vpop.permute.xlu1 %1503  ;;  %v4820_v42 = vpop.permute.xlu0 %1487 }
 0x1c3   : > { %6655 = vst [vmem:[#allocation94_spill] sm:$0xff] %v4820_v42  ;;  %v334_v42 = vadd.f32 %v4321_v23, %v298_v29  ;;  %v335_v3 = vadd.f32 %v4329_v28, %v299_v59  ;;  %v297_v29 = vmul.f32 %v4833_v49, %v294_v48 }
 0x1c5   : > { %v394_v15 = vadd.f32 %v4351_v41, %v334_v42  ;;  %v395_v52 = vadd.f32 %v4364_v51, %v335_v3  ;;  %v450_v41 = vsel %vm445_vm0, %v447_v7, %v449_v36  ;;  %v657_v51 = vrot.slane %v649_v35, 2 }
 0x1c6   : > { %v4828_v39 = vpop.permute.xlu1 %1507  ;;  %v4830_v40 = vpop.permute.xlu0 %1505  ;;  %v854_v3 = vstv %s3608_s10  ;;  %s5010_s10 = sld [smem:[#allocation2 + $0x3c]] }
 0x1c7   : > { %6656 = vst [vmem:[#allocation95_spill] sm:$0xff] %v4828_v39  ;;  %6657 = vst [vmem:[#allocation96_spill] sm:$0xff] %v4830_v40  ;;  %v448_v39 = vsel %vm445_vm0, %v446_v31, %v447_v7  ;;  %v647_v40 = vmul.f32 %v4815_v34, %v646_v60  ;;  %v655_v31 = vrot.slane %v648_v11, 2 }
 0x1c8   : > { %v454_v1 = vadd.f32 %v448_v39, %v394_v15 }
 0x1c9   : > { %v654_v42 = vrot.slane %v647_v40, 2 }
 0x1ca   : > { %v4837_v32 = vpop.permute.xlu1 %1525  ;;  %v4839_v27 = vpop.permute.xlu0 %1523 }
 0x1cb   : > { %6658 = vst [vmem:[#allocation97_spill] sm:$0xff] %v4837_v32  ;;  %v517_v32 = vadd.f32 %v4402_v25, %v454_v1  ;;  %v656_v39 = vsel %vm653_vm1, %v654_v42, %v655_v31  ;;  %v4881_v1 = vld [vmem:[%s4157_s25 + $0x20] sm:$0xff] }
 0x1cd   : > { %v592_v48 = vadd.f32 %v4437_v8, %v517_v32 }
 0x1ce   : > { %v4846_v54 = vpop.permute.xlu1 %1543  ;;  %v4848_v23 = vpop.permute.xlu0 %1527 }
 0x1cf   : > { %6659 = vst [vmem:[#allocation98_spill] sm:$0xff] %v4846_v54  ;;  %6660 = vst [vmem:[#allocation99_spill] sm:$0xff] %v4848_v23  ;;  %v300_v54 = vadd.f32 %v297_v29, %v285_v63  ;;  %v455_v23 = vadd.f32 %v450_v41, %v395_v52  ;;  %v662_v15 = vadd.f32 %v656_v39, %v592_v48  ;;  %v998_v29 = vstv %s3617_s13  ;;  %s5064_s13 = sld [smem:[#allocation2 + $0x27]] }
 0x1d0   : > { %v658_v63 = vsel %vm653_vm1, %v655_v31, %v657_v51  ;;  %v856_v39 = vmul.f32 %v4881_v1, %v854_v3 }
 0x1d1   : > { %v518_v7 = vadd.f32 %v4400_v24, %v455_v23  ;;  %v336_v25 = vadd.f32 %v4319_v22, %v300_v54  ;;  %v725_v8 = vadd.f32 %v4486_v21, %v662_v15  ;;  %v4877_v54 = vld [vmem:[%s4157_s25 + $0x18] sm:$0xff] }
 0x1d2   : > { %v4855_v28 = vpop.permute.xlu1 %1547  ;;  %v4857_v59 = vpop.permute.xlu0 %1545  ;;  %v999_v21 = vmul.f32 %v4877_v54, %v998_v29 }
 0x1d3   : > { %6661 = vst [vmem:[#allocation100_spill] sm:$0xff] %v4857_v59  ;;  %v593_v11 = vadd.f32 %v4449_v20, %v518_v7  ;;  %v396_v32 = vadd.f32 %v4362_v50, %v336_v25  ;;  %v800_v22 = vadd.f32 %v4521_v10, %v725_v8  ;;  %v855_v20 = vmul.f32 %v4877_v54, %v854_v3  ;;  %v4894_v25 = vld [vmem:[%s4157_s25 + $0x28] sm:$0xf] }
 0x1d4   : > { %v1000_v50 = vmul.f32 %v4881_v1, %v998_v29 }
 0x1d5   : > { %v663_v52 = vadd.f32 %v658_v63, %v593_v11  ;;  %v456_v41 = vadd.f32 %v449_v36, %v396_v32  ;;  %v858_v7 = vadd.f32 %v855_v20, %v800_v22  ;;  %v4897_v11 = vmul.f32 %v4894_v25, %v998_v29 }
 0x1d6   : > { %v4862_v60 = vpop.permute.xlu1 %1627  ;;  %v4864_v40 = vpop.permute.xlu0 %1625  ;;  %v1006_v15 = vrot.slane %v1000_v50, 1  ;;  %v1005_v36 = vrot.slane %v999_v21, 1  ;;  %v1205_v32 = vstv %s3626_s14  ;;  %s5072_s14 = sld [smem:[#allocation7 + $0x1]] }
 0x1d7   : > { %v726_v35 = vadd.f32 %v4484_v18, %v663_v52  ;;  %v519_v48 = vadd.f32 %v4411_v38, %v456_v41  ;;  %v894_v63 = vadd.f32 %v4570_v17, %v858_v7  ;;  %v1008_v22 = vrot.slane %v4897_v11, 1 }
 0x1d8   : > { %v1007_v29 = vsel %vm445_vm0, %v1005_v36, %v1006_v15  ;;  %v1207_v20 = vmul.f32 %v4881_v1, %v1205_v32  ;;  %v1206_v50 = vmul.f32 %v4877_v54, %v1205_v32  ;;  %v857_v11 = vmul.f32 %v4894_v25, %v854_v3 }
 0x1d9   : > { %v801_v10 = vadd.f32 %v4530_v56, %v726_v35  ;;  %v594_v18 = vadd.f32 %v4447_v19, %v519_v48  ;;  %v954_v52 = vadd.f32 %v4600_v4, %v894_v63 }
 0x1da   : > { %v4871_v24 = vpop.permute.xlu1 %1650  ;;  %v4873_v23 = vpop.permute.xlu0 %1629  ;;  %v1212_v7 = vrot.slane %v1206_v50, 2 }
 0x1db   : > { %v859_v56 = vadd.f32 %v856_v39, %v801_v10  ;;  %v664_v19 = vadd.f32 %v657_v51, %v594_v18  ;;  %v1013_v48 = vadd.f32 %v1007_v29, %v954_v52  ;;  %v1009_v10 = vsel %vm445_vm0, %v1006_v15, %v1008_v22 }
 0x1dc   : > { %v4921_v39 = vmul.f32 %v4894_v25, %v1205_v32  ;;  %v1213_v51 = vrot.slane %v1207_v20, 2  ;;  %v288_v20 = vstv %s3580_s12  ;;  %s5108_s12 = sld [smem:[#allocation7 + $0x1c]] }
 0x1dd   : > { %v895_v17 = vadd.f32 %v4568_v43, %v859_v56  ;;  %v727_v4 = vadd.f32 %v4495_v45, %v664_v19  ;;  %v1076_v36 = vadd.f32 %v4651_v62, %v1013_v48 }
 0x1de   : > { %v4886_v31 = vpop.permute.xlu1 %1654  ;;  %v4888_v42 = vpop.permute.xlu0 %1652  ;;  %v6551_v32 = vrot.slane %v4921_v39, 2  ;;  %v1214_v56 = vsel %vm653_vm1, %v1212_v7, %v1213_v51 }
 0x1df   : > { %v955_v35 = vadd.f32 %v4613_v58, %v895_v17  ;;  %v802_v43 = vadd.f32 %v4528_v55, %v727_v4  ;;  %v302_v58 = vstv %s3582_s30  ;;  %v1151_v63 = vadd.f32 %v4686_v16, %v1076_v36  ;;  %s5092_s30 = sld [smem:[#allocation2 + $0x24]] }
 0x1e0   : > { %v303_v62 = vmul.f32 %v4815_v34, %v302_v58  ;;  %v1216_v17 = vsel %vm653_vm1, %v1213_v51, %v6551_v32  ;;  %v4944_v4 = vstv %s3635_s16  ;;  %s5148_s16 = sld [smem:[#allocation2 + $0x2a]] }
 0x1e1   : > { %v1014_v15 = vadd.f32 %v1009_v10, %v955_v35  ;;  %v860_v55 = vadd.f32 %v857_v11, %v802_v43  ;;  %v1220_v16 = vadd.f32 %v1214_v56, %v1151_v63  ;;  %v458_v35 = vstv %s4915_s15  ;;  %s5141_s15 = sld [smem:[#allocation7 + $0x37]] }
 0x1e2   : > { %v4901_v8 = vpop.permute.xlu1 %1677  ;;  %v4903_v38 = vpop.permute.xlu0 %1675  ;;  %v1556_v10 = vstv %s3644_s17  ;;  %v4951_v7 = vadd.f32 %v303_v62, %v288_v20  ;;  %v310_v11 = vstv %s3583_s23  ;;  %s5170_s17 = sld [smem:[#allocation7 + $0x2]] }
 0x1e3   : > { %6662 = vst [vmem:[#allocation101_spill] sm:$0xff] %v4901_v8  ;;  %6663 = vst [vmem:[#allocation102_spill] sm:$0xff] %v4903_v38  ;;  %v1077_v3 = vadd.f32 %v4649_v0, %v1014_v15  ;;  %v896_v50 = vadd.f32 %v4578_v46, %v860_v55  ;;  %v1283_v48 = vadd.f32 %v4735_v37, %v1220_v16  ;;  %v291_v55 = vstv %s3581_s26  ;;  %v6670_v8 = vld [vmem:[#allocation81_spill] sm:$0xff]  ;;  %s5200_s23 = sld [smem:[#allocation7 + $0x1d]] }
 0x1e4   : > { %v305_v46 = vmul.f32 %v4833_v49, %v302_v58  ;;  %v1413_v37 = vmul.f32 %v4944_v4, %v4539_v5  ;;  %v459_v15 = vmul.f32 %v4815_v34, %v458_v35  ;;  %v1558_v63 = vmul.f32 %v1556_v10, %v4536_v47  ;;  %s5217_s26 = sld [smem:[#allocation7 + $0x4]] }
 0x1e5   : > { %v1152_v19 = vadd.f32 %v4698_v26, %v1077_v3  ;;  %v956_v0 = vadd.f32 %v4611_v61, %v896_v50  ;;  %v1358_v36 = vadd.f32 %v4770_v33, %v1283_v48  ;;  %v304_v61 = vmul.f32 %v4823_v2, %v302_v58 }
 0x1e6   : > { %v4911_v21 = vpop.permute.xlu1 %1700  ;;  %v4913_v41 = vpop.permute.xlu0 %1679  ;;  %v1557_v56 = vmul.f32 %v1556_v10, %v4539_v5  ;;  %v4968_v3 = vmul.f32 %v4823_v2, %v458_v35  ;;  %v312_v33 = vmul.f32 %v4823_v2, %v310_v11  ;;  %v313_v16 = vmul.f32 %v4833_v49, %v310_v11 }
 0x1e7   : > { %6664 = vst [vmem:[#allocation103_spill] sm:$0xff] %v4913_v41  ;;  %v1221_v51 = vadd.f32 %v1216_v17, %v1152_v19  ;;  %v1015_v62 = vadd.f32 %v1008_v22, %v956_v0  ;;  %v311_v19 = vmul.f32 %v4815_v34, %v310_v11  ;;  %v4975_v58 = vmul.f32 %v4833_v49, %v458_v35 }
 0x1e8   : > { %v1414_v0 = vmul.f32 %v4944_v4, %v4536_v47  ;;  %v465_v11 = vrot.slane %v459_v15, 1  ;;  %v4988_v32 = vmul.f32 %v1556_v10, %v4550_v30  ;;  %v1564_v35 = vrot.slane %v1558_v63, 1 }
 0x1e9   : > { %v1284_v50 = vadd.f32 %v4733_v6, %v1221_v51  ;;  %v1078_v22 = vadd.f32 %v4660_v9, %v1015_v62  ;;  %v1416_v51 = vadd.f32 %v1413_v37, %v1358_v36  ;;  %v466_v41 = vrot.slane %v4968_v3, 1 }
 0x1ea   : > { %v4926_v18 = vpop.permute.xlu1 %1704  ;;  %v4928_v45 = vpop.permute.xlu0 %1702  ;;  %v1763_v9 = vstv %s4949_s7  ;;  %v4994_v62 = vadd.f32 %v305_v46, %v288_v20  ;;  %v5000_v36 = vadd.f32 %v311_v19, %v291_v55  ;;  %v5006_v15 = vadd.f32 %v313_v16, %v291_v55  ;;  %s5222_s7 = sld [smem:[#allocation7 + $0x38]] }
 0x1eb   : > { %v1359_v6 = vadd.f32 %v4779_v57, %v1284_v50  ;;  %v4996_v57 = vadd.f32 %v304_v61, %v288_v20  ;;  %v4998_v50 = vadd.f32 %v312_v33, %v291_v55  ;;  %v477_v63 = vstv %s4958_s8  ;;  %s5253_s8 = sld [smem:[#allocation7 + $0x1f]] }
 0x1ec   : > { %v6552_v20 = vrot.slane %v4988_v32, 1  ;;  %v1765_v61 = vmul.f32 %v1763_v9, %v4536_v47  ;;  %v5017_v3 = vsel %vm445_vm0, %v465_v11, %v466_v41  ;;  %v6668_v33 = vrot.slane %v4921_v39, 2  ;;  %v6669_v39 = vld [vmem:[#allocation96_spill] sm:$0xff] }
 0x1ed   : > { %v5024_v16 = vmul.f32 %v4823_v2, %v477_v63  ;;  %v5041_v11 = vmul.f32 %v1763_v9, %v4550_v30 }
 0x1ee   : > { %v4935_v52 = vpop.permute.xlu1 %1727  ;;  %v4937_v29 = vpop.permute.xlu0 %1725 }
 0x1f2   : > { %v4954_v26 = vpop.permute.xlu1 %1750  ;;  %v4956_v43 = vpop.permute.xlu0 %1729 }
 0x1f3   : > { %6665 = vst [vmem:[#allocation104_spill] sm:$0xff] %v4954_v26  ;;  %v1563_v26 = vrot.slane %v1557_v56, 1  ;;  %v1764_v56 = vmul.f32 %v1763_v9, %v4539_v5 }
 0x1f5   : > { %v1565_v46 = vsel %vm445_vm0, %v1563_v26, %v1564_v35  ;;  %v666_v26 = vstv %s4977_s9  ;;  %s5261_s9 = sld [smem:[#allocation2 + $0x2d]] }
 0x1f6   : > { %v4979_v17 = vpop.permute.xlu1 %1754  ;;  %v4981_v48 = vpop.permute.xlu0 %1752  ;;  %v667_v55 = vmul.f32 %v4815_v34, %v666_v26 }
 0x1f7   : > { %6666 = vst [vmem:[#allocation105_spill] sm:$0xff] %v4979_v17  ;;  %6667 = vst [vmem:[#allocation106_spill] sm:$0xff] %v4981_v48  ;;  %v1153_v17 = vadd.f32 %v4696_v12, %v1078_v22  ;;  %v1452_v48 = vadd.f32 %v4800_v53, %v1416_v51  ;;  %v1417_v12 = vadd.f32 %v1414_v0, %v1359_v6  ;;  %v1969_v22 = vlaneseq }
 0x1f8   : > { %v478_v6 = vmul.f32 %v4815_v34, %v477_v63 }
 0x1f9   : > { %v1512_v53 = vadd.f32 %v4818_v44, %v1452_v48  ;;  %v1222_v19 = vadd.f32 %v6668_v33, %v1153_v17  ;;  %v1453_v44 = vadd.f32 %v4798_v14, %v1417_v12  ;;  %v5027_v48 = vmul.f32 %v4833_v49, %v477_v63 }
 0x1fa   : > { %v5002_v37 = vpop.permute.xlu1 %1834  ;;  %v5004_v10 = vpop.permute.xlu0 %1832  ;;  %v1567_v14 = vsel %vm445_vm0, %v1564_v35, %v6552_v20  ;;  %v1771_v12 = vrot.slane %v1765_v61, 2  ;;  %v1770_v33 = vrot.slane %v1764_v56, 2  ;;  %v5056_v61 = vshrl.u32 %v1969_v22, 7 }
 0x1fb   : > { %v1285_v0 = vadd.f32 %v4744_v13, %v1222_v19  ;;  %v1513_v17 = vadd.f32 %v6669_v39, %v1453_v44  ;;  %v1571_v51 = vadd.f32 %v1565_v46, %v1512_v53  ;;  %v1415_v13 = vmul.f32 %v4944_v4, %v4550_v30 }
 0x1fc   : > { %v668_v53 = vmul.f32 %v4823_v2, %v666_v26  ;;  %v5050_v46 = vmul.f32 %v4833_v49, %v666_v26  ;;  %v5058_v56 = vand.u32 127, %v1969_v22  ;;  %v485_v30 = vrot.slane %v5024_v16, 1 }
 0x1fd   : > { %v1360_v38 = vadd.f32 %v6670_v8, %v1285_v0  ;;  %v1634_v63 = vadd.f32 %v4864_v40, %v1571_v51  ;;  %v6671_v8 = vrot.slane %v4975_v58, 1  ;;  %v1572_v40 = vadd.f32 %v1567_v14, %v1513_v17 }
 0x1fe   : > { %v5030_v47 = vpop.permute.xlu1 %1857  ;;  %v5032_v5 = vpop.permute.xlu0 %1836  ;;  %v6553_v44 = vrot.slane %v5027_v48, 1  ;;  %v685_v26 = vstv %s5010_s10  ;;  %v1773_v0 = vrot.slane %v5041_v11, 2  ;;  %v1772_v39 = vsel %vm653_vm1, %v1770_v33, %v1771_v12  ;;  %v6673_v33 = vld [vmem:[#allocation15_spill] sm:$0xff]  ;;  %v6692_v11 = vld [vmem:[#allocation28_spill] sm:$0xff]  ;;  %s5279_s10 = sld [smem:[#allocation7 + $0x3a]] }
 0x1ff   : > { %v469_v19 = vsel %vm445_vm0, %v466_v41, %v6671_v8  ;;  %v1709_v4 = vadd.f32 %v4911_v21, %v1634_v63  ;;  %v484_v22 = vrot.slane %v478_v6, 1  ;;  %v673_v51 = vrot.slane %v667_v55, 2  ;;  %v6672_v55 = vld [vmem:[#allocation89_spill] sm:$0xff] }
 0x200   : > { %v1418_v20 = vadd.f32 %v1415_v13, %v1360_v38  ;;  %v1635_v59 = vadd.f32 %v4862_v60, %v1572_v40  ;;  %v674_v41 = vrot.slane %v668_v53, 2  ;;  %v6555_v16 = vrot.slane %v5050_v46, 2 }
 0x201   : > { %vm1975_vm2 = vcmp.ge.s32.totalorder %v5056_v61, 1  ;;  %vm1984_vm3 = vcmp.ge.s32.totalorder %v5058_v56, 1  ;;  %v5082_v14 = vmul.f32 %v4823_v2, %v685_v26  ;;  %v1778_v6 = vadd.f32 %v1772_v39, %v1709_v4  ;;  %v6679_v39 = vld [vmem:[#allocation21_spill] sm:$0xff] }
 0x202   : > { %v5052_v35 = vpop.permute.xlu1 %1861  ;;  %v5054_v9 = vpop.permute.xlu0 %1859  ;;  %v1454_v38 = vadd.f32 %v6672_v55, %v1418_v20  ;;  %v1710_v60 = vadd.f32 %v4928_v45, %v1635_v59  ;;  %v354_v13 = vadd.f32 %v6673_v33, %v4951_v7  ;;  %v5089_v63 = vmul.f32 %v4833_v49, %v685_v26  ;;  %v6674_v20 = vld [vmem:[#allocation17_spill] sm:$0xff]  ;;  %v6675_v59 = vld [vmem:[#allocation95_spill] sm:$0xff]  ;;  %vm5103_vm4 = vmand %vm1975_vm2, %vm1984_vm3 }
 0x203   : > { %v686_v53 = vmul.f32 %v4815_v34, %v685_v26  ;;  %v1774_v2 = vsel %vm653_vm1, %v1771_v12, %v1773_v0  ;;  %v355_v8 = vadd.f32 %v6674_v20, %v4996_v57  ;;  %v1841_v40 = vadd.f32 %v5004_v10, %v1778_v6  ;;  %v6678_v34 = vld [vmem:[#allocation22_spill] sm:$0xff] }
 0x204   : > { %v1514_v45 = vadd.f32 %v6675_v59, %v1454_v38  ;;  %vm1988_vm5 = vcmp.le.s32.totalorder %v5058_v56, 16  ;;  %v414_v7 = vadd.f32 %v6678_v34, %v354_v13  ;;  %v5114_v57 = vsel %vm445_vm0, %v485_v30, %v6553_v44 }
 0x205   : > { %v5117_v12 = vsel %vm445_vm0, %v484_v22, %v485_v30  ;;  %v675_v10 = vsel %vm653_vm1, %v673_v51, %v674_v41  ;;  %v415_v55 = vadd.f32 %v6679_v39, %v355_v8  ;;  %v1017_v38 = vstv %s5064_s13  ;;  %vm5133_vm6 = vmand %vm5103_vm4, %vm1988_vm5  ;;  %s5292_s13 = sld [smem:[#allocation2 + $0x30]] }
 0x206   : > { %v5075_v17 = vpop.permute.xlu1 %1884  ;;  %v5077_v21 = vpop.permute.xlu0 %1882  ;;  %v1779_v6 = vadd.f32 %v1774_v2, %v1710_v60  ;;  %v677_v13 = vsel %vm653_vm1, %v674_v41, %v6555_v16  ;;  %v693_v20 = vrot.slane %v5082_v14, 2  ;;  %v6554_v30 = vrot.slane %v5089_v63, 2  ;;  %v6683_v14 = vld [vmem:[#allocation16_spill] sm:$0xff]  ;;  %vm5162_vm7 = vmand %vm1984_vm3, %vm1988_vm5 }
 0x207   : > { %v692_v22 = vrot.slane %v686_v53, 2  ;;  %v6682_v60 = vrot.slane %v4988_v32, 1  ;;  %v2038_v59 = vstv %s5072_s14  ;;  %v356_v53 = vadd.f32 %v6683_v14, %v4994_v62  ;;  %v6689_v14 = vld [vmem:[#allocation34_spill] sm:$0xff]  ;;  %s5304_s14 = sld [smem:[#allocation7 + $0x5]] }
 0x208   : > { %v1842_v8 = vadd.f32 %v5002_v37, %v1779_v6  ;;  %v1018_v49 = vmul.f32 %v4877_v54, %v1017_v38  ;;  %v1019_v34 = vmul.f32 %v4881_v1, %v1017_v38  ;;  %v474_v32 = vadd.f32 %v469_v19, %v415_v55  ;;  %v6684_v6 = vld [vmem:[#allocation24_spill] sm:$0xff]  ;;  %v6688_v55 = vld [vmem:[#allocation29_spill] sm:$0xff] }
 0x209   : > { %v1573_v2 = vadd.f32 %v6682_v60, %v1514_v45  ;;  %v416_v62 = vadd.f32 %v6684_v6, %v356_v53  ;;  %v5174_v6 = vmul.f32 %v4894_v25, %v1017_v38  ;;  %v1972_v38 = vadd.s32 16, %v5056_v61 }
 0x20a   : > { %v1908_v4 = vpop.permute.xlu1 %1907  ;;  %v5120_v26 = vpop.permute.xlu0 %1886  ;;  %v543_v60 = vadd.f32 %v6688_v55, %v474_v32  ;;  %v5184_v32 = vsel %vm653_vm1, %v692_v22, %v693_v20  ;;  %v2066_v22 = vstv %s5141_s15  ;;  %v2080_v16 = vstv %s5170_s17  ;;  %s5375_s15 = sld [smem:[#allocation2 + $0x33]] }
 0x20b   : > { %v1916_v33 = vadd.f32 %v1908_v4, %v1841_v40  ;;  %v473_v40 = vadd.f32 %v5017_v3, %v414_v7  ;;  %v1636_v37 = vadd.f32 %v4873_v23, %v1573_v2  ;;  %v862_v7 = vstv %s5092_s30  ;;  %s5333_s30 = sld [smem:[#allocation7 + $0x20]] }
 0x20c   : > { %v864_v55 = vmul.f32 %v4881_v1, %v862_v7  ;;  %vm1980_vm8 = vcmp.le.s32.totalorder %v1972_v38, 16  ;;  %v6704_v38 = vrot.slane %v5050_v46, 2  ;;  %v6709_v46 = vld [vmem:[#allocation40_spill] sm:$0xff]  ;;  %s5397_s17 = sld [smem:[#allocation7 + $0x22]] }
 0x20d   : > { %v1992_v41 = vmax.f32 %v1916_v33, 0.0  ;;  %v6685_v33 = vld [vmem:[#allocation27_spill] sm:$0xff]  ;;  %v1711_v2 = vadd.f32 %v4926_v18, %v1636_v37  ;;  %v5181_v18 = vsel %vm653_vm1, %v693_v20, %v6554_v30  ;;  %vm5243_vm9 = vmand %vm1980_vm8, %vm1984_vm3 }
 0x20e   : > { %v1910_v4 = vpop.permute.xlu0 %1909  ;;  %v542_v3 = vadd.f32 %v6685_v33, %v473_v40  ;;  %v1024_v40 = vrot.slane %v1018_v49, 1  ;;  %v6690_v33 = vld [vmem:[#allocation33_spill] sm:$0xff]  ;;  %v863_v49 = vmul.f32 %v4877_v54, %v862_v7  ;;  %vm5267_vm10 = vmand %vm5243_vm9, %vm1988_vm5 }
 0x20f   : > { %v5153_v45 = vsel %vm5133_vm6, %v1992_v41, 0.0  ;;  %v1917_v39 = vadd.f32 %v1910_v4, %v1842_v8  ;;  %v2052_v41 = vstv %s5108_s12  ;;  %v1025_v4 = vrot.slane %v1019_v34, 1  ;;  %s5363_s12 = sld [smem:[#allocation7 + $0x3b]] }
 0x210   : > { %v2039_v23 = vmul.f32 %v2038_v59, %v5153_v45  ;;  %v617_v53 = vadd.f32 %v6689_v14, %v542_v3  ;;  %v618_v44 = vadd.f32 %v6690_v33, %v543_v60  ;;  %v6691_v3 = vrot.slane %v4975_v58, 1  ;;  %v1912_v58 = vpop.permute.xlu1 %1911  ;;  %v6693_v14 = vld [vmem:[#allocation39_spill] sm:$0xff]  ;;  %v6694_v33 = vld [vmem:[#allocation36_spill] sm:$0xff] }
 0x211   : > { %v1993_v8 = vmax.f32 %v1917_v39, 0.0  ;;  %v2053_v39 = vmul.f32 %v2052_v41, %v5153_v45  ;;  %v1780_v20 = vadd.f32 %v1773_v0, %v1711_v2  ;;  %v5206_v61 = vsel %vm445_vm0, %v1024_v40, %v1025_v4 }
 0x212   : > { %2043 = vrot.lane.b32.xlu0 %v2039_v23, %s3997_s6  ;;  %v475_v23 = vadd.f32 %v6691_v3, %v416_v62  ;;  %v681_v60 = vadd.f32 %v675_v10, %v617_v53  ;;  %v682_v62 = vadd.f32 %v677_v13, %v618_v44  ;;  %v1224_v2 = vstv %s5148_s16  ;;  %v6696_v44 = vld [vmem:[#allocation46_spill] sm:$0xff]  ;;  %s5382_s16 = sld [smem:[#allocation7 + $0x7]] }
 0x213   : > { %v5188_v37 = vsel %vm5162_vm7, %v1993_v8, 0.0  ;;  %v5203_v8 = vmul.f32 %v4894_v25, %v862_v7  ;;  %v1843_v10 = vadd.f32 %v5032_v5, %v1780_v20  ;;  %v2067_v40 = vmul.f32 %v2066_v22, %v5153_v45 }
 0x214   : > { %v2040_v34 = vmul.f32 %v2038_v59, %v5188_v37  ;;  %v1027_v59 = vrot.slane %v5174_v6, 1  ;;  %v544_v0 = vadd.f32 %v6692_v11, %v475_v23  ;;  %v750_v7 = vadd.f32 %v6693_v14, %v681_v60  ;;  %v6697_v23 = vld [vmem:[#allocation19_spill] sm:$0xff]  ;;  %v6698_v60 = vld [vmem:[#allocation45_spill] sm:$0xff] }
 0x215   : > { %v2054_v53 = vmul.f32 %v2052_v41, %v5188_v37  ;;  %v1225_v41 = vmul.f32 %v4877_v54, %v1224_v2  ;;  %v374_v20 = vadd.f32 %v6697_v23, %v5000_v36  ;;  %v1226_v11 = vmul.f32 %v4881_v1, %v1224_v2  ;;  %v6711_v54 = vld [vmem:[#allocation53_spill] sm:$0xff] }
 0x216   : > { %2045 = vrot.lane.b32.xlu1 %v2040_v34, %s3997_s6  ;;  %2057 = vrot.lane.b32.xlu0 %v2053_v39, %s3997_s6  ;;  %v619_v3 = vadd.f32 %v6694_v33, %v544_v0  ;;  %v6695_v34 = vld [vmem:[#allocation41_spill] sm:$0xff]  ;;  %v1918_v39 = vadd.f32 %v1912_v58, %v1843_v10  ;;  %v825_v13 = vadd.f32 %v6696_v44, %v750_v7  ;;  %v6702_v10 = vld [vmem:[#allocation20_spill] sm:$0xff] }
 0x217   : > { %v751_v30 = vadd.f32 %v6695_v34, %v682_v62  ;;  %v5228_v5 = vsel %vm445_vm0, %v1025_v4, %v1027_v59  ;;  %v5238_v0 = vmul.f32 %v4894_v25, %v1224_v2  ;;  %v6701_v4 = vld [vmem:[#allocation18_spill] sm:$0xff]  ;;  %v376_v36 = vadd.f32 %v6702_v10, %v5006_v15  ;;  %v6703_v25 = vld [vmem:[#allocation23_spill] sm:$0xff] }
 0x218   : > { %v375_v62 = vadd.f32 %v6701_v4, %v4998_v50  ;;  %v2081_v1 = vmul.f32 %v2080_v16, %v5153_v45  ;;  %v434_v2 = vadd.f32 %v6703_v25, %v374_v20  ;;  %v683_v14 = vadd.f32 %v6704_v38, %v619_v3  ;;  %v6706_v50 = vld [vmem:[#allocation26_spill] sm:$0xff]  ;;  %v6714_v25 = vld [vmem:[#allocation57_spill] sm:$0xff] }
 0x219   : > { %v826_v58 = vadd.f32 %v6698_v60, %v751_v30  ;;  %v2068_v30 = vmul.f32 %v2066_v22, %v5188_v37  ;;  %v1994_v7 = vmax.f32 %v1918_v39, 0.0  ;;  %v866_v44 = vadd.f32 %v863_v49, %v825_v13 }
 0x21a   : > { %2059 = vrot.lane.b32.xlu1 %v2054_v53, %s3997_s6  ;;  %2071 = vrot.lane.b32.xlu0 %v2067_v40, %s3997_s6  ;;  %v2094_v53 = vstv %s5200_s23  ;;  %v6705_v40 = vld [vmem:[#allocation25_spill] sm:$0xff]  ;;  %v435_v34 = vadd.f32 %v6706_v50, %v375_v62  ;;  %v1231_v15 = vrot.slane %v1225_v41, 2  ;;  %v752_v3 = vadd.f32 %v6709_v46, %v683_v14  ;;  %v6710_v41 = vld [vmem:[#allocation51_spill] sm:$0xff]  ;;  %v6715_v14 = vld [vmem:[#allocation58_spill] sm:$0xff]  ;;  %s5418_s23 = sld [smem:[#allocation7 + $0x3d]] }
 0x21b   : > { %v436_v33 = vadd.f32 %v6705_v40, %v376_v36  ;;  %v867_v39 = vadd.f32 %v864_v55, %v826_v58  ;;  %v1232_v49 = vrot.slane %v1226_v11, 2  ;;  %v6556_v13 = vrot.slane %v5238_v0, 2  ;;  %v6716_v46 = vld [vmem:[#allocation30_spill] sm:$0xff] }
 0x21c   : > { %v914_v23 = vadd.f32 %v6710_v41, %v866_v44  ;;  %v2082_v56 = vmul.f32 %v2080_v16, %v5188_v37  ;;  %v2095_v20 = vmul.f32 %v2094_v53, %v5153_v45  ;;  %v2173_v60 = vstv %s5217_s26  ;;  %v6718_v41 = vld [vmem:[#allocation32_spill] sm:$0xff]  ;;  %s5434_s26 = sld [smem:[#allocation7 + $0x8]] }
 0x21d   : > { %v915_v4 = vadd.f32 %v6711_v54, %v867_v39  ;;  %v5284_v62 = vsel %vm5267_vm10, %v1994_v7, 0.0  ;;  %v2108_v55 = vstv %s5222_s7  ;;  %v2175_v58 = vmul.f32 %v2173_v60, %v5188_v37  ;;  %s5452_s7 = sld [smem:[#allocation7 + $0x23]] }
 0x21e   : > { %2073 = vrot.lane.b32.xlu1 %v2068_v30, %s3997_s6  ;;  %2085 = vrot.lane.b32.xlu0 %v2081_v1, %s6557_s11  ;;  %v493_v11 = vadd.f32 %v5114_v57, %v435_v34  ;;  %v492_v10 = vadd.f32 %v5117_v12, %v434_v2  ;;  %v6712_v16 = vrot.slane %v5027_v48, 1  ;;  %v6713_v30 = vld [vmem:[#allocation48_spill] sm:$0xff]  ;;  %v974_v7 = vadd.f32 %v6715_v14, %v914_v23 }
 0x21f   : > { %v827_v1 = vadd.f32 %v6713_v30, %v752_v3  ;;  %v975_v38 = vadd.f32 %v6714_v25, %v915_v4  ;;  %v2174_v57 = vmul.f32 %v2173_v60, %v5153_v45  ;;  %v2096_v12 = vmul.f32 %v2094_v53, %v5188_v37  ;;  %v6717_v3 = vld [vmem:[#allocation31_spill] sm:$0xff]  ;;  %v6720_v14 = vld [vmem:[#allocation52_spill] sm:$0xff] }
 0x220   : > { %v494_v36 = vadd.f32 %v6712_v16, %v436_v33  ;;  %v2109_v48 = vmul.f32 %v2108_v55, %v5153_v45  ;;  %v2176_v2 = vmul.f32 %v2173_v60, %v5284_v62  ;;  %v2194_v40 = vstv %s5253_s8  ;;  %s5461_s8 = sld [smem:[#allocation2 + $0x3f]] }
 0x221   : > { %v1233_v33 = vsel %vm653_vm1, %v1231_v15, %v1232_v49  ;;  %v5310_v50 = vsel %vm653_vm1, %v1232_v49, %v6556_v13  ;;  %v2181_v34 = vrot.slane %v2175_v58, 1  ;;  %v2196_v44 = vmul.f32 %v2194_v40, %v5188_v37 }
 0x222   : > { %2087 = vrot.lane.b32.xlu1 %v2082_v56, %s6557_s11  ;;  %2099 = vrot.lane.b32.xlu0 %v2095_v20, %s6557_s11  ;;  %v5314_v53 = vadd.f32 %v6716_v46, %v493_v11  ;;  %v5317_v39 = vadd.f32 %v6717_v3, %v492_v10  ;;  %v5320_v23 = vadd.f32 %v6718_v41, %v494_v36  ;;  %v5323_v56 = vstv %s5261_s9  ;;  %s5471_s9 = sld [smem:[#allocation7 + $0x3e]] }
 0x223   : > { %v868_v15 = vadd.f32 %v5203_v8, %v827_v1  ;;  %v1032_v49 = vadd.f32 %v5206_v61, %v974_v7  ;;  %v2180_v20 = vrot.slane %v2174_v57, 1  ;;  %v2195_v60 = vmul.f32 %v2194_v40, %v5153_v45  ;;  %v6719_v61 = vld [vmem:[#allocation63_spill] sm:$0xff]  ;;  %v5340_v1 = vld [vmem:[%s4157_s25 + $0x30] sm:$0xff] }
 0x224   : > { %v1033_v54 = vadd.f32 %v5228_v5, %v975_v38  ;;  %v2110_v4 = vmul.f32 %v2108_v55, %v5188_v37  ;;  %v2183_v58 = vrot.slane %v2176_v2, 1  ;;  %v2215_v11 = vstv %s5279_s10  ;;  %v5347_v55 = vld [vmem:[%s4157_s25 + $0x38] sm:$0xff]  ;;  %v6721_v57 = vld [vmem:[#allocation65_spill] sm:$0xff]  ;;  %s5479_s10 = sld [smem:[#allocation2 + $0x42]] }
 0x225   : > { %v2182_v10 = vsel %vm445_vm0, %v2180_v20, %v2181_v34  ;;  %v2202_v16 = vrot.slane %v2196_v44, 1  ;;  %v2197_v8 = vmul.f32 %v2194_v40, %v5284_v62  ;;  %v2217_v36 = vmul.f32 %v2215_v11, %v5188_v37  ;;  %v6722_v40 = vld [vmem:[#allocation70_spill] sm:$0xff] }
 0x226   : > { %2101 = vrot.lane.b32.xlu1 %v2096_v12, %s6557_s11  ;;  %2113 = vrot.lane.b32.xlu0 %v2109_v48, %s6557_s11  ;;  %v1101_v30 = vadd.f32 %v6719_v61, %v1032_v49  ;;  %v5344_v5 = vmul.f32 %v5340_v1, %v5323_v56  ;;  %v5351_v25 = vmul.f32 %v5347_v55, %v5323_v56  ;;  %v1575_v38 = vstv %s5292_s13  ;;  %s5508_s13 = sld [smem:[#allocation7 + $0xa]] }
 0x227   : > { %v916_v7 = vadd.f32 %v6720_v14, %v868_v15  ;;  %v1102_v12 = vadd.f32 %v6721_v57, %v1033_v54  ;;  %v2201_v48 = vrot.slane %v2195_v60, 1  ;;  %v2216_v2 = vmul.f32 %v2215_v11, %v5153_v45 }
 0x228   : > { %v1176_v44 = vadd.f32 %v6722_v40, %v1101_v30  ;;  %v2184_v46 = vsel %vm445_vm0, %v2181_v34, %v2183_v58  ;;  %v2218_v3 = vmul.f32 %v2215_v11, %v5284_v62  ;;  %v2236_v41 = vstv %s5304_s14  ;;  %v6723_v58 = vld [vmem:[#allocation60_spill] sm:$0xff]  ;;  %s5523_s14 = sld [smem:[#allocation2 + $0x45]] }
 0x229   : > { %v2203_v49 = vsel %vm445_vm0, %v2201_v48, %v2202_v16  ;;  %v2204_v20 = vrot.slane %v2197_v8, 1  ;;  %v2238_v15 = vmul.f32 %v2236_v41, %v5188_v37  ;;  %v1576_v60 = vmul.f32 %v5340_v1, %v1575_v38  ;;  %v6724_v8 = vld [vmem:[#allocation69_spill] sm:$0xff] }
 0x22a   : > { %2115 = vrot.lane.b32.xlu1 %v2110_v4, %s6557_s11  ;;  %2185 = vrot.lane.b32.xlu0 %v2182_v10, %s3997_s6  ;;  %v2223_v4 = vrot.slane %v2217_v36, 1  ;;  %v1577_v54 = vmul.f32 %v5347_v55, %v1575_v38  ;;  %v5370_v10 = vld [vmem:[%s4157_s25 + $0x40] sm:$0xf]  ;;  %v976_v11 = vadd.f32 %v6723_v58, %v916_v7  ;;  %v1177_v36 = vadd.f32 %v6724_v8, %v1102_v12 }
 0x22b   : > { %v5373_v34 = vmul.f32 %v5370_v10, %v1575_v38  ;;  %v2222_v61 = vrot.slane %v2216_v2, 1  ;;  %v2237_v30 = vmul.f32 %v2236_v41, %v5153_v45  ;;  %v1239_v14 = vadd.f32 %v1233_v33, %v1176_v44 }
 0x22c   : > { %v2225_v57 = vrot.slane %v2218_v3, 1  ;;  %v2239_v38 = vmul.f32 %v2236_v41, %v5284_v62  ;;  %v2257_v48 = vstv %s5333_s30  ;;  %v2205_v40 = vsel %vm445_vm0, %v2202_v16, %v2204_v20  ;;  %v6726_v41 = vld [vmem:[#allocation83_spill] sm:$0xff]  ;;  %s5529_s30 = sld [smem:[#allocation7 + $0x25]] }
 0x22d   : > { %v2244_v13 = vrot.slane %v2238_v15, 1  ;;  %v2259_v7 = vmul.f32 %v2257_v48, %v5188_v37  ;;  %v1582_v2 = vrot.slane %v1576_v60, 1  ;;  %v1583_v58 = vrot.slane %v1577_v54, 1 }
 0x22e   : > { %2187 = vrot.lane.b32.xlu1 %v2184_v46, %s3997_s6  ;;  %2206 = vrot.lane.b32.xlu0 %v2203_v49, %s3997_s6  ;;  %v2224_v46 = vsel %vm445_vm0, %v2222_v61, %v2223_v4  ;;  %v6725_v49 = vld [vmem:[#allocation75_spill] sm:$0xff]  ;;  %v1585_v8 = vrot.slane %v5373_v34, 1  ;;  %v1034_v33 = vadd.f32 %v1027_v59, %v976_v11  ;;  %v1240_v16 = vadd.f32 %v5310_v50, %v1177_v36  ;;  %v6727_v50 = vld [vmem:[#allocation77_spill] sm:$0xff] }
 0x22f   : > { %v1308_v12 = vadd.f32 %v6725_v49, %v1239_v14  ;;  %v2243_v44 = vrot.slane %v2237_v30, 1  ;;  %v2258_v3 = vmul.f32 %v2257_v48, %v5153_v45  ;;  %v2226_v15 = vsel %vm445_vm0, %v2223_v4, %v2225_v57  ;;  %v6728_v57 = vld [vmem:[#allocation64_spill] sm:$0xff] }
 0x230   : > { %v2246_v60 = vrot.slane %v2239_v38, 1  ;;  %v2278_v54 = vstv %s5363_s12  ;;  %v2265_v14 = vrot.slane %v2259_v7, 1  ;;  %v2260_v6 = vmul.f32 %v2257_v48, %v5284_v62  ;;  %v6729_v7 = vld [vmem:[#allocation82_spill] sm:$0xff]  ;;  %s5548_s12 = sld [smem:[#allocation7 + $0x40]] }
 0x231   : > { %v1383_v20 = vadd.f32 %v6726_v41, %v1308_v12  ;;  %v2245_v61 = vsel %vm445_vm0, %v2243_v44, %v2244_v13  ;;  %v2280_v59 = vmul.f32 %v2278_v54, %v5188_v37  ;;  %v1309_v11 = vadd.f32 %v6727_v50, %v1240_v16 }
 0x232   : > { %2208 = vrot.lane.b32.xlu1 %v2205_v40, %s3997_s6  ;;  %2227 = vrot.lane.b32.xlu0 %v2224_v46, %s3997_s6  ;;  %v1584_v36 = vsel %vm445_vm0, %v1582_v2, %v1583_v58  ;;  %v5410_v30 = vsel %vm445_vm0, %v1583_v58, %v1585_v8  ;;  %v1782_v4 = vstv %s5375_s15  ;;  %v1103_v38 = vadd.f32 %v6728_v57, %v1034_v33  ;;  %s5565_s15 = sld [smem:[#allocation7 + $0xb]] }
 0x233   : > { %v2264_v40 = vrot.slane %v2258_v3, 1  ;;  %v2279_v48 = vmul.f32 %v2278_v54, %v5153_v45  ;;  %v2350_v46 = vstv %s5382_s16  ;;  %v1384_v49 = vadd.f32 %v6729_v7, %v1309_v11  ;;  %v6730_v3 = vld [vmem:[#allocation88_spill] sm:$0xff]  ;;  %s5579_s16 = sld [smem:[#allocation7 + $0x26]] }
 0x234   : > { %v1424_v12 = vadd.f32 %v5344_v5, %v1383_v20  ;;  %v2247_v2 = vsel %vm445_vm0, %v2244_v13, %v2246_v60  ;;  %v2281_v58 = vmul.f32 %v2278_v54, %v5284_v62  ;;  %v2267_v44 = vrot.slane %v2260_v6, 1  ;;  %v6731_v5 = vld [vmem:[#allocation72_spill] sm:$0xff] }
 0x235   : > { %v2266_v16 = vsel %vm445_vm0, %v2264_v40, %v2265_v14  ;;  %v2286_v41 = vrot.slane %v2280_v59, 1  ;;  %v2352_v33 = vmul.f32 %v2350_v46, %v5188_v37  ;;  %v1784_v50 = vmul.f32 %v5347_v55, %v1782_v4 }
 0x236   : > { %2229 = vrot.lane.b32.xlu1 %v2226_v15, %s3997_s6  ;;  %2248 = vrot.lane.b32.xlu0 %v2245_v61, %s6557_s11  ;;  %v1472_v15 = vadd.f32 %v6730_v3, %v1424_v12  ;;  %v1783_v61 = vmul.f32 %v5340_v1, %v1782_v4  ;;  %v1178_v13 = vadd.f32 %v6731_v5, %v1103_v38  ;;  %v2285_v20 = vrot.slane %v2279_v48, 1  ;;  %v6732_v48 = vld [vmem:[#allocation91_spill] sm:$0xff] }
 0x237   : > { %v2351_v60 = vmul.f32 %v2350_v46, %v5153_v45  ;;  %v2371_v54 = vstv %s5397_s17  ;;  %v1425_v6 = vadd.f32 %v5351_v25, %v1384_v49  ;;  %v2288_v11 = vrot.slane %v2281_v58, 1  ;;  %v6734_v58 = vld [vmem:[#allocation97_spill] sm:$0xff]  ;;  %s5584_s17 = sld [smem:[#allocation7 + $0xd]] }
 0x238   : > { %v1532_v59 = vadd.f32 %v4839_v27, %v1472_v15  ;;  %v2353_v57 = vmul.f32 %v2350_v46, %v5284_v62  ;;  %v2268_v40 = vsel %vm445_vm0, %v2265_v14, %v2267_v44  ;;  %v2287_v7 = vsel %vm445_vm0, %v2285_v20, %v2286_v41 }
 0x239   : > { %v2358_v12 = vrot.slane %v2352_v33, 2  ;;  %v2373_v38 = vmul.f32 %v2371_v54, %v5188_v37  ;;  %v1790_v3 = vrot.slane %v1784_v50, 2  ;;  %v5444_v5 = vmul.f32 %v5370_v10, %v1782_v4 }
 0x23a   : > { %2250 = vrot.lane.b32.xlu1 %v2247_v2, %s6557_s11  ;;  %2269 = vrot.lane.b32.xlu0 %v2266_v16, %s6557_s11  ;;  %v1473_v2 = vadd.f32 %v6732_v48, %v1425_v6  ;;  %v1789_v16 = vrot.slane %v1783_v61, 2  ;;  %v6733_v27 = vrot.slane %v5238_v0, 2  ;;  %v2357_v14 = vrot.slane %v2351_v60, 2 }
 0x23b   : > { %v2372_v46 = vmul.f32 %v2371_v54, %v5153_v45  ;;  %v2392_v49 = vstv %s5418_s23  ;;  %v1590_v33 = vadd.f32 %v1584_v36, %v1532_v59  ;;  %v2289_v15 = vsel %vm445_vm0, %v2286_v41, %v2288_v11  ;;  %v6736_v59 = vld [vmem:[#allocation76_spill] sm:$0xff]  ;;  %s5589_s23 = sld [smem:[#allocation2 + $0x48]] }
 0x23c   : > { %v1241_v25 = vadd.f32 %v6733_v27, %v1178_v13  ;;  %v1533_v44 = vadd.f32 %v6734_v58, %v1473_v2  ;;  %v2360_v4 = vrot.slane %v2353_v57, 2  ;;  %v2359_v61 = vsel %vm653_vm1, %v2357_v14, %v2358_v12  ;;  %v6735_v13 = vld [vmem:[#allocation35_spill] sm:$0xff] }
 0x23d   : > { %v2379_v50 = vrot.slane %v2373_v38, 2  ;;  %v2374_v20 = vmul.f32 %v2371_v54, %v5284_v62  ;;  %v2394_v0 = vmul.f32 %v2392_v49, %v5188_v37  ;;  %v642_v60 = vadd.f32 %v6735_v13, %v5317_v39 }
 0x23e   : > { %2271 = vrot.lane.b32.xlu1 %v2268_v40, %s6557_s11  ;;  %2290 = vrot.lane.b32.xlu0 %v2287_v7, %s6557_s11  ;;  %v1659_v6 = vadd.f32 %v4871_v24, %v1590_v33  ;;  %v1791_v36 = vsel %vm653_vm1, %v1789_v16, %v1790_v3  ;;  %v1792_v41 = vrot.slane %v5444_v5, 2  ;;  %v1310_v11 = vadd.f32 %v6736_v59, %v1241_v25 }
 0x23f   : > { %v2378_v54 = vrot.slane %v2372_v46, 2  ;;  %v2393_v57 = vmul.f32 %v2392_v49, %v5153_v45  ;;  %v2413_v40 = vstv %s5434_s26  ;;  %v1591_v39 = vadd.f32 %v5410_v30, %v1533_v44  ;;  %s5594_s26 = sld [smem:[#allocation7 + $0x41]] }
 0x240   : > { %v1734_v24 = vadd.f32 %v4937_v29, %v1659_v6  ;;  %v2361_v7 = vsel %vm653_vm1, %v2358_v12, %v2360_v4  ;;  %v2395_v38 = vmul.f32 %v2392_v49, %v5284_v62  ;;  %v2381_v2 = vrot.slane %v2374_v20, 2  ;;  %v6737_v12 = vld [vmem:[#allocation85_spill] sm:$0xff]  ;;  %v6739_v6 = vld [vmem:[#allocation38_spill] sm:$0xff] }
 0x241   : > { %v2380_v48 = vsel %vm653_vm1, %v2378_v54, %v2379_v50  ;;  %v2400_v16 = vrot.slane %v2394_v0, 2  ;;  %v2415_v27 = vmul.f32 %v2413_v40, %v5188_v37  ;;  %v1423_v25 = vmul.f32 %v5370_v10, %v5323_v56  ;;  %v6738_v0 = vld [vmem:[#allocation37_spill] sm:$0xff] }
 0x242   : > { %2292 = vrot.lane.b32.xlu1 %v2289_v15, %s6557_s11  ;;  %2362 = vrot.lane.b32.xlu0 %v2359_v61, %s3997_s6  ;;  %v1660_v30 = vadd.f32 %v4888_v42, %v1591_v39  ;;  %v1793_v29 = vsel %vm653_vm1, %v1790_v3, %v1792_v41  ;;  %v1385_v14 = vadd.f32 %v6737_v12, %v1310_v11  ;;  %v2399_v46 = vrot.slane %v2393_v57, 2  ;;  %v1933_v15 = vpop.permute.xlu0 %1932 }
 0x243   : > { %v2414_v49 = vmul.f32 %v2413_v40, %v5153_v45  ;;  %v2434_v58 = vstv %s5452_s7  ;;  %v1797_v56 = vadd.f32 %v1791_v36, %v1734_v24  ;;  %v2402_v33 = vrot.slane %v2395_v38, 2  ;;  %s5599_s7 = sld [smem:[#allocation7 + $0x28]] }
 0x244   : > { %v1735_v44 = vadd.f32 %v4935_v52, %v1660_v30  ;;  %v2416_v42 = vmul.f32 %v2413_v40, %v5284_v62  ;;  %v2382_v3 = vsel %vm653_vm1, %v2379_v50, %v2381_v2  ;;  %v2401_v4 = vsel %vm653_vm1, %v2399_v46, %v2400_v16 }
 0x245   : > { %v2421_v61 = vrot.slane %v2415_v27, 2  ;;  %v2436_v20 = vmul.f32 %v2434_v58, %v5188_v37  ;;  %v644_v13 = vadd.f32 %v6738_v0, %v5320_v23  ;;  %v643_v59 = vadd.f32 %v6739_v6, %v5314_v53  ;;  %v1935_v53 = vpop.permute.xlu1 %1934  ;;  %v6745_v6 = vld [vmem:[#allocation44_spill] sm:$0xff] }
 0x246   : > { %2364 = vrot.lane.b32.xlu1 %v2361_v7, %s3997_s6  ;;  %2383 = vrot.lane.b32.xlu0 %v2380_v48, %s3997_s6  ;;  %v870_v52 = vstv %s5461_s8  ;;  %v1866_v36 = vadd.f32 %v5030_v47, %v1797_v56  ;;  %v1426_v50 = vadd.f32 %v1423_v25, %v1385_v14  ;;  %v2420_v11 = vrot.slane %v2414_v49, 2  ;;  %v6740_v25 = vld [vmem:[#allocation90_spill] sm:$0xff]  ;;  %s5601_s8 = sld [smem:[#allocation2 + $0x4b]] }
 0x247   : > { %v2435_v54 = vmul.f32 %v2434_v58, %v5153_v45  ;;  %v2455_v57 = vstv %s5471_s9  ;;  %v1798_v40 = vadd.f32 %v1793_v29, %v1735_v44  ;;  %v2403_v23 = vsel %vm653_vm1, %v2400_v16, %v2402_v33  ;;  %s3704_s9 = sld [smem:[#allocation7 + $0x43]] }
 0x248   : > { %v1941_v39 = vadd.f32 %v1933_v15, %v1866_v36  ;;  %v2423_v24 = vrot.slane %v2416_v42, 2  ;;  %v2422_v47 = vsel %vm653_vm1, %v2420_v11, %v2421_v61  ;;  %v2442_v7 = vrot.slane %v2436_v20, 2  ;;  %v3848_v20 = vld [vmem:[%s4157_s25 + $0x20] sm:$0xff] }
 0x249   : > { %v2437_v38 = vmul.f32 %v2434_v58, %v5284_v62  ;;  %v2457_v48 = vmul.f32 %v2455_v57, %v5188_v37  ;;  %v700_v2 = vadd.f32 %v5184_v32, %v642_v60  ;;  %v1036_v27 = vstv %s5479_s10  ;;  %v6742_v32 = vld [vmem:[#allocation99_spill] sm:$0xff]  ;;  %s5618_s10 = sld [smem:[#allocation7 + $0xe]] }
 0x24a   : > { %2385 = vrot.lane.b32.xlu1 %v2382_v3, %s3997_s6  ;;  %2404 = vrot.lane.b32.xlu0 %v2401_v4, %s3997_s6  ;;  %v1474_v30 = vadd.f32 %v6740_v25, %v1426_v50  ;;  %v1867_v29 = vadd.f32 %v5054_v9, %v1798_v40  ;;  %v701_v16 = vadd.f32 %v5181_v18, %v643_v59  ;;  %v6741_v12 = vrot.slane %v5089_v63, 2  ;;  %v6743_v63 = vld [vmem:[#allocation43_spill] sm:$0xff]  ;;  %v3847_v3 = vld [vmem:[%s4157_s25 + $0x18] sm:$0xff]  ;;  %v6747_v25 = vld [vmem:[#allocation49_spill] sm:$0xff] }
 0x24b   : > { %v2441_v46 = vrot.slane %v2435_v54, 2  ;;  %v2456_v49 = vmul.f32 %v2455_v57, %v5153_v45  ;;  %v1998_v9 = vmax.f32 %v1941_v39, 0.0  ;;  %v2424_v44 = vsel %vm653_vm1, %v2421_v61, %v2423_v24  ;;  %v6744_v61 = vld [vmem:[#allocation42_spill] sm:$0xff]  ;;  %v6746_v11 = vld [vmem:[#allocation47_spill] sm:$0xff] }
 0x24c   : > { %v702_v14 = vadd.f32 %v6741_v12, %v644_v13  ;;  %v1534_v60 = vadd.f32 %v6742_v32, %v1474_v30  ;;  %v1942_v58 = vadd.f32 %v1935_v53, %v1867_v29  ;;  %v2444_v33 = vrot.slane %v2437_v38, 2  ;;  %v6748_v29 = vld [vmem:[#allocation50_spill] sm:$0xff] }
 0x24d   : > { %v2443_v56 = vsel %vm653_vm1, %v2441_v46, %v2442_v7  ;;  %v2463_v42 = vrot.slane %v2457_v48, 2  ;;  %v2458_v18 = vmul.f32 %v2455_v57, %v5284_v62  ;;  %v775_v15 = vadd.f32 %v6743_v63, %v700_v2  ;;  %v3849_v48 = vld [vmem:[%s4157_s25 + $0x28] sm:$0xf] }
 0x24e   : > { %2406 = vrot.lane.b32.xlu1 %v2403_v23, %s3997_s6  ;;  %2425 = vrot.lane.b32.xlu0 %v2422_v47, %s6557_s11  ;;  %v871_v4 = vmul.f32 %v3847_v3, %v870_v52  ;;  %v1038_v0 = vmul.f32 %v3848_v20, %v1036_v27  ;;  %v776_v13 = vadd.f32 %v6744_v61, %v701_v16  ;;  %v2462_v50 = vrot.slane %v2456_v49, 2 }
 0x24f   : > { %v777_v59 = vadd.f32 %v6745_v6, %v702_v14  ;;  %v1037_v36 = vmul.f32 %v3847_v3, %v1036_v27  ;;  %v850_v54 = vadd.f32 %v6746_v11, %v775_v15  ;;  %v1592_v57 = vadd.f32 %v1585_v8, %v1534_v60  ;;  %v1937_v11 = vpop.permute.xlu0 %1936 }
 0x250   : > { %v1999_v40 = vmax.f32 %v1942_v58, 0.0  ;;  %v2494_v39 = vstv %s5508_s13  ;;  %v5544_v23 = vsel %vm5133_vm6, %v1998_v9, 0.0  ;;  %v2445_v24 = vsel %vm653_vm1, %v2442_v7, %v2444_v33  ;;  %v6749_v58 = vld [vmem:[#allocation55_spill] sm:$0xff]  ;;  %s5636_s13 = sld [smem:[#allocation2 + $0x4e]] }
 0x251   : > { %v2464_v53 = vsel %vm653_vm1, %v2462_v50, %v2463_v42  ;;  %v2465_v47 = vrot.slane %v2458_v18, 2  ;;  %v872_v38 = vmul.f32 %v3848_v20, %v870_v52  ;;  %v873_v2 = vmul.f32 %v3849_v48, %v870_v52  ;;  %v6750_v18 = vld [vmem:[#allocation59_spill] sm:$0xff] }
 0x252   : > { %2427 = vrot.lane.b32.xlu1 %v2424_v44, %s6557_s11  ;;  %2446 = vrot.lane.b32.xlu0 %v2443_v56, %s6557_s11  ;;  %v1039_v34 = vmul.f32 %v3849_v48, %v1036_v27  ;;  %v1044_v8 = vrot.slane %v1038_v0, 1  ;;  %v852_v30 = vadd.f32 %v6747_v25, %v777_v59  ;;  %v851_v7 = vadd.f32 %v6748_v29, %v776_v13  ;;  %v6751_v0 = vld [vmem:[#allocation54_spill] sm:$0xff]  ;;  %v6752_v13 = vld [vmem:[#allocation56_spill] sm:$0xff] }
 0x253   : > { %v1043_v16 = vrot.slane %v1037_v36, 1  ;;  %v1661_v12 = vadd.f32 %v4886_v31, %v1592_v57  ;;  %v874_v14 = vadd.f32 %v871_v4, %v850_v54  ;;  %v1243_v46 = vstv %s5523_s14  ;;  %v6754_v57 = vld [vmem:[#allocation62_spill] sm:$0xff]  ;;  %s5645_s14 = sld [smem:[#allocation7 + $0x29]] }
 0x254   : > { %v2495_v49 = vmul.f32 %v2494_v39, %v5544_v23  ;;  %v5561_v52 = vsel %vm5162_vm7, %v1999_v40, 0.0  ;;  %v2466_v27 = vsel %vm653_vm1, %v2463_v42, %v2465_v47  ;;  %v2508_v60 = vstv %s5529_s30  ;;  %s5651_s30 = sld [smem:[#allocation7 + $0x44]] }
 0x255   : > { %v1736_v32 = vadd.f32 %v4956_v43, %v1661_v12  ;;  %v934_v9 = vadd.f32 %v6749_v58, %v874_v14  ;;  %v1046_v44 = vrot.slane %v1039_v34, 1  ;;  %v875_v31 = vadd.f32 %v872_v38, %v851_v7  ;;  %v6757_v14 = vld [vmem:[#allocation66_spill] sm:$0xff] }
 0x256   : > { %2448 = vrot.lane.b32.xlu1 %v2445_v24, %s6557_s11  ;;  %2467 = vrot.lane.b32.xlu0 %v2464_v53, %s6557_s11  ;;  %v876_v56 = vadd.f32 %v873_v2, %v852_v30  ;;  %v1045_v43 = vsel %vm445_vm0, %v1043_v16, %v1044_v8  ;;  %v1245_v33 = vmul.f32 %v3848_v20, %v1243_v46  ;;  %v2522_v36 = vstv %s5548_s12  ;;  %v6755_v2 = vld [vmem:[#allocation67_spill] sm:$0xff]  ;;  %s5667_s12 = sld [smem:[#allocation7]] }
 0x257   : > { %v994_v63 = vadd.f32 %v6750_v18, %v934_v9  ;;  %v1244_v15 = vmul.f32 %v3847_v3, %v1243_v46  ;;  %v2496_v42 = vmul.f32 %v2494_v39, %v5561_v52  ;;  %v2509_v4 = vmul.f32 %v2508_v60, %v5544_v23  ;;  %v6753_v3 = vld [vmem:[#allocation61_spill] sm:$0xff]  ;;  %v6756_v30 = vld [vmem:[#allocation71_spill] sm:$0xff] }
 0x258   : > { %v935_v61 = vadd.f32 %v6751_v0, %v875_v31  ;;  %v936_v6 = vadd.f32 %v6752_v13, %v876_v56  ;;  %v1799_v59 = vadd.f32 %v1792_v41, %v1736_v32  ;;  %v1047_v50 = vsel %vm445_vm0, %v1044_v8, %v1046_v44  ;;  %v6759_v9 = vld [vmem:[#allocation73_spill] sm:$0xff]  ;;  %v6760_v31 = vld [vmem:[#allocation74_spill] sm:$0xff] }
 0x259   : > { %v1246_v20 = vmul.f32 %v3849_v48, %v1243_v46  ;;  %v1251_v5 = vrot.slane %v1245_v33, 2  ;;  %v1051_v39 = vadd.f32 %v1045_v43, %v994_v63  ;;  %v1250_v24 = vrot.slane %v1244_v15, 2 }
 0x25a   : > { %2469 = vrot.lane.b32.xlu1 %v2466_v27, %s6557_s11  ;;  %2499 = vrot.lane.b32.xlu0 %v2495_v49, %s3997_s6  ;;  %v996_v54 = vadd.f32 %v6753_v3, %v936_v6  ;;  %v995_v40 = vadd.f32 %v6754_v57, %v935_v61  ;;  %v1868_v41 = vadd.f32 %v5052_v35, %v1799_v59  ;;  %v2536_v48 = vstv %s5565_s15  ;;  %v6758_v49 = vld [vmem:[#allocation68_spill] sm:$0xff]  ;;  %v6761_v59 = vld [vmem:[#allocation79_spill] sm:$0xff]  ;;  %s5676_s15 = sld [smem:[#allocation8]] }
 0x25b   : > { %v2510_v53 = vmul.f32 %v2508_v60, %v5561_v52  ;;  %v2523_v47 = vmul.f32 %v2522_v36, %v5544_v23  ;;  %v1126_v34 = vadd.f32 %v6755_v2, %v1051_v39  ;;  %v1253_v25 = vrot.slane %v1246_v20, 2  ;;  %v6763_v2 = vld [vmem:[#allocation80_spill] sm:$0xff] }
 0x25c   : > { %v1943_v38 = vadd.f32 %v1937_v11, %v1868_v41  ;;  %v1052_v35 = vadd.f32 %v1047_v50, %v995_v40  ;;  %v1053_v8 = vadd.f32 %v1046_v44, %v996_v54  ;;  %v1252_v7 = vsel %vm653_vm1, %v1250_v24, %v1251_v5 }
 0x25d   : > { %v1201_v29 = vadd.f32 %v6756_v30, %v1126_v34  ;;  %v2524_v16 = vmul.f32 %v2522_v36, %v5561_v52  ;;  %v2537_v12 = vmul.f32 %v2536_v48, %v5544_v23  ;;  %v2550_v60 = vstv %s5579_s16  ;;  %s5683_s16 = sld [smem:[#allocation7 + $0x10]] }
 0x25e   : > { %2501 = vrot.lane.b32.xlu1 %v2496_v42, %s3997_s6  ;;  %2513 = vrot.lane.b32.xlu0 %v2509_v4, %s3997_s6  ;;  %v1127_v46 = vadd.f32 %v6757_v14, %v1052_v35  ;;  %v1128_v32 = vadd.f32 %v6758_v49, %v1053_v8  ;;  %v2000_v27 = vmax.f32 %v1943_v38, 0.0  ;;  %v2629_v58 = vstv %s5584_s17  ;;  %v6762_v38 = vld [vmem:[#allocation78_spill] sm:$0xff]  ;;  %v6764_v35 = vld [vmem:[#allocation84_spill] sm:$0xff]  ;;  %s5687_s17 = sld [smem:[#allocation8 + $0x1]] }
 0x25f   : > { %v1254_v43 = vsel %vm653_vm1, %v1251_v5, %v1253_v25  ;;  %v1258_v33 = vadd.f32 %v1252_v7, %v1201_v29  ;;  %v2538_v18 = vmul.f32 %v2536_v48, %v5561_v52  ;;  %v2551_v63 = vmul.f32 %v2550_v60, %v5544_v23 }
 0x260   : > { %v1203_v44 = vadd.f32 %v6759_v9, %v1128_v32  ;;  %v1202_v56 = vadd.f32 %v6760_v31, %v1127_v46  ;;  %v5622_v15 = vsel %vm5267_vm10, %v2000_v27, 0.0  ;;  %v2564_v42 = vstv %s5594_s26  ;;  %s5706_s26 = sld [smem:[#allocation7 + $0x2b]] }
 0x261   : > { %v2630_v4 = vmul.f32 %v2629_v58, %v5544_v23  ;;  %v2631_v0 = vmul.f32 %v2629_v58, %v5561_v52  ;;  %v1428_v61 = vstv %s5589_s23  ;;  %v2650_v13 = vstv %s5599_s7  ;;  %s5695_s23 = sld [smem:[#allocation7 + $0x1b]] }
 0x262   : > { %2515 = vrot.lane.b32.xlu1 %v2510_v53, %s3997_s6  ;;  %2527 = vrot.lane.b32.xlu0 %v2523_v47, %s3997_s6  ;;  %v1259_v6 = vadd.f32 %v1254_v43, %v1202_v56  ;;  %v1333_v36 = vadd.f32 %v6761_v59, %v1258_v33  ;;  %v1260_v50 = vadd.f32 %v1253_v25, %v1203_v44  ;;  %v1594_v20 = vstv %s5601_s8  ;;  %v6766_v44 = vld [vmem:[#allocation87_spill] sm:$0xff]  ;;  %s5712_s7 = sld [smem:[#allocation7 + $0x46]] }
 0x263   : > { %v2552_v11 = vmul.f32 %v2550_v60, %v5561_v52  ;;  %v2565_v3 = vmul.f32 %v2564_v42, %v5544_v23  ;;  %v2632_v54 = vmul.f32 %v2629_v58, %v5622_v15  ;;  %v2671_v57 = vstv %s3704_s9  ;;  %v6765_v58 = vld [vmem:[#allocation86_spill] sm:$0xff]  ;;  %s5721_s8 = sld [smem:[#allocation8 + $0x2]] }
 0x264   : > { %v2636_v40 = vrot.slane %v2630_v4, 1  ;;  %v2637_v5 = vrot.slane %v2631_v0, 1  ;;  %v2651_v41 = vmul.f32 %v2650_v13, %v5544_v23  ;;  %v2652_v39 = vmul.f32 %v2650_v13, %v5561_v52  ;;  %s5731_s9 = sld [smem:[#allocation7 + $0x36]] }
 0x265   : > { %v1430_v24 = vmul.f32 %v5347_v55, %v1428_v61  ;;  %v1429_v53 = vmul.f32 %v5340_v1, %v1428_v61  ;;  %v1596_v47 = vmul.f32 %v5347_v55, %v1594_v20  ;;  %v1334_v48 = vadd.f32 %v6762_v38, %v1259_v6 }
 0x266   : > { %2529 = vrot.lane.b32.xlu1 %v2524_v16, %s3997_s6  ;;  %2541 = vrot.lane.b32.xlu0 %v2537_v12, %s6557_s11  ;;  %v1335_v34 = vadd.f32 %v6763_v2, %v1260_v50  ;;  %v1408_v8 = vadd.f32 %v6764_v35, %v1333_v36  ;;  %v2653_v25 = vmul.f32 %v2650_v13, %v5622_v15  ;;  %v2692_v16 = vstv %s5618_s10  ;;  %v6768_v35 = vld [vmem:[#allocation92_spill] sm:$0xff]  ;;  %s5736_s10 = sld [smem:[#allocation7 + $0x3]] }
 0x267   : > { %v2566_v30 = vmul.f32 %v2564_v42, %v5561_v52  ;;  %v2672_v29 = vmul.f32 %v2671_v57, %v5544_v23  ;;  %v2673_v7 = vmul.f32 %v2671_v57, %v5561_v52  ;;  %v2638_v12 = vsel %vm445_vm0, %v2636_v40, %v2637_v5 }
 0x268   : > { %v2639_v14 = vrot.slane %v2632_v54, 1  ;;  %v2657_v46 = vrot.slane %v2651_v41, 1  ;;  %v2658_v49 = vrot.slane %v2652_v39, 1  ;;  %v1431_v32 = vmul.f32 %v5370_v10, %v1428_v61 }
 0x269   : > { %v5660_v27 = vmul.f32 %v5370_v10, %v1594_v20  ;;  %v1595_v60 = vmul.f32 %v5340_v1, %v1594_v20  ;;  %v1410_v9 = vadd.f32 %v6765_v58, %v1335_v34  ;;  %v1409_v31 = vadd.f32 %v6766_v44, %v1334_v48 }
 0x26a   : > { %2543 = vrot.lane.b32.xlu1 %v2538_v18, %s6557_s11  ;;  %2555 = vrot.lane.b32.xlu0 %v2551_v63, %s6557_s11  ;;  %v1602_v56 = vrot.slane %v1596_v47, 1  ;;  %v2660_v43 = vrot.slane %v2653_v25, 1  ;;  %v2678_v33 = vrot.slane %v2672_v29, 1  ;;  %v2679_v18 = vrot.slane %v2673_v7, 1  ;;  %v6769_v25 = vld [vmem:[#allocation94_spill] sm:$0xff] }
 0x26b   : > { %v2674_v63 = vmul.f32 %v2671_v57, %v5622_v15  ;;  %v2693_v42 = vmul.f32 %v2692_v16, %v5544_v23  ;;  %v1432_v4 = vadd.f32 %v1429_v53, %v1408_v8  ;;  %v2640_v0 = vsel %vm445_vm0, %v2637_v5, %v2639_v14  ;;  %v6770_v29 = vld [vmem:[#allocation98_spill] sm:$0xff] }
 0x26c   : > { %v2659_v61 = vsel %vm445_vm0, %v2657_v46, %v2658_v49  ;;  %v5674_v13 = vmul.f32 %v2692_v16, %v5561_v52  ;;  %v1604_v6 = vrot.slane %v5660_v27, 1  ;;  %v1601_v59 = vrot.slane %v1595_v60, 1 }
 0x26d   : > { %v1801_v36 = vstv %s5636_s13  ;;  %v2713_v50 = vstv %s5645_s14  ;;  %v1433_v20 = vadd.f32 %v1430_v24, %v1409_v31  ;;  %v1434_v54 = vadd.f32 %v1431_v32, %v1410_v9  ;;  %v5725_v31 = vpop.permute.xlu1 %1957  ;;  %s5748_s13 = sld [smem:[#allocation7 + $0x11]] }
 0x26e   : > { %2557 = vrot.lane.b32.xlu1 %v2552_v11, %s6557_s11  ;;  %2569 = vrot.lane.b32.xlu0 %v2565_v3, %s6557_s11  ;;  %v6767_v11 = vld [vmem:[#allocation93_spill] sm:$0xff]  ;;  %v2734_v57 = vstv %s5651_s30  ;;  %v2661_v40 = vsel %vm445_vm0, %v2658_v49, %v2660_v43  ;;  %v2680_v5 = vsel %vm445_vm0, %v2678_v33, %v2679_v18  ;;  %v2681_v41 = vrot.slane %v2674_v63, 1  ;;  %s5757_s14 = sld [smem:[#allocation7 + $0x2c]] }
 0x26f   : > { %v1492_v3 = vadd.f32 %v6767_v11, %v1432_v4  ;;  %v2699_v39 = vrot.slane %v2693_v42, 1  ;;  %v2700_v53 = vrot.slane %v5674_v13, 1  ;;  %v2695_v47 = vmul.f32 %v2692_v16, %v5622_v15  ;;  %s5763_s30 = sld [smem:[#allocation7 + $0x1e]] }
 0x270   : > { %v2714_v38 = vmul.f32 %v2713_v50, %v5544_v23  ;;  %v2715_v24 = vmul.f32 %v2713_v50, %v5561_v52  ;;  %v1605_v48 = vsel %vm445_vm0, %v1602_v56, %v1604_v6  ;;  %v1603_v2 = vsel %vm445_vm0, %v1601_v59, %v1602_v56 }
 0x271   : > { %v5702_v34 = vmul.f32 %v5347_v55, %v1801_v36  ;;  %v1493_v8 = vadd.f32 %v6768_v35, %v1433_v20  ;;  %v1552_v7 = vadd.f32 %v6770_v29, %v1492_v3  ;;  %v2020_v16 = vstv %s5667_s12  ;;  %s6122_s12 = sld [smem:[#allocation7 + $0x4d]] }
 0x272   : > { %2571 = vrot.lane.b32.xlu1 %v2566_v30, %s6557_s11  ;;  %2641 = vrot.lane.b32.xlu0 %v2638_v12, %s3997_s6  ;;  %v1494_v30 = vadd.f32 %v6769_v25, %v1434_v54  ;;  %v2682_v55 = vsel %vm445_vm0, %v2679_v18, %v2681_v41  ;;  %v2716_v12 = vmul.f32 %v2713_v50, %v5622_v15  ;;  %v2702_v32 = vrot.slane %v2695_v47, 1  ;;  %v6771_v18 = vld [vmem:[#allocation100_spill] sm:$0xff]  ;;  %v6772_v41 = vld [vmem:[#allocation102_spill] sm:$0xff] }
 0x273   : > { %v2735_v14 = vmul.f32 %v2734_v57, %v5544_v23  ;;  %v5718_v46 = vmul.f32 %v2734_v57, %v5561_v52  ;;  %v2701_v49 = vsel %vm445_vm0, %v2699_v39, %v2700_v53  ;;  %v2720_v60 = vrot.slane %v2714_v38, 1 }
 0x274   : > { %v2721_v58 = vrot.slane %v2715_v24, 1  ;;  %v1809_v9 = vrot.slane %v5702_v34, 2  ;;  %v1802_v44 = vmul.f32 %v5340_v1, %v1801_v36  ;;  %v2011_v56 = vstv %s5676_s15  ;;  %v5738_v1 = vpop.permute.xlu0 %1959  ;;  %s6132_s15 = sld [smem:[#allocation7 + $0x24]] }
 0x275   : > { %v2806_v43 = vstv %s5683_s16  ;;  %v1554_v33 = vadd.f32 %v4855_v28, %v1494_v30  ;;  %v1553_v63 = vadd.f32 %v6771_v18, %v1493_v8  ;;  %v1609_v42 = vadd.f32 %v1603_v2, %v1552_v7  ;;  %s5775_s16 = sld [smem:[#allocation7 + $0x39]] }
 0x276   : > { %2643 = vrot.lane.b32.xlu1 %v2640_v0, %s3997_s6  ;;  %2662 = vrot.lane.b32.xlu0 %v2659_v61, %s3997_s6  ;;  %v2014_v4 = vstv %s5687_s17  ;;  %v2723_v0 = vrot.slane %v2716_v12, 1  ;;  %v2741_v61 = vrot.slane %v2735_v14, 1  ;;  %v2742_v13 = vrot.slane %v5718_v46, 1  ;;  %v6774_v14 = vld [vmem:[#allocation103_spill] sm:$0xff]  ;;  %s6136_s17 = sld [smem:[#allocation7 + $0x19]] }
 0x277   : > { %v2737_v59 = vmul.f32 %v2734_v57, %v5622_v15  ;;  %v2703_v50 = vsel %vm445_vm0, %v2700_v53, %v2702_v32  ;;  %v2722_v28 = vsel %vm445_vm0, %v2720_v60, %v2721_v58  ;;  %v2807_v20 = vmul.f32 %v2806_v43, %v5544_v23 }
 0x278   : > { %v5746_v11 = vmul.f32 %v2806_v43, %v5561_v52  ;;  %v5751_v3 = vmul.f32 %v5370_v10, %v1801_v36  ;;  %v1808_v54 = vrot.slane %v1802_v44, 2  ;;  %v2026_v57 = vstv %s5695_s23  ;;  %v5765_v10 = vpop.permute.xlu1 %1961  ;;  %s6142_s23 = sld [smem:[#allocation7 + $0x3f]] }
 0x279   : > { %v1684_v39 = vadd.f32 %v6772_v41, %v1609_v42  ;;  %v1611_v53 = vadd.f32 %v1604_v6, %v1554_v33  ;;  %v2848_v47 = vstv %s5712_s7  ;;  %v2724_v38 = vsel %vm445_vm0, %v2721_v58, %v2723_v0  ;;  %s5793_s7 = sld [smem:[#allocation7 + $0x47]] }
 0x27a   : > { %2664 = vrot.lane.b32.xlu1 %v2661_v40, %s3997_s6  ;;  %2683 = vrot.lane.b32.xlu0 %v2680_v5, %s3997_s6  ;;  %v2827_v40 = vstv %s5706_s26  ;;  %v1610_v5 = vadd.f32 %v1605_v48, %v1553_v63  ;;  %v2743_v24 = vsel %vm445_vm0, %v2741_v61, %v2742_v13  ;;  %v2744_v2 = vrot.slane %v2737_v59, 1  ;;  %s5785_s26 = sld [smem:[#allocation7 + $0x6]] }
 0x27b   : > { %v2809_v48 = vmul.f32 %v2806_v43, %v5622_v15  ;;  %v2813_v35 = vrot.slane %v2807_v20, 2  ;;  %v2814_v27 = vrot.slane %v5746_v11, 2  ;;  %v2828_v6 = vmul.f32 %v2827_v40, %v5544_v23  ;;  %v6776_v20 = vld [vmem:[#allocation105_spill] sm:$0xff] }
 0x27c   : > { %v2829_v8 = vmul.f32 %v2827_v40, %v5561_v52  ;;  %v1811_v25 = vrot.slane %v5751_v3, 2  ;;  %v1810_v30 = vsel %vm653_vm1, %v1808_v54, %v1809_v9  ;;  %v2017_v29 = vstv %s5721_s8  ;;  %v6777_v3 = vld [vmem:[#allocation106_spill] sm:$0xff]  ;;  %s6146_s8 = sld [smem:[#allocation7 + $0x34]] }
 0x27d   : > { %v2032_v7 = vstv %s5731_s9  ;;  %v1686_v46 = vadd.f32 %v6774_v14, %v1611_v53  ;;  %v5791_v60 = vstv %s5736_s10  ;;  %v2745_v43 = vsel %vm445_vm0, %v2742_v13, %v2744_v2  ;;  %s5804_s10 = sld [smem:[#allocation7 + $0x21]] }
 0x27e   : > { %2685 = vrot.lane.b32.xlu1 %v2682_v55, %s3997_s6  ;;  %2704 = vrot.lane.b32.xlu0 %v2701_v49, %s6557_s11  ;;  %v6773_v55 = vld [vmem:[#allocation101_spill] sm:$0xff]  ;;  %v6775_v49 = vld [vmem:[#allocation104_spill] sm:$0xff]  ;;  %v2816_v33 = vrot.slane %v2809_v48, 2  ;;  %v2830_v18 = vmul.f32 %v2827_v40, %v5622_v15  ;;  %v2849_v63 = vmul.f32 %v2848_v47, %v5544_v23  ;;  %v2815_v42 = vsel %vm653_vm1, %v2813_v35, %v2814_v27  ;;  %s6158_s9 = sld [smem:[#allocation7 + $0x4f]] }
 0x27f   : > { %v1685_v12 = vadd.f32 %v6773_v55, %v1610_v5  ;;  %v1759_v32 = vadd.f32 %v6775_v49, %v1684_v39  ;;  %v2834_v0 = vrot.slane %v2828_v6, 2  ;;  %v2835_v61 = vrot.slane %v2829_v8, 2 }
 0x280   : > { %v2850_v59 = vmul.f32 %v2848_v47, %v5561_v52  ;;  %v2869_v13 = vstv %s5748_s13  ;;  %v1761_v11 = vadd.f32 %v6776_v20, %v1686_v46  ;;  %v5818_v5 = vstv %s5763_s30  ;;  %s5828_s13 = sld [smem:[#allocation7 + $0x2e]] }
 0x281   : > { %v1760_v54 = vadd.f32 %v6777_v3, %v1685_v12  ;;  %v1816_v40 = vadd.f32 %v1810_v30, %v1759_v32  ;;  %v2817_v41 = vsel %vm653_vm1, %v2814_v27, %v2816_v33  ;;  %v2837_v39 = vrot.slane %v2830_v18, 2  ;;  %s5840_s30 = sld [smem:[#allocation7 + $0x14]] }
 0x282   : > { %2706 = vrot.lane.b32.xlu1 %v2703_v50, %s6557_s11  ;;  %2725 = vrot.lane.b32.xlu0 %v2722_v28, %s6557_s11  ;;  %v1812_v50 = vsel %vm653_vm1, %v1809_v9, %v1811_v25  ;;  %v2890_v28 = vstv %s5757_s14  ;;  %v2855_v53 = vrot.slane %v2849_v63, 2  ;;  %v2856_v2 = vrot.slane %v2850_v59, 2  ;;  %s5833_s14 = sld [smem:[#allocation7 + $0x49]] }
 0x283   : > { %v2870_v48 = vmul.f32 %v2869_v13, %v5544_v23  ;;  %v2871_v35 = vmul.f32 %v2869_v13, %v5561_v52  ;;  %v5838_v27 = vstv %s5775_s16  ;;  %v1817_v6 = vadd.f32 %v1812_v50, %v1760_v54  ;;  %s5856_s16 = sld [smem:[#allocation7 + $0x4a]] }
 0x284   : > { %v5767_v36 = vpop.permute.xlu0 %2043  ;;  %v1891_v8 = vadd.f32 %v5077_v21, %v1816_v40  ;;  %v1818_v30 = vadd.f32 %v1811_v25, %v1761_v11  ;;  %v2911_v55 = vstv %s5793_s7  ;;  %v2838_v46 = vsel %vm653_vm1, %v2835_v61, %v2837_v39  ;;  %s5870_s7 = sld [smem:[#allocation7 + $0x31]] }
 0x285   : > { %v2872_v32 = vmul.f32 %v2869_v13, %v5622_v15  ;;  %v2857_v21 = vsel %vm653_vm1, %v2855_v53, %v2856_v2  ;;  %v2876_v25 = vrot.slane %v2870_v48, 2  ;;  %v2877_v33 = vrot.slane %v2871_v35, 2 }
 0x286   : > { %2727 = vrot.lane.b32.xlu1 %v2724_v38, %s6557_s11  ;;  %2746 = vrot.lane.b32.xlu0 %v2743_v24, %s6557_s11  ;;  %v2851_v38 = vmul.f32 %v2848_v47, %v5622_v15  ;;  %v2836_v24 = vsel %vm653_vm1, %v2834_v0, %v2835_v61  ;;  %v5843_v47 = vstv %s5785_s26  ;;  %v2892_v18 = vmul.f32 %v2890_v28, %v5561_v52  ;;  %s5860_s26 = sld [smem:[#allocation7 + $0x16]] }
 0x287   : > { %v5865_v63 = vstv %s5804_s10  ;;  %v1892_v0 = vadd.f32 %v5075_v17, %v1817_v6  ;;  %v1893_v61 = vadd.f32 %v5120_v26, %v1818_v30  ;;  %v1966_v59 = vadd.f32 %v5725_v31, %v1891_v8  ;;  %s6172_s10 = sld [smem:[#allocation7 + $0x1a]] }
 0x288   : > { %v5795_v58 = vpop.permute.xlu1 %2045  ;;  %v5797_v44 = vpop.permute.xlu0 %2057  ;;  %v2858_v49 = vrot.slane %v2851_v38, 2  ;;  %v2950_v50 = vstv %s5820_s1  ;;  %v2879_v3 = vrot.slane %v2872_v32, 2  ;;  %v2893_v17 = vmul.f32 %v2890_v28, %v5622_v15  ;;  %s6089_s1 = sld [smem:[#allocation7 + $0x17]] }
 0x289   : > { %v2878_v26 = vsel %vm653_vm1, %v2876_v25, %v2877_v33  ;;  %v2898_v31 = vrot.slane %v2892_v18, 2  ;;  %v2912_v40 = vmul.f32 %v2911_v55, %v5544_v23  ;;  %v1967_v39 = vadd.f32 %v5738_v1, %v1892_v0 }
 0x28a   : > { %2748 = vrot.lane.b32.xlu1 %v2745_v43, %s6557_s11  ;;  %2818 = vrot.lane.b32.xlu0 %v2815_v42, %s3997_s6  ;;  %s5847_s11 = sld [smem:[#allocation7 + $0x2f]]  ;;  %v2891_v43 = vmul.f32 %v2890_v28, %v5544_v23  ;;  %v5868_v42 = vstv %s5813_s0  ;;  %v2859_v11 = vsel %vm653_vm1, %v2856_v2, %v2858_v49  ;;  %s6778_s0 = smov 126   ;;  %v2964_v53 = vstv %s5828_s13 }
 0x28b   : > { %v2978_v38 = vstv %s5833_s14  ;;  %v5893_v28 = vadd.f32 %v5765_v10, %v1893_v61  ;;  %v2021_v2 = vmul.f32 %v2020_v16, %v5153_v45  ;;  %v2992_v48 = vstv %s5840_s30  ;;  %s6180_s13 = sld [smem:[#allocation7 + $0xc]] }
 0x28c   : > { %v5822_v34 = vpop.permute.xlu1 %2059  ;;  %v5824_v9 = vpop.permute.xlu0 %2071  ;;  %v2897_v54 = vrot.slane %v2891_v43, 2  ;;  %v2880_v1 = vsel %vm653_vm1, %v2877_v33, %v2879_v3  ;;  %v2900_v8 = vrot.slane %v2893_v17, 2  ;;  %v2918_v49 = vrot.slane %v2912_v40, 2  ;;  %s6186_s14 = sld [smem:[#allocation7 + $0x35]] }
 0x28d   : > { %v2914_v43 = vmul.f32 %v2911_v55, %v5622_v15  ;;  %v5911_v25 = vstv %s5860_s26  ;;  %v5914_v33 = vstv %s5870_s7  ;;  %v2006_v0 = vmax.f32 %v5893_v28, 0.0  ;;  %s6190_s30 = sld [smem:[#allocation7 + $0x27]] }
 0x28e   : > { %2820 = vrot.lane.b32.xlu1 %v2817_v41, %s3997_s6  ;;  %2839 = vrot.lane.b32.xlu0 %v2836_v24, %s3997_s6  ;;  %v2913_v41 = vmul.f32 %v2911_v55, %v5561_v52  ;;  %v2004_v24 = vmax.f32 %v1966_v59, 0.0  ;;  %v2023_v61 = vadd.f32 %v2021_v2, %v2011_v56  ;;  %v5924_v59 = vstv %s5876_s2  ;;  %s6106_s2 = sld [smem:[#allocation7 + $0x32]] }
 0x28f   : > { %v2022_v55 = vmul.f32 %v2020_v16, %v5188_v37  ;;  %v2124_v51 = vmul.f32 %v5791_v60, %v5188_v37  ;;  %v2125_v17 = vmul.f32 %v5791_v60, %v5284_v62  ;;  %v2141_v40 = vmul.f32 %v5818_v5, %v5188_v37  ;;  %s6212_s26 = sld [smem:[#allocation7 + $0x42]] }
 0x290   : > { %v5849_v12 = vpop.permute.xlu1 %2073  ;;  %v5851_v14 = vpop.permute.xlu0 %2085  ;;  %v3006_v30 = vstv %s5847_s11  ;;  %v2919_v32 = vrot.slane %v2913_v41, 2  ;;  %v5918_v18 = vsel %vm5133_vm6, %v2004_v24, 0.0  ;;  %v2921_v41 = vrot.slane %v2914_v43, 2  ;;  %s6117_s11 = sld [smem:[#allocation7 + $0x9]] }
 0x291   : > { %v2028_v24 = vmul.f32 %v2026_v57, %v5188_v37  ;;  %v2123_v2 = vmul.f32 %v5791_v60, %v5153_v45  ;;  %v2033_v19 = vmul.f32 %v2032_v7, %v5153_v45  ;;  %v2158_v60 = vmul.f32 %v5838_v27, %v5188_v37  ;;  %s3709_s7 = sld [smem:[#allocation7 + $0x2a]] }
 0x292   : > { %2841 = vrot.lane.b32.xlu1 %v2838_v46, %s3997_s6  ;;  %2860 = vrot.lane.b32.xlu0 %v2857_v21, %s3997_s6  ;;  %v2899_v46 = vsel %vm653_vm1, %v2897_v54, %v2898_v31  ;;  %v2005_v21 = vmax.f32 %v1967_v39, 0.0  ;;  %v2920_v16 = vsel %vm653_vm1, %v2918_v49, %v2919_v32  ;;  %v2132_v49 = vrot.slane %v2125_v17, 1 }
 0x293   : > { %v2164_v10 = vrot.slane %v2158_v60, 1 }
 0x294   : > { %v5878_v13 = vpop.permute.xlu1 %2087  ;;  %v5880_v20 = vpop.permute.xlu0 %2099  ;;  %v5946_v39 = vsel %vm5162_vm7, %v2005_v21, 0.0 }
 0x296   : > { %2862 = vrot.lane.b32.xlu1 %v2859_v11, %s3997_s6  ;;  %2881 = vrot.lane.b32.xlu0 %v2878_v26, %s6778_s0  ;;  %v2027_v11 = vmul.f32 %v2026_v57, %v5153_v45  ;;  %v2901_v26 = vsel %vm653_vm1, %v2898_v31, %v2900_v8  ;;  %v2142_v31 = vmul.f32 %v5818_v5, %v5284_v62 }
 0x297   : > { %v2140_v57 = vmul.f32 %v5818_v5, %v5153_v45  ;;  %v2024_v8 = vadd.f32 %v2022_v55, %v2011_v56  ;;  %v2922_v5 = vsel %vm653_vm1, %v2919_v32, %v2921_v41  ;;  %v2157_v56 = vmul.f32 %v5838_v27, %v5153_v45 }
 0x298   : > { %v5899_v35 = vpop.permute.xlu1 %2101  ;;  %v5901_v6 = vpop.permute.xlu0 %2113  ;;  %v2030_v55 = vadd.f32 %v2028_v24, %v2014_v4  ;;  %v2149_v17 = vrot.slane %v2142_v31, 1  ;;  %v2952_v31 = vmul.f32 %v2950_v50, %v5946_v39 }
 0x299   : > { %v2146_v41 = vrot.slane %v2140_v57, 1  ;;  %v2966_v57 = vmul.f32 %v2964_v53, %v5946_v39 }
 0x29a   : > { %2883 = vrot.lane.b32.xlu1 %v2880_v1, %s6778_s0  ;;  %2902 = vrot.lane.b32.xlu0 %v2899_v46, %s6778_s0  ;;  %v2034_v1 = vmul.f32 %v2032_v7, %v5188_v37  ;;  %v2130_v46 = vrot.slane %v2124_v51, 1  ;;  %v2029_v7 = vadd.f32 %v2027_v11, %v2014_v4  ;;  %v2129_v51 = vrot.slane %v2123_v2, 1 }
 0x29b   : > { %v2159_v11 = vmul.f32 %v5838_v27, %v5284_v62  ;;  %v2965_v27 = vmul.f32 %v2964_v53, %v5918_v18 }
 0x29c   : > { %v5932_v3 = vpop.permute.xlu1 %2115  ;;  %v5936_v54 = vpop.permute.xlu0 %2185  ;;  %v2036_v32 = vadd.f32 %v2034_v1, %v2017_v29  ;;  %v2131_v4 = vsel %vm445_vm0, %v2129_v51, %v2130_v46  ;;  %v2133_v24 = vsel %vm445_vm0, %v2130_v46, %v2132_v49  ;;  %v2163_v1 = vrot.slane %v2157_v56, 1 }
 0x29d   : > { %v2979_v46 = vmul.f32 %v2978_v38, %v5918_v18  ;;  %v2994_v51 = vmul.f32 %v2992_v48, %v5946_v39 }
 0x29e   : > { %2904 = vrot.lane.b32.xlu1 %v2901_v26, %s6778_s0  ;;  %2923 = vrot.lane.b32.xlu0 %v2920_v16, %s6778_s0  ;;  %v2951_v26 = vmul.f32 %v2950_v50, %v5918_v18  ;;  %v2147_v16 = vrot.slane %v2141_v40, 1  ;;  %v2035_v40 = vadd.f32 %v2033_v19, %v2017_v29  ;;  %v2049_v29 = vadd.f32 %v5767_v36, %v2023_v61 }
 0x29f   : > { %v2166_v50 = vrot.slane %v2159_v11, 1  ;;  %v2980_v36 = vmul.f32 %v2978_v38, %v5946_v39  ;;  %v2165_v53 = vsel %vm445_vm0, %v2163_v1, %v2164_v10  ;;  %v2300_v38 = vmul.f32 %v5843_v47, %v5153_v45 }
 0x2a0   : > { %v5969_v43 = vpop.permute.xlu1 %2187  ;;  %v5971_v21 = vpop.permute.xlu0 %2206  ;;  %v2148_v19 = vsel %vm445_vm0, %v2146_v41, %v2147_v16  ;;  %v2150_v60 = vsel %vm445_vm0, %v2147_v16, %v2149_v17  ;;  %v2077_v61 = vadd.f32 %v5824_v9, %v2035_v40  ;;  %v2091_v49 = vadd.f32 %v5851_v14, %v2049_v29 }
 0x2a1   : > { %v2993_v16 = vmul.f32 %v2992_v48, %v5918_v18  ;;  %v3007_v17 = vmul.f32 %v3006_v30, %v5918_v18  ;;  %v2301_v9 = vmul.f32 %v5843_v47, %v5188_v37  ;;  %v2050_v14 = vadd.f32 %v5795_v58, %v2024_v8 }
 0x2a2   : > { %2925 = vrot.lane.b32.xlu1 %v2922_v5, %s6778_s0  ;;  %2955 = vrot.lane.b32.xlu0 %v2951_v26, %s3997_s6  ;;  %v2063_v11 = vadd.f32 %v5797_v44, %v2029_v7  ;;  %v2119_v40 = vadd.f32 %v5901_v6, %v2077_v61  ;;  %v3008_v41 = vmul.f32 %v3006_v30, %v5946_v39  ;;  %v6041_v48 = vsel %vm5267_vm10, %v2006_v0, 0.0 }
 0x2a3   : > { %v6779_v58 = vstv %s5856_s16  ;;  %v2302_v6 = vmul.f32 %v5843_v47, %v5284_v62  ;;  %v2078_v30 = vadd.f32 %v5849_v12, %v2036_v32  ;;  %v2092_v28 = vadd.f32 %v5878_v13, %v2050_v14  ;;  %s6195_s16 = sld [smem:[#allocation7 + $0x50]] }
 0x2a4   : > { %v5993_v2 = vpop.permute.xlu1 %2208  ;;  %v2228_v26 = vpop.permute.xlu0 %2227  ;;  %v3021_v44 = vmul.f32 %v6779_v58, %v5918_v18  ;;  %v2105_v22 = vadd.f32 %v5880_v20, %v2063_v11  ;;  %v2136_v0 = vadd.f32 %v2131_v4, %v2091_v49  ;;  %v2317_v29 = vmul.f32 %v5865_v63, %v5153_v45 }
 0x2a5   : > { %v6059_v1 = vmul.f32 %v5865_v63, %v5188_v37  ;;  %v2120_v47 = vadd.f32 %v5932_v3, %v2078_v30  ;;  %v2170_v13 = vadd.f32 %v2165_v53, %v2119_v40  ;;  %v2306_v20 = vrot.slane %v2300_v38, 2 }
 0x2a6   : > { %2957 = vrot.lane.b32.xlu1 %v2952_v31, %s3997_s6  ;;  %2969 = vrot.lane.b32.xlu0 %v2965_v27, %s3997_s6  ;;  %v2167_v31 = vsel %vm445_vm0, %v2164_v10, %v2166_v50  ;;  %v2064_v10 = vadd.f32 %v5822_v34, %v2030_v55  ;;  %v2307_v27 = vrot.slane %v2301_v9, 2  ;;  %v2191_v12 = vadd.f32 %v5936_v54, %v2136_v0 }
 0x2a7   : > { %v2309_v34 = vrot.slane %v2302_v6, 2  ;;  %v6780_v55 = vmov %v6779_v58  ;;  %v2137_v50 = vadd.f32 %v2133_v24, %v2092_v28  ;;  %v2233_v3 = vadd.f32 %v2228_v26, %v2170_v13 }
 0x2a8   : > { %v2230_v5 = vpop.permute.xlu1 %2229  ;;  %v2249_v56 = vpop.permute.xlu0 %2248  ;;  %v2106_v32 = vadd.f32 %v5899_v35, %v2064_v10  ;;  %v3022_v4 = vmul.f32 %v6780_v55, %v5946_v39  ;;  %v2308_v53 = vsel %vm653_vm1, %v2306_v20, %v2307_v27  ;;  %v2324_v35 = vrot.slane %v6059_v1, 2 }
 0x2a9   : > { %v2254_v61 = vadd.f32 %v2249_v56, %v2191_v12  ;;  %v2192_v38 = vadd.f32 %v5969_v43, %v2137_v50  ;;  %v2323_v9 = vrot.slane %v2317_v29, 2  ;;  %v2334_v14 = vmul.f32 %v5868_v42, %v5153_v45 }
 0x2aa   : > { %2971 = vrot.lane.b32.xlu1 %v2966_v57, %s3997_s6  ;;  %2983 = vrot.lane.b32.xlu0 %v2979_v46, %s3997_s6  ;;  %v3086_v57 = vmul.f32 %v5911_v25, %v5918_v18  ;;  %v2153_v46 = vadd.f32 %v2148_v19, %v2105_v22  ;;  %v2171_v19 = vadd.f32 %v2167_v31, %v2120_v47 }
 0x2ab   : > { %v2154_v56 = vadd.f32 %v2150_v60, %v2106_v32  ;;  %v6087_v11 = vmul.f32 %v5868_v42, %v5188_v37  ;;  %v2313_v58 = vadd.f32 %v2308_v53, %v2254_v61  ;;  %v3088_v31 = vmul.f32 %v5911_v25, %v6041_v48 }
 0x2ac   : > { %v2251_v8 = vpop.permute.xlu1 %2250  ;;  %v2270_v7 = vpop.permute.xlu0 %2269  ;;  %v2212_v24 = vadd.f32 %v5971_v21, %v2153_v46  ;;  %v3108_v45 = vmul.f32 %v5914_v33, %v5946_v39  ;;  %v3107_v0 = vmul.f32 %v5914_v33, %v5918_v18  ;;  %v3109_v47 = vmul.f32 %v5914_v33, %v6041_v48 }
 0x2ad   : > { %v2255_v40 = vadd.f32 %v2251_v8, %v2192_v38  ;;  %v2213_v37 = vadd.f32 %v5993_v2, %v2154_v56  ;;  %v2341_v22 = vrot.slane %v6087_v11, 2  ;;  %v3095_v1 = vrot.slane %v3088_v31, 1 }
 0x2ae   : > { %2985 = vrot.lane.b32.xlu1 %v2980_v36, %s3997_s6  ;;  %2997 = vrot.lane.b32.xlu0 %v2993_v16, %s6778_s0  ;;  %v6075_v36 = vmul.f32 %v5911_v25, %v5946_v39  ;;  %v2319_v16 = vmul.f32 %v5865_v63, %v5284_v62  ;;  %v2234_v63 = vadd.f32 %v2230_v5, %v2171_v19  ;;  %v3148_v46 = vstv %s6089_s1  ;;  %s3710_s1 = sld [smem:[#allocation7 + $0x45]] }
 0x2af   : > { %v2275_v43 = vadd.f32 %v2270_v7, %v2212_v24  ;;  %v2336_v25 = vmul.f32 %v5868_v42, %v5284_v62  ;;  %v3092_v7 = vrot.slane %v3086_v57, 1  ;;  %v3129_v62 = vmul.f32 %v5924_v59, %v5946_v39 }
 0x2b0   : > { %v2272_v54 = vpop.permute.xlu1 %2271  ;;  %v2291_v49 = vpop.permute.xlu0 %2290  ;;  %v3093_v30 = vrot.slane %v6075_v36, 1  ;;  %v2326_v28 = vrot.slane %v2319_v16, 2  ;;  %v3128_v50 = vmul.f32 %v5924_v59, %v5918_v18  ;;  %v3130_v53 = vmul.f32 %v5924_v59, %v6041_v48 }
 0x2b1   : > { %v2296_v26 = vadd.f32 %v2291_v49, %v2233_v3  ;;  %v2276_v10 = vadd.f32 %v2272_v54, %v2213_v37  ;;  %v2343_v55 = vrot.slane %v2336_v25, 2  ;;  %v3116_v49 = vrot.slane %v3109_v47, 1 }
 0x2b2   : > { %2999 = vrot.lane.b32.xlu1 %v2994_v51, %s6778_s0  ;;  %3011 = vrot.lane.b32.xlu0 %v3007_v17, %s6778_s0  ;;  %v2310_v51 = vsel %vm653_vm1, %v2307_v27, %v2309_v34  ;;  %v2325_v17 = vsel %vm653_vm1, %v2323_v9, %v2324_v35  ;;  %v3094_v20 = vsel %vm445_vm0, %v3092_v7, %v3093_v30  ;;  %v3113_v34 = vrot.slane %v3107_v0, 1 }
 0x2b3   : > { %v2314_v8 = vadd.f32 %v2310_v51, %v2255_v40  ;;  %v2330_v2 = vadd.f32 %v2325_v17, %v2275_v43  ;;  %v2327_v42 = vsel %vm653_vm1, %v2324_v35, %v2326_v28  ;;  %v3096_v61 = vsel %vm445_vm0, %v3093_v30, %v3095_v1 }
 0x2b4   : > { %v2293_v21 = vpop.permute.xlu1 %2292  ;;  %v2363_v60 = vpop.permute.xlu0 %2362  ;;  %v2331_v33 = vadd.f32 %v2327_v42, %v2276_v10  ;;  %v3135_v16 = vrot.slane %v3129_v62, 1  ;;  %v3150_v38 = vmul.f32 %v3148_v46, %v5946_v39  ;;  %v2344_v24 = vsel %vm653_vm1, %v2341_v22, %v2343_v55 }
 0x2b5   : > { %v2297_v5 = vadd.f32 %v2293_v21, %v2234_v63  ;;  %v2368_v6 = vadd.f32 %v2363_v60, %v2313_v58  ;;  %v3149_v56 = vmul.f32 %v3148_v46, %v5918_v18  ;;  %v3169_v9 = vstv %s6106_s2  ;;  %s3727_s2 = sld [smem:[#allocation7 + $0x30]] }
 0x2b6   : > { %3013 = vrot.lane.b32.xlu1 %v3008_v41, %s6778_s0  ;;  %3025 = vrot.lane.b32.xlu0 %v3021_v44, %s6778_s0  ;;  %v2340_v41 = vrot.slane %v2334_v14, 2  ;;  %v3114_v44 = vrot.slane %v3108_v45, 1  ;;  %v3137_v63 = vrot.slane %v3130_v53, 1  ;;  %v3151_v40 = vmul.f32 %v3148_v46, %v6041_v48 }
 0x2b7   : > { %v2348_v19 = vadd.f32 %v2344_v24, %v2297_v5  ;;  %v3171_v43 = vmul.f32 %v3169_v9, %v5946_v39  ;;  %v3156_v51 = vrot.slane %v3150_v38, 1  ;;  %v3155_v17 = vrot.slane %v3149_v56, 1 }
 0x2b8   : > { %v2365_v27 = vpop.permute.xlu1 %2364  ;;  %v2384_v29 = vpop.permute.xlu0 %2383  ;;  %v2342_v32 = vsel %vm653_vm1, %v2340_v41, %v2341_v22  ;;  %v3115_v54 = vsel %vm445_vm0, %v3113_v34, %v3114_v44  ;;  %v3117_v11 = vsel %vm445_vm0, %v3114_v44, %v3116_v49  ;;  %v3170_v31 = vmul.f32 %v3169_v9, %v5918_v18 }
 0x2b9   : > { %v2369_v12 = vadd.f32 %v2365_v27, %v2314_v8  ;;  %v2389_v13 = vadd.f32 %v2384_v29, %v2330_v2  ;;  %v2347_v57 = vadd.f32 %v2342_v32, %v2296_v26  ;;  %v3134_v26 = vrot.slane %v3128_v50, 1 }
 0x2ba   : > { %3027 = vrot.lane.b32.xlu1 %v3022_v4, %s6778_s0  ;;  %3097 = vrot.lane.b32.xlu0 %v3094_v20, %s3997_s6  ;;  %v2476_v45 = vstv %s6117_s11  ;;  %v3190_v37 = vstv %s6122_s12  ;;  %v3158_v28 = vrot.slane %v3151_v40, 1  ;;  %v3177_v22 = vrot.slane %v3171_v43, 1  ;;  %s6320_s11 = sld [smem:[#allocation7 + $0x2d]] }
 0x2bb   : > { %v3136_v60 = vsel %vm445_vm0, %v3134_v26, %v3135_v16  ;;  %v3172_v0 = vmul.f32 %v3169_v9, %v6041_v48  ;;  %v3157_v8 = vsel %vm445_vm0, %v3155_v17, %v3156_v51  ;;  %v3192_v2 = vmul.f32 %v3190_v37, %v5946_v39  ;;  %s6322_s12 = sld [smem:[#allocation7 + $0x48]] }
 0x2bc   : > { %v2386_v3 = vpop.permute.xlu1 %2385  ;;  %v2405_v4 = vpop.permute.xlu0 %2404  ;;  %v2482_v7 = vstv %s6132_s15  ;;  %v3176_v27 = vrot.slane %v3170_v31, 1  ;;  %v2477_v29 = vmul.f32 %v2476_v45, %v5544_v23  ;;  %v3191_v41 = vmul.f32 %v3190_v37, %v5918_v18  ;;  %s3728_s15 = sld [smem:[#allocation7 + $0x4b]] }
 0x2bd   : > { %v2390_v35 = vadd.f32 %v2386_v3, %v2331_v33  ;;  %v2410_v36 = vadd.f32 %v2405_v4, %v2347_v57  ;;  %v3262_v1 = vstv %s6136_s17  ;;  %v3193_v20 = vmul.f32 %v3190_v37, %v6041_v48  ;;  %s3735_s17 = sld [smem:[#allocation7 + $0x18]] }
 0x2be   : > { %3099 = vrot.lane.b32.xlu1 %v3096_v61, %s3997_s6  ;;  %3118 = vrot.lane.b32.xlu0 %v3115_v54, %s3997_s6  ;;  %v3264_v62 = vmul.f32 %v3262_v1, %v5946_v39  ;;  %v3178_v34 = vsel %vm445_vm0, %v3176_v27, %v3177_v22  ;;  %v3198_v55 = vrot.slane %v3192_v2, 1  ;;  %v3263_v33 = vmul.f32 %v3262_v1, %v5918_v18 }
 0x2bf   : > { %v2488_v57 = vstv %s6142_s23  ;;  %v3283_v50 = vstv %s6146_s8  ;;  %v3197_v3 = vrot.slane %v3191_v41, 1  ;;  %v2478_v4 = vmul.f32 %v2476_v45, %v5561_v52  ;;  %s3736_s23 = sld [smem:[#allocation7 + $0x33]] }
 0x2c0   : > { %v2407_v59 = vpop.permute.xlu1 %2406  ;;  %v2426_v14 = vpop.permute.xlu0 %2425  ;;  %v2483_v61 = vmul.f32 %v2482_v7, %v5544_v23  ;;  %v3285_v26 = vmul.f32 %v3283_v50, %v5946_v39  ;;  %v3269_v56 = vrot.slane %v3263_v33, 2  ;;  %v2484_v9 = vmul.f32 %v2482_v7, %v5561_v52  ;;  %s3737_s8 = sld [smem:[#allocation7 + $0x4e]] }
 0x2c1   : > { %v2411_v58 = vadd.f32 %v2407_v59, %v2348_v19  ;;  %v2431_v21 = vadd.f32 %v2426_v14, %v2368_v6  ;;  %v3138_v6 = vsel %vm445_vm0, %v3135_v16, %v3137_v63  ;;  %v3265_v16 = vmul.f32 %v3262_v1, %v6041_v48 }
 0x2c2   : > { %3120 = vrot.lane.b32.xlu1 %v3117_v11, %s3997_s6  ;;  %3139 = vrot.lane.b32.xlu0 %v3136_v60, %s3997_s6  ;;  %v3199_v19 = vsel %vm445_vm0, %v3197_v3, %v3198_v55  ;;  %v3304_v59 = vstv %s6158_s9  ;;  %v2489_v63 = vmul.f32 %v2488_v57, %v5544_v23  ;;  %v3284_v40 = vmul.f32 %v3283_v50, %v5918_v18  ;;  %s267_s9 = sand.u32 1, %s3983_s19  }
 0x2c3   : > { %v2479_v46 = vadd.f32 %v2477_v29, %v2431_v21  ;;  %v3286_v17 = vmul.f32 %v3283_v50, %v6041_v48  ;;  %v3291_v37 = vrot.slane %v3285_v26, 2  ;;  %v2490_v7 = vmul.f32 %v2488_v57, %v5561_v52 }
 0x2c4   : > { %v2428_v5 = vpop.permute.xlu1 %2427  ;;  %v2447_v30 = vpop.permute.xlu0 %2446  ;;  %v3367_v3 = vstv %s6195_s16 }
 0x2c5   : > { %v2432_v25 = vadd.f32 %v2428_v5, %v2369_v12  ;;  %v2452_v10 = vadd.f32 %v2447_v30, %v2389_v13  ;;  %v3159_v12 = vsel %vm445_vm0, %v3156_v51, %v3158_v28  ;;  %v3179_v13 = vrot.slane %v3172_v0, 1 }
 0x2c6   : > { %3141 = vrot.lane.b32.xlu1 %v3138_v6, %s3997_s6  ;;  %3160 = vrot.lane.b32.xlu0 %v3157_v8, %s6778_s0  ;;  %v3272_v51 = vrot.slane %v3265_v16, 2  ;;  %v3306_v5 = vmul.f32 %v3304_v59, %v5946_v39  ;;  %v3307_v30 = vmul.f32 %v3304_v59, %v6041_v48  ;;  %v3325_v6 = vstv %s6172_s10  ;;  %s3751_s10 = smul.u32 48, %s267_s9 }
 0x2c7   : > { %v3180_v53 = vsel %vm445_vm0, %v3177_v22, %v3179_v13  ;;  %v2480_v14 = vadd.f32 %v2478_v4, %v2432_v25  ;;  %v2485_v11 = vadd.f32 %v2483_v61, %v2452_v10  ;;  %v3290_v0 = vrot.slane %v3284_v40, 2 }
 0x2c8   : > { %v2449_v44 = vpop.permute.xlu1 %2448  ;;  %v2468_v47 = vpop.permute.xlu0 %2467  ;;  %v3305_v25 = vmul.f32 %v3304_v59, %v5918_v18  ;;  %v3293_v27 = vrot.slane %v3286_v17, 2  ;;  %v3327_v29 = vmul.f32 %v3325_v6, %v5946_v39  ;;  %v3326_v13 = vmul.f32 %v3325_v6, %v5918_v18 }
 0x2c9   : > { %v2453_v42 = vadd.f32 %v2449_v44, %v2390_v35  ;;  %v2473_v32 = vadd.f32 %v2468_v47, %v2410_v36  ;;  %v3200_v35 = vrot.slane %v3193_v20, 1  ;;  %v3270_v36 = vrot.slane %v3264_v62, 2 }
 0x2ca   : > { %3162 = vrot.lane.b32.xlu1 %v3159_v12, %s6778_s0  ;;  %3181 = vrot.lane.b32.xlu0 %v3178_v34, %s6778_s0  ;;  %v3292_v44 = vsel %vm653_vm1, %v3290_v0, %v3291_v37  ;;  %v3312_v47 = vrot.slane %v3306_v5, 2  ;;  %v3314_v12 = vrot.slane %v3307_v30, 2  ;;  %v3346_v20 = vstv %s6186_s14 }
 0x2cb   : > { %v3201_v21 = vsel %vm445_vm0, %v3198_v55, %v3200_v35  ;;  %v3271_v60 = vsel %vm653_vm1, %v3269_v56, %v3270_v36  ;;  %v2486_v28 = vadd.f32 %v2484_v9, %v2453_v42  ;;  %v2491_v22 = vadd.f32 %v2489_v63, %v2473_v32 }
 0x2cc   : > { %v2470_v54 = vpop.permute.xlu1 %2469  ;;  %v2500_v49 = vpop.permute.xlu0 %2499  ;;  %v3273_v2 = vsel %vm653_vm1, %v3270_v36, %v3272_v51  ;;  %v2578_v62 = vstv %s6180_s13  ;;  %v3311_v32 = vrot.slane %v3305_v25, 2  ;;  %v3328_v34 = vmul.f32 %v3325_v6, %v6041_v48  ;;  %s269_s13 = scalar_lea.vmem [#allocation10], %s3751_s10 }
 0x2cd   : > { %v2474_v38 = vadd.f32 %v2470_v54, %v2411_v58  ;;  %v2505_v24 = vadd.f32 %v2500_v49, %v2479_v46  ;;  %v3348_v55 = vmul.f32 %v3346_v20, %v5946_v39  ;;  %v3294_v50 = vsel %vm653_vm1, %v3291_v37, %v3293_v27  ;;  %v3850_v37 = vld [vmem:[%s4157_s25] sm:$0xff]  ;;  %s3464_s14 = sshll.u32 %s269_s13, 4  ;;  %s6492_s14 = int_to_ptr.vmem [resolvable:$true] %s3464_s14 }
 0x2ce   : > { %3183 = vrot.lane.b32.xlu1 %v3180_v53, %s6778_s0  ;;  %3202 = vrot.lane.b32.xlu0 %v3199_v19, %s6778_s0  ;;  %v3333_v46 = vrot.slane %v3327_v29, 2  ;;  %v2595_v4 = vstv %s6190_s30  ;;  %v3313_v49 = vsel %vm653_vm1, %v3311_v32, %v3312_v47  ;;  %v3347_v53 = vmul.f32 %v3346_v20, %v5918_v18  ;;  %s3753_s30 = smul.u32 768, %s4053_s22  ;;  %s6502_s22 = scalar_lea.sflag [#allocation3], %s267_s9 }
 0x2cf   : > { %v2492_v42 = vadd.f32 %v2490_v7, %v2474_v38  ;;  %v3315_v35 = vsel %vm653_vm1, %v3312_v47, %v3314_v12  ;;  %v3332_v36 = vrot.slane %v3326_v13, 2  ;;  %v2579_v16 = vmul.f32 %v2578_v62, %v5544_v23  ;;  %v3851_v12 = vld [vmem:[%s4157_s25 + $0x8] sm:$0xff] }
 0x2d0   : > { %v2502_v43 = vpop.permute.xlu1 %2501  ;;  %v2514_v58 = vpop.permute.xlu0 %2513  ;;  %v2580_v38 = vmul.f32 %v2578_v62, %v5561_v52  ;;  %v3335_v19 = vrot.slane %v3328_v34, 2  ;;  %v3354_v26 = vrot.slane %v3348_v55, 2  ;;  %v3349_v56 = vmul.f32 %v3346_v20, %v6041_v48 }
 0x2d1   : > { %v2506_v31 = vadd.f32 %v2502_v43, %v2480_v14  ;;  %v2519_v45 = vadd.f32 %v2514_v58, %v2485_v11  ;;  %v3334_v14 = vsel %vm653_vm1, %v3332_v36, %v3333_v46  ;;  %v2581_v11 = vmul.f32 %v2578_v62, %v5622_v15 }
 0x2d2   : > { %3204 = vrot.lane.b32.xlu1 %v3201_v21, %s6778_s0  ;;  %3274 = vrot.lane.b32.xlu0 %v3271_v60, %s3997_s6  ;;  %v2596_v63 = vmul.f32 %v2595_v4, %v5544_v23  ;;  %v6234_v40 = vmul.f32 %v2595_v4, %v5561_v52  ;;  %v3353_v21 = vrot.slane %v3347_v53, 2  ;;  %v3368_v60 = vmul.f32 %v3367_v3, %v5918_v18 }
 0x2d3   : > { %v2585_v51 = vrot.slane %v2579_v16, 1  ;;  %v2586_v17 = vrot.slane %v2580_v38, 1  ;;  %v3392_v5 = vrot.slane %v3850_v37, 2  ;;  %v2612_v30 = vstv %s6212_s26 }
 0x2d4   : > { %v2516_v10 = vpop.permute.xlu1 %2515  ;;  %v2528_v8 = vpop.permute.xlu0 %2527  ;;  %v3336_v6 = vsel %vm653_vm1, %v3333_v46, %v3335_v19  ;;  %v2588_v25 = vrot.slane %v2581_v11, 1  ;;  %v3374_v29 = vrot.slane %v3368_v60, 2  ;;  %v3393_v13 = vrot.slane %v3851_v12, 2 }
 0x2d5   : > { %v2520_v41 = vadd.f32 %v2516_v10, %v2486_v28  ;;  %v2533_v1 = vadd.f32 %v2528_v8, %v2491_v22  ;;  %v3355_v28 = vsel %vm653_vm1, %v3353_v21, %v3354_v26  ;;  %v3356_v22 = vrot.slane %v3349_v56, 2  ;;  %v3855_v21 = vld [vmem:[%s4157_s25 + $0x28] sm:$0xf] }
 0x2d6   : > { %3276 = vrot.lane.b32.xlu1 %v3273_v2, %s3997_s6  ;;  %3295 = vrot.lane.b32.xlu0 %v3292_v44, %s3997_s6  ;;  %v2602_v10 = vrot.slane %v2596_v63, 1  ;;  %v2603_v8 = vrot.slane %v6234_v40, 1  ;;  %v3370_v2 = vmul.f32 %v3367_v3, %v6041_v48  ;;  %v2598_v44 = vmul.f32 %v2595_v4, %v5622_v15  ;;  %v3852_v4 = vld [vmem:[%s4157_s25 + $0x10] sm:$0xf] }
 0x2d7   : > { %v2587_v47 = vsel %vm445_vm0, %v2585_v51, %v2586_v17  ;;  %v2613_v20 = vmul.f32 %v2612_v30, %v5544_v23  ;;  %v2614_v62 = vmul.f32 %v2612_v30, %v5561_v52  ;;  %v2589_v55 = vsel %vm445_vm0, %v2586_v17, %v2588_v25  ;;  %v3856_v51 = vld [vmem:[%s4157_s25 + $0x30] sm:$0xff] }
 0x2d8   : > { %v2530_v33 = vpop.permute.xlu1 %2529  ;;  %v2542_v57 = vpop.permute.xlu0 %2541  ;;  %v2615_v36 = vmul.f32 %v2612_v30, %v5622_v15  ;;  %v3416_v60 = vrot.slane %v3855_v21, 2  ;;  %v3434_v17 = vrot.slane %v3856_v51, 2 }
 0x2d9   : > { %v2534_v61 = vadd.f32 %v2530_v33, %v2492_v42  ;;  %v2547_v54 = vadd.f32 %v2542_v57, %v2505_v24  ;;  %v6228_v24 = vmul.f32 %v3367_v3, %v5946_v39  ;;  %v2604_v33 = vsel %vm445_vm0, %v2602_v10, %v2603_v8 }
 0x2da   : > { %3297 = vrot.lane.b32.xlu1 %v3294_v50, %s3997_s6  ;;  %3316 = vrot.lane.b32.xlu0 %v3313_v49, %s3997_s6  ;;  %v3377_v57 = vrot.slane %v3370_v2, 2  ;;  %v2605_v3 = vrot.slane %v2598_v44, 1  ;;  %v3395_v49 = vrot.slane %v3852_v4, 2  ;;  %v2619_v53 = vrot.slane %v2613_v20, 1 }
 0x2db   : > { %v2592_v42 = vadd.f32 %v2587_v47, %v2547_v54  ;;  %v3394_v54 = vsel %vm653_vm1, %v3392_v5, %v3393_v13  ;;  %v2789_v4 = vstv %s3710_s1  ;;  %s3999_s1 = smov [#allocation10]  }
 0x2dc   : > { %v2544_v9 = vpop.permute.xlu1 %2543  ;;  %v2556_v59 = vpop.permute.xlu0 %2555  ;;  %v2606_v63 = vsel %vm445_vm0, %v2603_v8, %v2605_v3  ;;  %v3396_v40 = vsel %vm653_vm1, %v3393_v13, %v3395_v49 }
 0x2dd   : > { %v2548_v43 = vadd.f32 %v2544_v9, %v2506_v31  ;;  %v2561_v58 = vadd.f32 %v2556_v59, %v2519_v45  ;;  %v3375_v31 = vrot.slane %v6228_v24, 2 }
 0x2de   : > { %3318 = vrot.lane.b32.xlu1 %v3315_v35, %s3997_s6  ;;  %3337 = vrot.lane.b32.xlu0 %v3334_v14, %s6778_s0  ;;  %v2620_v35 = vrot.slane %v2614_v62, 1  ;;  %s6262_s6 = sld [smem:[#allocation7 + $0xf]] }
 0x2df   : > { %v3376_v34 = vsel %vm653_vm1, %v3374_v29, %v3375_v31  ;;  %v2593_v16 = vadd.f32 %v2589_v55, %v2548_v43  ;;  %v2609_v38 = vadd.f32 %v2604_v33, %v2561_v58  ;;  %v3378_v59 = vsel %vm653_vm1, %v3375_v31, %v3377_v57 }
 0x2e0   : > { %v2558_v45 = vpop.permute.xlu1 %2557  ;;  %v2570_v0 = vpop.permute.xlu0 %2569  ;;  %v2621_v43 = vsel %vm445_vm0, %v2619_v53, %v2620_v35  ;;  %v2622_v58 = vrot.slane %v2615_v36, 1 }
 0x2e1   : > { %v2562_v7 = vadd.f32 %v2558_v45, %v2520_v41  ;;  %v2575_v27 = vadd.f32 %v2570_v0, %v2533_v1  ;;  %v3357_v41 = vsel %vm653_vm1, %v3354_v26, %v3356_v22  ;;  %v3854_v26 = vld [vmem:[%s4157_s25 + $0x20] sm:$0xff] }
 0x2e2   : > { %3339 = vrot.lane.b32.xlu1 %v3336_v6, %s6778_s0  ;;  %3358 = vrot.lane.b32.xlu0 %v3355_v28, %s6778_s0  ;;  %v3414_v56 = vrot.slane %v3854_v26, 2  ;;  %v3857_v6 = vld [vmem:[%s4157_s25 + $0x38] sm:$0xff]  ;;  %v2623_v25 = vsel %vm445_vm0, %v2620_v35, %v2622_v58  ;;  %v2790_v26 = vmul.f32 %v2789_v4, %v5544_v23 }
 0x2e3   : > { %v2610_v37 = vadd.f32 %v2606_v63, %v2562_v7  ;;  %v2626_v5 = vadd.f32 %v2621_v43, %v2575_v27  ;;  %v3435_v28 = vrot.slane %v3857_v6, 2  ;;  %v3858_v27 = vld [vmem:[%s4157_s25 + $0x40] sm:$0xf] }
 0x2e4   : > { %v2572_v1 = vpop.permute.xlu1 %2571  ;;  %v2642_v32 = vpop.permute.xlu0 %2641  ;;  %v2755_v10 = vstv %s6262_s6  ;;  %v3417_v2 = vsel %vm653_vm1, %v3414_v56, %v3416_v60  ;;  %v3437_v29 = vrot.slane %v3858_v27, 2  ;;  %v2796_v21 = vrot.slane %v2790_v26, 2  ;;  %s6497_s6 = scalar_lea.hbm %s6547_s5, %s3753_s30 }
 0x2e5   : > { %v2576_v50 = vadd.f32 %v2572_v1, %v2534_v61  ;;  %v2647_v46 = vadd.f32 %v2642_v32, %v2592_v42  ;;  %v3853_v61 = vld [vmem:[%s4157_s25 + $0x18] sm:$0xff]  ;;  %v3436_v7 = vsel %vm653_vm1, %v3434_v17, %v3435_v28  ;;  %v2756_v20 = vmul.f32 %v2755_v10, %v5544_v23  ;;  %s3726_s25 = sld [smem:[#allocation7 + $0x15]] }
 0x2e6   : > { %3360 = vrot.lane.b32.xlu1 %v3357_v41, %s6778_s0  ;;  %3379 = vrot.lane.b32.xlu0 %v3376_v34, %s6778_s0  ;;  %v3413_v19 = vrot.slane %v3853_v61, 2  ;;  %v2757_v62 = vmul.f32 %v2755_v10, %v5561_v52  ;;  %v2772_v42 = vstv %s3709_s7  ;;  %v3438_v41 = vsel %vm653_vm1, %v3435_v28, %v3437_v29  ;;  %s3919_s7 = scalar_lea.vmem %s6492_s14, 768 }
 0x2e7   : > { %v2627_v8 = vadd.f32 %v2623_v25, %v2576_v50  ;;  %v2758_v34 = vmul.f32 %v2755_v10, %v5622_v15  ;;  %v2773_v57 = vmul.f32 %v2772_v42, %v5544_v23  ;;  %v2762_v50 = vrot.slane %v2756_v20, 2  ;;  %p3920_p8 = scmp.ne.s32.totalorder %s6492_s14, %s3919_s7 }
 0x2e8   : > { %v2644_v24 = vpop.permute.xlu1 %2643  ;;  %v2663_v9 = vpop.permute.xlu0 %2662  ;;  %v3415_v30 = vsel %vm653_vm1, %v3413_v19, %v3414_v56  ;;  %v2774_v3 = vmul.f32 %v2772_v42, %v5561_v52  ;;  %v2791_v56 = vmul.f32 %v2789_v4, %v5561_v52  ;;  %v2944_v26 = vstv %s6322_s12 }
 0x2e9   : > { %v2648_v14 = vadd.f32 %v2644_v24, %v2593_v16  ;;  %v2668_v11 = vadd.f32 %v2663_v9, %v2609_v38  ;;  %v2765_v53 = vrot.slane %v2758_v34, 2  ;;  %v2779_v16 = vrot.slane %v2773_v57, 2  ;;  %p3921_p13 = pnand %p3920_p8, %p6781_p11 }
 0x2ea   : > { %3381 = vrot.lane.b32.xlu1 %v3378_v59, %s6778_s0  ;;  %3397 = vrot.lane.b32.xlu0 %v3394_v54, %s6778_s0  ;;  %v2775_v38 = vmul.f32 %v2772_v42, %v5622_v15  ;;  %v2780_v19 = vrot.slane %v2774_v3, 2  ;;  %v2797_v60 = vrot.slane %v2791_v56, 2 }
 0x2eb   : > { %v6326_v34 = vstv %s3726_s25  ;;  %p3922_p1 = pneg %p3921_p13  ;;  %s3923_s25 = sshll.u32 %s3999_s1, 4  ;;  %s3924_s25 = int_to_ptr.vmem [resolvable:$false] %s3923_s25 }
 0x2ec   : > { %v2665_v22 = vpop.permute.xlu1 %2664  ;;  %v2684_v31 = vpop.permute.xlu0 %2683  ;;  %v2781_v43 = vsel %vm653_vm1, %v2779_v16, %v2780_v19  ;;  %v2782_v58 = vrot.slane %v2775_v38, 2  ;;  %v2798_v6 = vsel %vm653_vm1, %v2796_v21, %v2797_v60  ;;  %v3037_v57 = vmul.f32 %v6326_v34, %v6041_v48  ;;  %p3926_p2 = scmp.lt.s32.totalorder %s6492_s14, %s3924_s25 }
 0x2ed   : > { %v2669_v45 = vadd.f32 %v2665_v22, %v2610_v37  ;;  %v2689_v0 = vadd.f32 %v2684_v31, %v2626_v5 }
 0x2ee   : > { %3399 = vrot.lane.b32.xlu1 %v3396_v40, %s6778_s0  ;;  %3418 = vrot.lane.b32.xlu0 %v3415_v30, %s6778_s0  ;;  %v2792_v40 = vmul.f32 %v2789_v4, %v5622_v15  ;;  %v2783_v30 = vsel %vm653_vm1, %v2780_v19, %v2782_v58  ;;  %v6340_v4 = vstv %s3727_s2  ;;  %v3044_v16 = vrot.slane %v3037_v57, 1 }
 0x2ef   : > { %v3054_v38 = vmul.f32 %v6340_v4, %v6041_v48 }
 0x2f0   : > { %v2686_v44 = vpop.permute.xlu1 %2685  ;;  %v2705_v47 = vpop.permute.xlu0 %2704  ;;  %v2799_v28 = vrot.slane %v2792_v40, 2 }
 0x2f1   : > { %v2690_v12 = vadd.f32 %v2686_v44, %v2627_v8  ;;  %v2710_v13 = vadd.f32 %v2705_v47, %v2647_v46  ;;  %v2763_v46 = vrot.slane %v2757_v62, 2  ;;  %v3061_v58 = vrot.slane %v3054_v38, 1 }
 0x2f2   : > { %3420 = vrot.lane.b32.xlu1 %v3417_v2, %s6778_s0  ;;  %3439 = vrot.lane.b32.xlu0 %v3436_v7, %s6778_s0  ;;  %v2800_v10 = vsel %vm653_vm1, %v2797_v60, %v2799_v28 }
 0x2f3   : > { %v2764_v61 = vsel %vm653_vm1, %v2762_v50, %v2763_v46  ;;  %v2766_v63 = vsel %vm653_vm1, %v2763_v46, %v2765_v53  ;;  %v6344_v53 = vmul.f32 %v6340_v4, %v5946_v39 }
 0x2f4   : > { %v2707_v1 = vpop.permute.xlu1 %2706  ;;  %v2726_v32 = vpop.permute.xlu0 %2725  ;;  %v2769_v24 = vadd.f32 %v2764_v61, %v2710_v13 }
 0x2f5   : > { %v2711_v55 = vadd.f32 %v2707_v1, %v2648_v14  ;;  %v2731_v33 = vadd.f32 %v2726_v32, %v2668_v11  ;;  %v3059_v40 = vrot.slane %v6344_v53, 1 }
 0x2f6   : > { %3441 = vrot.lane.b32.xlu1 %v3438_v41, %s6778_s0  ;;  %s6316_s0 = sld [smem:[#allocation7 + $0x12]] }
 0x2f7   : > { %v2770_v51 = vadd.f32 %v2766_v63, %v2711_v55  ;;  %v2786_v17 = vadd.f32 %v2781_v43, %v2731_v33  ;;  %v6331_v33 = vmul.f32 %v6326_v34, %v5946_v39  ;;  %v3062_v28 = vsel %vm445_vm0, %v3059_v40, %v3061_v58 }
 0x2f8   : > { %v2728_v49 = vpop.permute.xlu1 %2727  ;;  %v2747_v54 = vpop.permute.xlu0 %2746 }
 0x2f9   : > { %v2732_v35 = vadd.f32 %v2728_v49, %v2669_v45  ;;  %v2752_v36 = vadd.f32 %v2747_v54, %v2689_v0 }
 0x2fb   : > { %v2787_v22 = vadd.f32 %v2783_v30, %v2732_v35  ;;  %v2803_v31 = vadd.f32 %v2798_v6, %v2752_v36  ;;  %v2938_v35 = vstv %s6320_s11  ;;  %v3042_v36 = vrot.slane %v6331_v33, 1 }
 0x2fc   : > { %v2749_v9 = vpop.permute.xlu1 %2748  ;;  %v2819_v59 = vpop.permute.xlu0 %2818  ;;  %v2932_v55 = vstv %s6316_s0  ;;  %v2940_v19 = vmul.f32 %v2938_v35, %v5946_v39  ;;  %s3925_s0 = scalar_lea.vmem %s3924_s25, 1536 }
 0x2fd   : > { %v2753_v14 = vadd.f32 %v2749_v9, %v2690_v12  ;;  %v6296_v11 = vadd.f32 %v2819_v59, %v2769_v24  ;;  %v2934_v50 = vmul.f32 %v2932_v55, %v5946_v39  ;;  %v6356_v9 = vstv %s3728_s15  ;;  %p3927_p3 = scmp.lt.s32.totalorder %s3925_s0, %s3919_s7 }
 0x2fe   : > { %v3045_v43 = vsel %vm445_vm0, %v3042_v36, %v3044_v16  ;;  %v6364_v21 = vmul.f32 %v6356_v9, %v5946_v39  ;;  %v3071_v60 = vmul.f32 %v6356_v9, %v6041_v48 }
 0x2ff   : > { %v2804_v8 = vadd.f32 %v2800_v10, %v2753_v14  ;;  %p3928_p4 = por %p3927_p3, %p3926_p2 }
 0x300   : > { %v2821_v23 = vpop.permute.xlu1 %2820  ;;  %v2840_v37 = vpop.permute.xlu0 %2839 }
 0x301   : > { %v2825_v52 = vadd.f32 %v2821_v23, %v2770_v51  ;;  %v6301_v5 = vadd.f32 %v2840_v37, %v2786_v17  ;;  %v2946_v17 = vmul.f32 %v2944_v26, %v5946_v39  ;;  %p3929_p9 = pnand %p3928_p4, %p3922_p1 }
 0x304   : > { %v2842_v15 = vpop.permute.xlu1 %2841  ;;  %v2861_v45 = vpop.permute.xlu0 %2860 }
 0x305   : > { %v2846_v0 = vadd.f32 %v2842_v15, %v2787_v22  ;;  %v6305_v25 = vadd.f32 %v2861_v45, %v2803_v31  ;;  %v3076_v22 = vrot.slane %v6364_v21, 1  ;;  %v3078_v31 = vrot.slane %v3071_v60, 1 }
 0x308   : > { %v2863_v2 = vpop.permute.xlu1 %2862  ;;  %v6308_v7 = vpop.permute.xlu0 %2881 }
 0x309   : > { %v2867_v27 = vadd.f32 %v2863_v2, %v2804_v8  ;;  %v3079_v2 = vsel %vm445_vm0, %v3076_v22, %v3078_v31  ;;  %v2933_v31 = vmul.f32 %v2932_v55, %v5918_v18 }
 0x30c   : > { %v2884_v29 = vpop.permute.xlu1 %2883  ;;  %v6310_v44 = vpop.permute.xlu0 %2902 }
 0x30d   : > { %v2888_v32 = vadd.f32 %v2884_v29, %v2825_v52 }
 0x30f   : > { %v2936_v54 = vadd.f32 %v2934_v50, %v2888_v32 }
 0x310   : > { %v2905_v47 = vpop.permute.xlu1 %2904  ;;  %v6312_v12 = vpop.permute.xlu0 %2923 }
 0x311   : > { %v2909_v49 = vadd.f32 %v2905_v47, %v2846_v0 }
 0x313   : > { %v2942_v14 = vadd.f32 %v2940_v19, %v2909_v49  ;;  %v6390_v49 = vstv %s3736_s23 }
 0x314   : > { %v2926_v13 = vpop.permute.xlu1 %2925  ;;  %v6314_v20 = vpop.permute.xlu0 %2955 }
 0x315   : > { %v2930_v59 = vadd.f32 %v2926_v13, %v2867_v27 }
 0x317   : > { %v2948_v30 = vadd.f32 %v2946_v17, %v2930_v59 }
 0x318   : > { %v2958_v62 = vpop.permute.xlu1 %2957  ;;  %v6318_v42 = vpop.permute.xlu0 %2969 }
 0x319   : > { %v2962_v61 = vadd.f32 %v2958_v62, %v2936_v54  ;;  %v6394_v54 = vmul.f32 %v6390_v49, %v5946_v39 }
 0x31c   : > { %v2972_v41 = vpop.permute.xlu1 %2971  ;;  %v6324_v1 = vpop.permute.xlu0 %2983 }
 0x31d   : > { %v2976_v51 = vadd.f32 %v2972_v41, %v2942_v14  ;;  %v3211_v41 = vstv %s3735_s17 }
 0x31e   : > { %v6387_v32 = vmul.f32 %v3211_v41, %v5946_v39  ;;  %v3214_v57 = vmul.f32 %v3211_v41, %v6041_v48 }
 0x320   : > { %v2986_v46 = vpop.permute.xlu1 %2985  ;;  %v6338_v3 = vpop.permute.xlu0 %2997  ;;  %v3219_v16 = vrot.slane %v6387_v32, 2  ;;  %v3221_v38 = vrot.slane %v3214_v57, 2  ;;  %v2939_v57 = vmul.f32 %v2938_v35, %v5918_v18 }
 0x321   : > { %v2990_v15 = vadd.f32 %v2986_v46, %v2948_v30 }
 0x322   : > { %v3222_v58 = vsel %vm653_vm1, %v3219_v16, %v3221_v38 }
 0x324   : > { %v3000_v56 = vpop.permute.xlu1 %2999  ;;  %v6354_v24 = vpop.permute.xlu0 %3011 }
 0x325   : > { %v3004_v63 = vadd.f32 %v3000_v56, %v2962_v61  ;;  %v3231_v61 = vmul.f32 %v6390_v49, %v6041_v48 }
 0x327   : > { %v3049_v23 = vadd.f32 %v3045_v43, %v3004_v63  ;;  %v3236_v63 = vrot.slane %v6394_v54, 2  ;;  %v6402_v43 = vstv %s3737_s8  ;;  %v3238_v60 = vrot.slane %v3231_v61, 2 }
 0x328   : > { %v3014_v37 = vpop.permute.xlu1 %3013  ;;  %v6371_v52 = vpop.permute.xlu0 %3025  ;;  %v3248_v17 = vmul.f32 %v6402_v43, %v6041_v48 }
 0x329   : > { %v3018_v6 = vadd.f32 %v3014_v37, %v2976_v51  ;;  %v6409_v51 = vmul.f32 %v6402_v43, %v5946_v39  ;;  %v3239_v39 = vsel %vm653_vm1, %v3236_v63, %v3238_v60 }
 0x32a   : > { %v3255_v48 = vrot.slane %v3248_v17, 2  ;;  %v3069_v17 = vmul.f32 %v6356_v9, %v5918_v18  ;;  %v3229_v9 = vmul.f32 %v6390_v49, %v5918_v18  ;;  %v3246_v49 = vmul.f32 %v6402_v43, %v5918_v18 }
 0x32b   : > { %v3066_v45 = vadd.f32 %v3062_v28, %v3018_v6 }
 0x32c   : > { %v3028_v0 = vpop.permute.xlu1 %3027  ;;  %v6377_v10 = vpop.permute.xlu0 %3097 }
 0x32d   : > { %v3032_v8 = vadd.f32 %v3028_v0, %v2990_v15  ;;  %v3253_v0 = vrot.slane %v6409_v51, 2 }
 0x32f   : > { %v3083_v27 = vadd.f32 %v3079_v2, %v3032_v8  ;;  %v3035_v2 = vmul.f32 %v6326_v34, %v5918_v18 }
 0x330   : > { %v3100_v29 = vpop.permute.xlu1 %3099  ;;  %v6382_v47 = vpop.permute.xlu0 %3118 }
 0x331   : > { %v3104_v19 = vadd.f32 %v3100_v29, %v3049_v23  ;;  %v2887_v23 = vadd.f32 %v6308_v7, %v6296_v11  ;;  %v2908_v11 = vadd.f32 %v6310_v44, %v6301_v5  ;;  %v3256_v5 = vsel %vm653_vm1, %v3253_v0, %v3255_v48 }
 0x332   : > { %v2929_v44 = vadd.f32 %v6312_v12, %v6305_v25  ;;  %v3041_v61 = vrot.slane %v3035_v2, 1  ;;  %v3235_v48 = vrot.slane %v3229_v9, 2 }
 0x333   : > { %v2935_v7 = vadd.f32 %v2933_v31, %v2887_v23  ;;  %v3075_v31 = vrot.slane %v3069_v17, 1 }
 0x334   : > { %v3121_v13 = vpop.permute.xlu1 %3120  ;;  %v6384_v62 = vpop.permute.xlu0 %3139  ;;  %v3043_v25 = vsel %vm445_vm0, %v3041_v61, %v3042_v36 }
 0x335   : > { %v3125_v37 = vadd.f32 %v3121_v13, %v3066_v45  ;;  %v2961_v13 = vadd.f32 %v6314_v20, %v2935_v7  ;;  %v3052_v20 = vmul.f32 %v6340_v4, %v5918_v18  ;;  %v3212_v4 = vmul.f32 %v3211_v41, %v5918_v18 }
 0x336   : > { %v3077_v53 = vsel %vm445_vm0, %v3075_v31, %v3076_v22  ;;  %v3237_v22 = vsel %vm653_vm1, %v3235_v48, %v3236_v63 }
 0x337   : > { %v3058_v60 = vrot.slane %v3052_v20, 1 }
 0x338   : > { %v3142_v50 = vpop.permute.xlu1 %3141  ;;  %v3161_v46 = vpop.permute.xlu0 %3160 }
 0x339   : > { %v3146_v45 = vadd.f32 %v3142_v50, %v3083_v27  ;;  %v2941_v27 = vadd.f32 %v2939_v57, %v2908_v11  ;;  %v3003_v50 = vadd.f32 %v6338_v3, %v2961_v13  ;;  %v3060_v33 = vsel %vm445_vm0, %v3058_v60, %v3059_v40 }
 0x33b   : > { %v2975_v35 = vadd.f32 %v6318_v42, %v2941_v27 }
 0x33c   : > { %v3163_v56 = vpop.permute.xlu1 %3162  ;;  %v6399_v59 = vpop.permute.xlu0 %3181 }
 0x33d   : > { %v3167_v14 = vadd.f32 %v3163_v56, %v3104_v19  ;;  %v3017_v3 = vadd.f32 %v6354_v24, %v2975_v35 }
 0x33f   : > { %v6415_v30 = vadd.f32 %v3222_v58, %v3167_v14  ;;  %v2945_v14 = vmul.f32 %v2944_v26, %v5918_v18  ;;  %v3048_v58 = vadd.f32 %v3043_v25, %v3003_v50  ;;  %v3065_v24 = vadd.f32 %v3060_v33, %v3017_v3 }
 0x340   : > { %v3184_v6 = vpop.permute.xlu1 %3183  ;;  %v3203_v28 = vpop.permute.xlu0 %3202 }
 0x341   : > { %v3188_v15 = vadd.f32 %v3184_v6, %v3125_v37  ;;  %v2947_v12 = vadd.f32 %v2945_v14, %v2929_v44  ;;  %v3103_v26 = vadd.f32 %v6377_v10, %v3048_v58 }
 0x343   : > { %v6426_v8 = vadd.f32 %v3239_v39, %v3188_v15  ;;  %v2989_v42 = vadd.f32 %v6324_v1, %v2947_v12  ;;  %v3166_v6 = vadd.f32 %v3161_v46, %v3103_v26  ;;  %v3218_v15 = vrot.slane %v3212_v4, 2 }
 0x344   : > { %v3205_v55 = vpop.permute.xlu1 %3204  ;;  %v3275_v29 = vpop.permute.xlu0 %3274  ;;  %v3124_v1 = vadd.f32 %v6382_v47, %v3065_v24 }
 0x345   : > { %v3209_v38 = vadd.f32 %v3205_v55, %v3146_v45  ;;  %v3031_v36 = vadd.f32 %v6371_v52, %v2989_v42  ;;  %v3220_v40 = vsel %vm653_vm1, %v3218_v15, %v3219_v16 }
 0x346   : > { %v3187_v10 = vadd.f32 %v6399_v59, %v3124_v1  ;;  %v3225_v46 = vadd.f32 %v3220_v40, %v3166_v6  ;;  %v3252_v59 = vrot.slane %v3246_v49, 2 }
 0x347   : > { %v6440_v34 = vadd.f32 %v3256_v5, %v3209_v38  ;;  %v3082_v52 = vadd.f32 %v3077_v53, %v3031_v36 }
 0x348   : > { %v3277_v19 = vpop.permute.xlu1 %3276  ;;  %v3296_v56 = vpop.permute.xlu0 %3295  ;;  %v3280_v21 = vadd.f32 %v3275_v29, %v3225_v46  ;;  %v3242_v16 = vadd.f32 %v3237_v22, %v3187_v10 }
 0x349   : > { %v3145_v47 = vadd.f32 %v6384_v62, %v3082_v52  ;;  %v3281_v18 = vadd.f32 %v3277_v19, %v6415_v30  ;;  %v3254_v62 = vsel %vm653_vm1, %v3252_v59, %v3253_v0 }
 0x34a   : > { %v3301_v43 = vadd.f32 %v3296_v56, %v3242_v16 }
 0x34b   : > { %v3208_v32 = vadd.f32 %v3203_v28, %v3145_v47 }
 0x34c   : > { %v3298_v23 = vpop.permute.xlu1 %3297  ;;  %v3317_v37 = vpop.permute.xlu0 %3316 }
 0x34d   : > { %v3259_v29 = vadd.f32 %v3254_v62, %v3208_v32  ;;  %v3302_v38 = vadd.f32 %v3298_v23, %v6426_v8 }
 0x34f   : > { %v3322_v5 = vadd.f32 %v3317_v37, %v3259_v29 }
 0x350   : > { %v3319_v41 = vpop.permute.xlu1 %3318  ;;  %v3338_v39 = vpop.permute.xlu0 %3337 }
 0x351   : > { %v3343_v45 = vadd.f32 %v3338_v39, %v3280_v21  ;;  %v3323_v20 = vadd.f32 %v3319_v41, %v6440_v34 }
 0x353   : > { %v3387_v13 = vmax.f32 %v3343_v45, 0.0 }
 0x354   : > { %v3340_v11 = vpop.permute.xlu1 %3339  ;;  %v3359_v7 = vpop.permute.xlu0 %3358 }
 0x355   : > { %v3344_v54 = vadd.f32 %v3340_v11, %v3281_v18  ;;  %v3364_v57 = vadd.f32 %v3359_v7, %v3301_v43 }
 0x357   : > { %v3388_v27 = vmax.f32 %v3344_v54, 0.0  ;;  %v3408_v50 = vmax.f32 %v3364_v57, 0.0 }
 0x358   : > { %v3361_v2 = vpop.permute.xlu1 %3360  ;;  %v3380_v55 = vpop.permute.xlu0 %3379 }
 0x359   : > { %v3365_v61 = vadd.f32 %v3361_v2, %v3302_v38  ;;  %v3385_v30 = vadd.f32 %v3380_v55, %v3322_v5 }
 0x35b   : > { %v3409_v35 = vmax.f32 %v3365_v61, 0.0  ;;  %v3429_v14 = vmax.f32 %v3385_v30, 0.0 }
 0x35c   : > { %v3382_v63 = vpop.permute.xlu1 %3381  ;;  %v3398_v28 = vpop.permute.xlu0 %3397 }
 0x35d   : > { %v3403_v44 = vadd.f32 %v3398_v28, %v3387_v13  ;;  %v3386_v25 = vadd.f32 %v3382_v63, %v3323_v20 }
 0x35f   : > { %3406 = vst.msk [vmem:[%s269_s13] sm:$0xff] %vm3405_vm11, %v3403_v44  ;;  %v3430_v60 = vmax.f32 %v3386_v25, 0.0 }
 0x360   : > { %v3400_v51 = vpop.permute.xlu1 %3399  ;;  %v3419_v0 = vpop.permute.xlu0 %3418 }
 0x361   : > { %v3404_v19 = vadd.f32 %v3400_v51, %v3388_v27  ;;  %v3424_v56 = vadd.f32 %v3419_v0, %v3408_v50 }
 0x363   : > { %3407 = vst.msk [vmem:[%s269_s13 + $0x8] sm:$0xff] %vm3405_vm11, %v3404_v19  ;;  %3744 = vst.msk [vmem:[%s269_s13 + $0x10] sm:$0xff] %vm3405_vm11, %v3424_v56 }
 0x364   : > { %v3421_v8 = vpop.permute.xlu1 %3420  ;;  %v3440_v12 = vpop.permute.xlu0 %3439 }
 0x365   : > { %v3425_v3 = vadd.f32 %v3421_v8, %v3409_v35  ;;  %v3445_v58 = vadd.f32 %v3440_v12, %v3429_v14 }
 0x367   : > { %3745 = vst.msk [vmem:[%s269_s13 + $0x18] sm:$0xff] %vm3405_vm11, %v3425_v3  ;;  %3746 = vst.msk [vmem:[%s269_s13 + $0x20] sm:$0xff] %vm3405_vm11, %v3445_v58 }
 0x368   : > { %v3442_v34 = vpop.permute.xlu1 %3441 }
 0x369   : > { %v3446_v17 = vadd.f32 %v3442_v34, %v3430_v60 }
 0x36b   : > { %3747 = vst.msk [vmem:[%s269_s13 + $0x28] sm:$0xff] %vm3405_vm11, %v3446_v17 }
 0x36c   : > { %3932 = shalt.err (!%p3929_p9)
}
 0x36d   : > { %s3933_s2 = scalar_lea.hbm %s6497_s6, 768  ;;  %s3937_s15 = scalar_lea.hbm %s6547_s5, 1536 }
 0x36e   : > { %p3934_p7 = scmp.ne.s32.totalorder %s6497_s6, %s3933_s2  ;;  %p3938_p6 = scmp.lt.s32.totalorder %s6497_s6, %s6547_s5 }
 0x36f   : > { %p3939_p12 = scmp.lt.s32.totalorder %s3937_s15, %s3933_s2 }
 0x370   : > { %p3935_p0 = pnand %p3934_p7, %p6781_p11 }
 0x371   : > { %p3940_p10 = por %p3939_p12, %p3938_p6 }
 0x372   : > { %p3936_p5 = pneg %p3935_p0 }
 0x374   : > { %p3941_p8 = pnand %p3940_p10, %p3936_p5 }
 0x376   : > { %3944 = shalt.err (!%p3941_p8)
}
 0x377   : > { %s4000_s8 = smov 128   ;;  %s4001_s9 = smov 8  }
 0x378   : > { %3770 = dma.vmem_to_hbm [thread:$0]  (%p6781_p11), %s6492_s14, 768, %s6497_s6, %s6502_s22, %s4000_s8, %s4000_s8, %s4001_s9  }
 0x379 PF: > { %p3797_p13 = scmp.ge.s32.totalorder %s3991_s21, 2  ;;  %s3479_s10 = sand.u32 1, %s3979_s18  }
 0x37a   : > { %p6782_p1 = scmp.ne.s32.totalorder %s6563_s29, 0  ;;  %s3480_s13 = scalar_lea.sflag [#allocation3], %s3479_s10 }
 0x37c   : > { %p3786_p2 = pnand %p3797_p13, %p6782_p1 }
 0x37e   : > { %p3787_p3 = pneg %p3786_p2 }
 0x380   : > { %3974 = dma.done.wait (%p3787_p3), %s3480_s13, 768  }
 0x381   : > { %3976 = vsyncadd (%p3787_p3), %s3480_s13, 4294966528  ;;  %p18_p4 = scmp.ge.s32.totalorder %s4057_s24, 4   ;;  %s6783_s18 = smov %s3983_s19 }
 0x382   : > { %s6784_s19 = smov %s3987_s20  ;;  %s6785_s20 = smov %s4068_s27 }
 0x383   : > { %s6786_s21 = smov %s4057_s24  ;;  %20 = sbr.rel (!%p18_p4) target bundleno = 10 (0xa), region = 94 }
 0x388   :  { %3485 = vsyncpa [#allocation3], 1 }
 0x389   :  { %3487 = vsyncpa [#allocation3 + $0x1], 1 }
 0x38a   :  { %3488 = vsyncpa [#allocation4], 1 }
 0x38b   :  { %3490 = vsyncpa [#allocation4 + $0x1], 1 }
 0x38c   :  { %3491 = vsyncpa [#allocation6], 1 }
 0x38d   :  { %3492 = vsyncpa [#allocation9], 1 }

</bundles_post_ra>
